<compile_context>
chip_gen: v7x
topology: tpu7x:2x2x1
jax: 0.10.0
libtpu: 0.0.40
codegen_flags: <defaults>
</compile_context>

<pallas_src>
import functools
import math

import numpy as np
import jax
import jax.numpy as jnp
from jax.experimental import pallas as pl
from jax.experimental.pallas import tpu as pltpu

BT = 32              # samples per grid step (multiple of 8 == sublane group)
C1, C2 = 16, 32      # conv channel counts
HALF1 = 256          # one w-parity half of conv1 output lanes (14*16 -> padded 256)
HALF2 = 256          # one w-parity half of conv2 output lanes (7*32  -> padded 256)
N1 = 2 * HALF1
N2 = 2 * HALF2
K1 = 96              # merged conv1 contraction: 3 kh taps x 32-lane padded width
FC_H = 128


# ---------------------------------------------------------------- fused kernel
def _cnn_kernel(x_ref, t1_ref, b1_ref, w2_ref, b2_ref, w3_ref, b3_ref,
                w4_ref, b4_ref, o_ref):
    f32 = jnp.float32
    bf16 = jnp.bfloat16

    # ---- conv1 (1->16, 3x3, pad=1): ONE merged K=96 bf16 MXU matmul --------------
    # x rows are (out_h*BT + sample); lanes are (kh*32 + padded_w).
    acc1 = jnp.dot(x_ref[0], t1_ref[...], preferred_element_type=f32)   # [28*BT, 512]

    # ---- maxpool 2x2 #1, then bias + ReLU (hoisted past the pool; exact) ---------
    # h-halving: vreg-block max of even/odd BT-row groups; w-halving: max of lane halves.
    a1 = acc1.reshape(14, 2 * BT, N1)
    hmax1 = jnp.maximum(a1[:, :BT, :], a1[:, BT:, :]).reshape(14 * BT, N1)
    p1 = jnp.maximum(jnp.maximum(hmax1[:, :HALF1], hmax1[:, HALF1:]) + b1_ref[...], 0.0)
    p1b = p1.astype(bf16)                                               # [14*BT, 256]

    # ---- conv2 (16->32, 3x3, pad=1): h zero-pad via shortened-row matmuls --------
    zrow = jnp.zeros((BT, N2), f32)
    acc2 = jnp.dot(p1b, w2_ref[1], preferred_element_type=f32)          # kh = 1
    acc2 = acc2 + jnp.concatenate(
        [zrow, jnp.dot(p1b[:13 * BT, :], w2_ref[0], preferred_element_type=f32)], axis=0)
    acc2 = acc2 + jnp.concatenate(
        [jnp.dot(p1b[BT:, :], w2_ref[2], preferred_element_type=f32), zrow], axis=0)

    # ---- maxpool 2x2 #2, then bias + ReLU ----------------------------------------
    a2 = acc2.reshape(7, 2 * BT, N2)
    hmax2 = jnp.maximum(a2[:, :BT, :], a2[:, BT:, :]).reshape(7 * BT, N2)
    p2 = jnp.maximum(jnp.maximum(hmax2[:, :HALF2], hmax2[:, HALF2:]) + b2_ref[...], 0.0)
    p2b = p2.astype(bf16)                                               # [7*BT, 256]

    # ---- fc1 (1568->128) + ReLU: 7 accumulated K=256 bf16 dots -------------------
    acc3 = jnp.dot(p2b[0:BT, :], w3_ref[0], preferred_element_type=f32)
    for h in range(1, 7):
        acc3 = acc3 + jnp.dot(p2b[h * BT:(h + 1) * BT, :], w3_ref[h],
                              preferred_element_type=f32)
    h3 = jnp.maximum(acc3 + b3_ref[...], 0.0)                           # [BT, 128]

    # ---- fc2 (128 -> num_classes padded to 128): lane-dense unmasked HBM store ---
    o_ref[...] = jnp.dot(h3.astype(bf16), w4_ref[...],
                         preferred_element_type=f32) + b4_ref[...]


# ---------------------------------------------------------------- wrapper
@functools.partial(jax.jit, static_argnums=(2,))
def simple_char_cnn_forward(x_nchw, packed, num_classes):
    (t1, b1p, w2b, b2p, w3p, b3p, w4p, b4p) = packed
    B = x_nchw.shape[0]
    nb = -(-B // BT)
    Bp = nb * BT

    # Wrapper-side layout plumbing only (tiny tensors): squeeze channel, zero-pad H to 30
    # and W to 32, lane-concat the 3 h-shifted windows (merged conv1 K=96), cast bf16, and
    # arrange rows as (out_h * BT + sample-in-tile).
    x = x_nchw[:, 0]
    x = jnp.pad(x, ((0, Bp - B), (1, 1), (1, 3)))                       # [Bp, 30, 32]
    xw = jnp.stack([x[:, 0:28], x[:, 1:29], x[:, 2:30]], axis=2)        # [Bp, 28, 3, 32]
    xw = xw.reshape(Bp, 28, K1).astype(jnp.bfloat16)
    xw = xw.reshape(nb, BT, 28, K1).transpose(0, 2, 1, 3).reshape(nb, 28 * BT, K1)

    out = pl.pallas_call(
        _cnn_kernel,
        out_shape=jax.ShapeDtypeStruct((Bp, FC_H), jnp.float32),
        grid_spec=pltpu.PrefetchScalarGridSpec(
            num_scalar_prefetch=0,
            grid=(nb,),
            in_specs=[
                pl.BlockSpec((1, 28 * BT, K1), lambda i: (i, 0, 0)),    # x (merged windows)
                pl.BlockSpec((K1, N1), lambda i: (0, 0)),               # conv1 merged Toeplitz
                pl.BlockSpec((1, HALF1), lambda i: (0, 0)),             # conv1 pooled bias
                pl.BlockSpec((3, HALF1, N2), lambda i: (0, 0, 0)),      # conv2 banded
                pl.BlockSpec((1, HALF2), lambda i: (0, 0)),             # conv2 pooled bias
                pl.BlockSpec((7, HALF2, FC_H), lambda i: (0, 0, 0)),    # fc1 (permuted)
                pl.BlockSpec((1, FC_H), lambda i: (0, 0)),              # fc1 bias
                pl.BlockSpec((FC_H, FC_H), lambda i: (0, 0)),           # fc2 (padded)
                pl.BlockSpec((1, FC_H), lambda i: (0, 0)),              # fc2 bias
            ],
            out_specs=pl.BlockSpec((BT, FC_H), lambda i: (i, 0)),
        ),
        compiler_params=pltpu.CompilerParams(
            dimension_semantics=("parallel",),
            vmem_limit_bytes=48 * 1024 * 1024),
    )(xw, t1, b1p, w2b, b2p, w3p, b3p, w4p, b4p)

    return out[:B, :num_classes]


# ---------------------------------------------------------------- params
def init_params(key, num_classes):
    """Torch-like uniform(-1/sqrt(fan_in), 1/sqrt(fan_in)) init, torch layouts."""
    ks = jax.random.split(key, 8)

    def u(k, shape, fan_in):
        b = 1.0 / math.sqrt(fan_in)
        return jax.random.uniform(k, shape, jnp.float32, -b, b)

    return dict(
        w1=u(ks[0], (C1, 1, 3, 3), 9), b1=u(ks[1], (C1,), 9),
        w2=u(ks[2], (C2, C1, 3, 3), 9 * C1), b2=u(ks[3], (C2,), 9 * C1),
        w3=u(ks[4], (FC_H, C2 * 7 * 7), C2 * 7 * 7), b3=u(ks[5], (FC_H,), C2 * 7 * 7),
        w4=u(ks[6], (num_classes, FC_H), FC_H), b4=u(ks[7], (num_classes,), FC_H),
    )


def pack_params(params, num_classes):
    """Host-side (one-time) repacking of torch-layout weights into the structured
    matrices the fused kernel multiplies with.  Forward is mathematically identical
    up to bf16 rounding of the MXU operands (accumulation stays f32)."""
    assert num_classes <= FC_H
    # TODO(synk): num_classes > 128 would need lane-tiling of the final matmul.
    w1 = np.asarray(params["w1"], np.float32); b1 = np.asarray(params["b1"], np.float32)
    w2 = np.asarray(params["w2"], np.float32); b2 = np.asarray(params["b2"], np.float32)
    w3 = np.asarray(params["w3"], np.float32); b3 = np.asarray(params["b3"], np.float32)
    w4 = np.asarray(params["w4"], np.float32); b4 = np.asarray(params["b4"], np.float32)

    # conv1 -> single merged block-Toeplitz right-multiply.
    # LHS lane = kh*32 + padded_w ; output lane = (w%2)*256 + (w//2)*16 + c.
    t1 = np.zeros((K1, N1), np.float32)
    for w in range(28):
        L0 = (w % 2) * HALF1 + (w // 2) * C1
        for kh in range(3):
            for kw in range(3):
                t1[kh * 32 + (w + kw), L0:L0 + C1] = w1[:, 0, kh, kw]

    # pooled conv1 bias (identical across each 2x2 window and both w-parity halves).
    b1p = np.zeros((1, HALF1), np.float32)
    for wp in range(14):
        b1p[0, wp * C1:wp * C1 + C1] = b1

    # conv2 -> 3 block-banded right-multiplies; input lane = w*16 + c1,
    # output lane = (w'%2)*256 + (w'//2)*32 + c2 (w boundaries encoded as zero blocks).
    w2b = np.zeros((3, HALF1, N2), np.float32)
    for wp in range(14):
        Lo = (wp % 2) * HALF2 + (wp // 2) * C2
        for kw in range(3):
            w = wp + kw - 1
            if 0 <= w < 14:
                Li = w * C1
                for kh in range(3):
                    w2b[kh, Li:Li + C1, Lo:Lo + C2] = w2[:, :, kh, kw].T

    # pooled conv2 bias.
    b2p = np.zeros((1, HALF2), np.float32)
    for wp in range(7):
        b2p[0, wp * C2:wp * C2 + C2] = b2

    # fc1 rows permuted so the kernel's (h, w*32+c2) layout matches torch's NCHW flatten.
    w3p = np.zeros((7, HALF2, FC_H), np.float32)
    for h in range(7):
        for w in range(7):
            for c in range(C2):
                w3p[h, w * C2 + c, :] = w3[:, c * 49 + h * 7 + w]
    b3p = b3.reshape(1, FC_H)

    # fc2 padded to 128 output lanes (extra lanes are zero, sliced off in the wrapper).
    w4p = np.zeros((FC_H, FC_H), np.float32)
    w4p[:, :num_classes] = w4.T
    b4p = np.zeros((1, FC_H), np.float32)
    b4p[0, :num_classes] = b4

    # Matmul operands feed the MXU as bf16; biases stay f32 (added in f32 epilogues).
    return (jnp.asarray(t1, jnp.bfloat16), jnp.asarray(b1p, jnp.float32),
            jnp.asarray(w2b, jnp.bfloat16), jnp.asarray(b2p, jnp.float32),
            jnp.asarray(w3p, jnp.bfloat16), jnp.asarray(b3p, jnp.float32),
            jnp.asarray(w4p, jnp.bfloat16), jnp.asarray(b4p, jnp.float32))


# ---------------------------------------------------------------- pure-JAX reference
def _reference_forward(x_nchw, params):
    dn = ("NCHW", "OIHW", "NCHW")
    hi = jax.lax.Precision.HIGHEST
    h = jax.lax.conv_general_dilated(x_nchw, params["w1"], (1, 1), ((1, 1), (1, 1)),
                                     dimension_numbers=dn, precision=hi)
    h = jax.nn.relu(h + params["b1"][None, :, None, None])
    h = jax.lax.reduce_window(h, -jnp.inf, jax.lax.max, (1, 1, 2, 2), (1, 1, 2, 2), "VALID")
    h = jax.lax.conv_general_dilated(h, params["w2"], (1, 1), ((1, 1), (1, 1)),
                                     dimension_numbers=dn, precision=hi)
    h = jax.nn.relu(h + params["b2"][None, :, None, None])
    h = jax.lax.reduce_window(h, -jnp.inf, jax.lax.max, (1, 1, 2, 2), (1, 1, 2, 2), "VALID")
    f = h.reshape(h.shape[0], -1)
    h = jax.nn.relu(jnp.dot(f, params["w3"].T, precision=hi) + params["b3"])
    return jnp.dot(h, params["w4"].T, precision=hi) + params["b4"]


if __name__ == "__main__":
    num_classes = 10
    key = jax.random.PRNGKey(0)
    pkey, xkey = jax.random.split(key)
    params = init_params(pkey, num_classes)
    packed = pack_params(params, num_classes)

    x = jax.random.normal(xkey, (2, 1, 28, 28), jnp.float32)

    out = simple_char_cnn_forward(x, packed, num_classes)
    out = jax.block_until_ready(out)
    assert out.shape == (2, num_classes) and out.dtype == jnp.float32

    ref = jax.block_until_ready(_reference_forward(x, params))
    np.testing.assert_allclose(np.asarray(out), np.asarray(ref), rtol=5e-2, atol=5e-2)

    print("KERNEL_OK")
</pallas_src>

<mosaic_0001>
module attributes {stable_mosaic.version = 11 : i64} {
  func.func @_cnn_kernel(%arg0: i32, %arg1: memref<1x896x96xbf16, #tpu.memory_space<vmem>>, %arg2: memref<96x512xbf16, #tpu.memory_space<vmem>>, %arg3: memref<1x256xf32, #tpu.memory_space<vmem>>, %arg4: memref<3x256x512xbf16, #tpu.memory_space<vmem>>, %arg5: memref<1x256xf32, #tpu.memory_space<vmem>>, %arg6: memref<7x256x128xbf16, #tpu.memory_space<vmem>>, %arg7: memref<1x128xf32, #tpu.memory_space<vmem>>, %arg8: memref<128x128xbf16, #tpu.memory_space<vmem>>, %arg9: memref<1x128xf32, #tpu.memory_space<vmem>>, %arg10: memref<32x128xf32, #tpu.memory_space<vmem>>) attributes {dimension_semantics = [#tpu.dimension_semantics<parallel>], iteration_bounds = array<i64: 1>, scalar_prefetch = 0 : i64, scratch_operands = 0 : i64, tpu.core_type = #tpu.core_type<tc>, window_params = [{transform_indices = @transform_0, window_bounds = array<i64: 1, 896, 96>}, {pipeline_mode = #tpu.pipeline_mode<synchronous>, transform_indices = @transform_1, window_bounds = array<i64: 96, 512>}, {pipeline_mode = #tpu.pipeline_mode<synchronous>, transform_indices = @transform_2, window_bounds = array<i64: 1, 256>}, {pipeline_mode = #tpu.pipeline_mode<synchronous>, transform_indices = @transform_3, window_bounds = array<i64: 3, 256, 512>}, {pipeline_mode = #tpu.pipeline_mode<synchronous>, transform_indices = @transform_4, window_bounds = array<i64: 1, 256>}, {pipeline_mode = #tpu.pipeline_mode<synchronous>, transform_indices = @transform_5, window_bounds = array<i64: 7, 256, 128>}, {pipeline_mode = #tpu.pipeline_mode<synchronous>, transform_indices = @transform_6, window_bounds = array<i64: 1, 128>}, {pipeline_mode = #tpu.pipeline_mode<synchronous>, transform_indices = @transform_7, window_bounds = array<i64: 128, 128>}, {pipeline_mode = #tpu.pipeline_mode<synchronous>, transform_indices = @transform_8, window_bounds = array<i64: 1, 128>}, {transform_indices = @transform_9, window_bounds = array<i64: 32, 128>}]} {
    %c0 = arith.constant 0 : index
    %c0_0 = arith.constant 0 : index
    %c0_1 = arith.constant 0 : index
    %0 = vector.load %arg1[%c0, %c0_0, %c0_1] : memref<1x896x96xbf16, #tpu.memory_space<vmem>>, vector<1x896x96xbf16>
    %1 = vector.shape_cast %0 : vector<1x896x96xbf16> to vector<896x96xbf16>
    %c0_2 = arith.constant 0 : index
    %c0_3 = arith.constant 0 : index
    %2 = vector.load %arg2[%c0_2, %c0_3] : memref<96x512xbf16, #tpu.memory_space<vmem>>, vector<96x512xbf16>
    %cst = arith.constant dense<0.000000e+00> : vector<896x512xf32>
    %3 = tpu.matmul %1, %2, %cst {dimension_numbers = #tpu.dot_dimension_numbers<[1], [0], [0], [1], [0, 0, 1, 1], [], []>} : vector<896x96xbf16>, vector<96x512xbf16>, vector<896x512xf32> -> vector<896x512xf32>
    %4 = vector.shape_cast %3 : vector<896x512xf32> to vector<14x64x512xf32>
    %5 = vector.extract_strided_slice %4 {offsets = [0, 0, 0], sizes = [14, 32, 512], strides = [1, 1, 1]} : vector<14x64x512xf32> to vector<14x32x512xf32>
    %6 = vector.extract_strided_slice %4 {offsets = [0, 32, 0], sizes = [14, 32, 512], strides = [1, 1, 1]} : vector<14x64x512xf32> to vector<14x32x512xf32>
    %7 = arith.maximumf %5, %6 : vector<14x32x512xf32>
    %8 = vector.shape_cast %7 : vector<14x32x512xf32> to vector<448x512xf32>
    %9 = vector.extract_strided_slice %8 {offsets = [0, 0], sizes = [448, 256], strides = [1, 1]} : vector<448x512xf32> to vector<448x256xf32>
    %10 = vector.extract_strided_slice %8 {offsets = [0, 256], sizes = [448, 256], strides = [1, 1]} : vector<448x512xf32> to vector<448x256xf32>
    %11 = arith.maximumf %9, %10 : vector<448x256xf32>
    %c0_4 = arith.constant 0 : index
    %c0_5 = arith.constant 0 : index
    %12 = vector.load %arg3[%c0_4, %c0_5] : memref<1x256xf32, #tpu.memory_space<vmem>>, vector<1x256xf32>
    %13 = vector.broadcast %12 : vector<1x256xf32> to vector<448x256xf32>
    %14 = arith.addf %11, %13 : vector<448x256xf32>
    %cst_6 = arith.constant 0.000000e+00 : f32
    %15 = vector.broadcast %cst_6 : f32 to vector<448x256xf32>
    %16 = arith.maximumf %14, %15 : vector<448x256xf32>
    %17 = arith.truncf %16 : vector<448x256xf32> to vector<448x256xbf16>
    %cst_7 = arith.constant 0.000000e+00 : f32
    %18 = vector.broadcast %cst_7 : f32 to vector<32x512xf32>
    %c1 = arith.constant 1 : index
    %c0_8 = arith.constant 0 : index
    %c0_9 = arith.constant 0 : index
    %19 = vector.load %arg4[%c1, %c0_8, %c0_9] : memref<3x256x512xbf16, #tpu.memory_space<vmem>>, vector<1x256x512xbf16>
    %20 = vector.shape_cast %19 : vector<1x256x512xbf16> to vector<256x512xbf16>
    %cst_10 = arith.constant dense<0.000000e+00> : vector<448x512xf32>
    %21 = tpu.matmul %17, %20, %cst_10 {dimension_numbers = #tpu.dot_dimension_numbers<[1], [0], [0], [1], [0, 0, 1, 1], [], []>} : vector<448x256xbf16>, vector<256x512xbf16>, vector<448x512xf32> -> vector<448x512xf32>
    %22 = vector.extract_strided_slice %17 {offsets = [0, 0], sizes = [416, 256], strides = [1, 1]} : vector<448x256xbf16> to vector<416x256xbf16>
    %c0_11 = arith.constant 0 : index
    %c0_12 = arith.constant 0 : index
    %c0_13 = arith.constant 0 : index
    %23 = vector.load %arg4[%c0_11, %c0_12, %c0_13] : memref<3x256x512xbf16, #tpu.memory_space<vmem>>, vector<1x256x512xbf16>
    %24 = vector.shape_cast %23 : vector<1x256x512xbf16> to vector<256x512xbf16>
    %cst_14 = arith.constant dense<0.000000e+00> : vector<416x512xf32>
    %25 = tpu.matmul %22, %24, %cst_14 {dimension_numbers = #tpu.dot_dimension_numbers<[1], [0], [0], [1], [0, 0, 1, 1], [], []>} : vector<416x256xbf16>, vector<256x512xbf16>, vector<416x512xf32> -> vector<416x512xf32>
    %26 = tpu.concatenate %18, %25 in 0 : vector<32x512xf32>, vector<416x512xf32> -> vector<448x512xf32>
    %27 = arith.addf %21, %26 : vector<448x512xf32>
    %28 = vector.extract_strided_slice %17 {offsets = [32, 0], sizes = [416, 256], strides = [1, 1]} : vector<448x256xbf16> to vector<416x256xbf16>
    %c2 = arith.constant 2 : index
    %c0_15 = arith.constant 0 : index
    %c0_16 = arith.constant 0 : index
    %29 = vector.load %arg4[%c2, %c0_15, %c0_16] : memref<3x256x512xbf16, #tpu.memory_space<vmem>>, vector<1x256x512xbf16>
    %30 = vector.shape_cast %29 : vector<1x256x512xbf16> to vector<256x512xbf16>
    %cst_17 = arith.constant dense<0.000000e+00> : vector<416x512xf32>
    %31 = tpu.matmul %28, %30, %cst_17 {dimension_numbers = #tpu.dot_dimension_numbers<[1], [0], [0], [1], [0, 0, 1, 1], [], []>} : vector<416x256xbf16>, vector<256x512xbf16>, vector<416x512xf32> -> vector<416x512xf32>
    %32 = tpu.concatenate %31, %18 in 0 : vector<416x512xf32>, vector<32x512xf32> -> vector<448x512xf32>
    %33 = arith.addf %27, %32 : vector<448x512xf32>
    %34 = vector.shape_cast %33 : vector<448x512xf32> to vector<7x64x512xf32>
    %35 = vector.extract_strided_slice %34 {offsets = [0, 0, 0], sizes = [7, 32, 512], strides = [1, 1, 1]} : vector<7x64x512xf32> to vector<7x32x512xf32>
    %36 = vector.extract_strided_slice %34 {offsets = [0, 32, 0], sizes = [7, 32, 512], strides = [1, 1, 1]} : vector<7x64x512xf32> to vector<7x32x512xf32>
    %37 = arith.maximumf %35, %36 : vector<7x32x512xf32>
    %38 = vector.shape_cast %37 : vector<7x32x512xf32> to vector<224x512xf32>
    %39 = vector.extract_strided_slice %38 {offsets = [0, 0], sizes = [224, 256], strides = [1, 1]} : vector<224x512xf32> to vector<224x256xf32>
    %40 = vector.extract_strided_slice %38 {offsets = [0, 256], sizes = [224, 256], strides = [1, 1]} : vector<224x512xf32> to vector<224x256xf32>
    %41 = arith.maximumf %39, %40 : vector<224x256xf32>
    %c0_18 = arith.constant 0 : index
    %c0_19 = arith.constant 0 : index
    %42 = vector.load %arg5[%c0_18, %c0_19] : memref<1x256xf32, #tpu.memory_space<vmem>>, vector<1x256xf32>
    %43 = vector.broadcast %42 : vector<1x256xf32> to vector<224x256xf32>
    %44 = arith.addf %41, %43 : vector<224x256xf32>
    %cst_20 = arith.constant 0.000000e+00 : f32
    %45 = vector.broadcast %cst_20 : f32 to vector<224x256xf32>
    %46 = arith.maximumf %44, %45 : vector<224x256xf32>
    %47 = arith.truncf %46 : vector<224x256xf32> to vector<224x256xbf16>
    %48 = vector.extract_strided_slice %47 {offsets = [0, 0], sizes = [32, 256], strides = [1, 1]} : vector<224x256xbf16> to vector<32x256xbf16>
    %c0_21 = arith.constant 0 : index
    %c0_22 = arith.constant 0 : index
    %c0_23 = arith.constant 0 : index
    %49 = vector.load %arg6[%c0_21, %c0_22, %c0_23] : memref<7x256x128xbf16, #tpu.memory_space<vmem>>, vector<1x256x128xbf16>
    %50 = vector.shape_cast %49 : vector<1x256x128xbf16> to vector<256x128xbf16>
    %cst_24 = arith.constant dense<0.000000e+00> : vector<32x128xf32>
    %51 = tpu.matmul %48, %50, %cst_24 {dimension_numbers = #tpu.dot_dimension_numbers<[1], [0], [0], [1], [0, 0, 1, 1], [], []>} : vector<32x256xbf16>, vector<256x128xbf16>, vector<32x128xf32> -> vector<32x128xf32>
    %52 = vector.extract_strided_slice %47 {offsets = [32, 0], sizes = [32, 256], strides = [1, 1]} : vector<224x256xbf16> to vector<32x256xbf16>
    %c1_25 = arith.constant 1 : index
    %c0_26 = arith.constant 0 : index
    %c0_27 = arith.constant 0 : index
    %53 = vector.load %arg6[%c1_25, %c0_26, %c0_27] : memref<7x256x128xbf16, #tpu.memory_space<vmem>>, vector<1x256x128xbf16>
    %54 = vector.shape_cast %53 : vector<1x256x128xbf16> to vector<256x128xbf16>
    %cst_28 = arith.constant dense<0.000000e+00> : vector<32x128xf32>
    %55 = tpu.matmul %52, %54, %cst_28 {dimension_numbers = #tpu.dot_dimension_numbers<[1], [0], [0], [1], [0, 0, 1, 1], [], []>} : vector<32x256xbf16>, vector<256x128xbf16>, vector<32x128xf32> -> vector<32x128xf32>
    %56 = arith.addf %51, %55 : vector<32x128xf32>
    %57 = vector.extract_strided_slice %47 {offsets = [64, 0], sizes = [32, 256], strides = [1, 1]} : vector<224x256xbf16> to vector<32x256xbf16>
    %c2_29 = arith.constant 2 : index
    %c0_30 = arith.constant 0 : index
    %c0_31 = arith.constant 0 : index
    %58 = vector.load %arg6[%c2_29, %c0_30, %c0_31] : memref<7x256x128xbf16, #tpu.memory_space<vmem>>, vector<1x256x128xbf16>
    %59 = vector.shape_cast %58 : vector<1x256x128xbf16> to vector<256x128xbf16>
    %cst_32 = arith.constant dense<0.000000e+00> : vector<32x128xf32>
    %60 = tpu.matmul %57, %59, %cst_32 {dimension_numbers = #tpu.dot_dimension_numbers<[1], [0], [0], [1], [0, 0, 1, 1], [], []>} : vector<32x256xbf16>, vector<256x128xbf16>, vector<32x128xf32> -> vector<32x128xf32>
    %61 = arith.addf %56, %60 : vector<32x128xf32>
    %62 = vector.extract_strided_slice %47 {offsets = [96, 0], sizes = [32, 256], strides = [1, 1]} : vector<224x256xbf16> to vector<32x256xbf16>
    %c3 = arith.constant 3 : index
    %c0_33 = arith.constant 0 : index
    %c0_34 = arith.constant 0 : index
    %63 = vector.load %arg6[%c3, %c0_33, %c0_34] : memref<7x256x128xbf16, #tpu.memory_space<vmem>>, vector<1x256x128xbf16>
    %64 = vector.shape_cast %63 : vector<1x256x128xbf16> to vector<256x128xbf16>
    %cst_35 = arith.constant dense<0.000000e+00> : vector<32x128xf32>
    %65 = tpu.matmul %62, %64, %cst_35 {dimension_numbers = #tpu.dot_dimension_numbers<[1], [0], [0], [1], [0, 0, 1, 1], [], []>} : vector<32x256xbf16>, vector<256x128xbf16>, vector<32x128xf32> -> vector<32x128xf32>
    %66 = arith.addf %61, %65 : vector<32x128xf32>
    %67 = vector.extract_strided_slice %47 {offsets = [128, 0], sizes = [32, 256], strides = [1, 1]} : vector<224x256xbf16> to vector<32x256xbf16>
    %c4 = arith.constant 4 : index
    %c0_36 = arith.constant 0 : index
    %c0_37 = arith.constant 0 : index
    %68 = vector.load %arg6[%c4, %c0_36, %c0_37] : memref<7x256x128xbf16, #tpu.memory_space<vmem>>, vector<1x256x128xbf16>
    %69 = vector.shape_cast %68 : vector<1x256x128xbf16> to vector<256x128xbf16>
    %cst_38 = arith.constant dense<0.000000e+00> : vector<32x128xf32>
    %70 = tpu.matmul %67, %69, %cst_38 {dimension_numbers = #tpu.dot_dimension_numbers<[1], [0], [0], [1], [0, 0, 1, 1], [], []>} : vector<32x256xbf16>, vector<256x128xbf16>, vector<32x128xf32> -> vector<32x128xf32>
    %71 = arith.addf %66, %70 : vector<32x128xf32>
    %72 = vector.extract_strided_slice %47 {offsets = [160, 0], sizes = [32, 256], strides = [1, 1]} : vector<224x256xbf16> to vector<32x256xbf16>
    %c5 = arith.constant 5 : index
    %c0_39 = arith.constant 0 : index
    %c0_40 = arith.constant 0 : index
    %73 = vector.load %arg6[%c5, %c0_39, %c0_40] : memref<7x256x128xbf16, #tpu.memory_space<vmem>>, vector<1x256x128xbf16>
    %74 = vector.shape_cast %73 : vector<1x256x128xbf16> to vector<256x128xbf16>
    %cst_41 = arith.constant dense<0.000000e+00> : vector<32x128xf32>
    %75 = tpu.matmul %72, %74, %cst_41 {dimension_numbers = #tpu.dot_dimension_numbers<[1], [0], [0], [1], [0, 0, 1, 1], [], []>} : vector<32x256xbf16>, vector<256x128xbf16>, vector<32x128xf32> -> vector<32x128xf32>
    %76 = arith.addf %71, %75 : vector<32x128xf32>
    %77 = vector.extract_strided_slice %47 {offsets = [192, 0], sizes = [32, 256], strides = [1, 1]} : vector<224x256xbf16> to vector<32x256xbf16>
    %c6 = arith.constant 6 : index
    %c0_42 = arith.constant 0 : index
    %c0_43 = arith.constant 0 : index
    %78 = vector.load %arg6[%c6, %c0_42, %c0_43] : memref<7x256x128xbf16, #tpu.memory_space<vmem>>, vector<1x256x128xbf16>
    %79 = vector.shape_cast %78 : vector<1x256x128xbf16> to vector<256x128xbf16>
    %cst_44 = arith.constant dense<0.000000e+00> : vector<32x128xf32>
    %80 = tpu.matmul %77, %79, %cst_44 {dimension_numbers = #tpu.dot_dimension_numbers<[1], [0], [0], [1], [0, 0, 1, 1], [], []>} : vector<32x256xbf16>, vector<256x128xbf16>, vector<32x128xf32> -> vector<32x128xf32>
    %81 = arith.addf %76, %80 : vector<32x128xf32>
    %c0_45 = arith.constant 0 : index
    %c0_46 = arith.constant 0 : index
    %82 = vector.load %arg7[%c0_45, %c0_46] : memref<1x128xf32, #tpu.memory_space<vmem>>, vector<1x128xf32>
    %83 = vector.broadcast %82 : vector<1x128xf32> to vector<32x128xf32>
    %84 = arith.addf %81, %83 : vector<32x128xf32>
    %cst_47 = arith.constant 0.000000e+00 : f32
    %85 = vector.broadcast %cst_47 : f32 to vector<32x128xf32>
    %86 = arith.maximumf %84, %85 : vector<32x128xf32>
    %87 = arith.truncf %86 : vector<32x128xf32> to vector<32x128xbf16>
    %c0_48 = arith.constant 0 : index
    %c0_49 = arith.constant 0 : index
    %88 = vector.load %arg8[%c0_48, %c0_49] : memref<128x128xbf16, #tpu.memory_space<vmem>>, vector<128x128xbf16>
    %cst_50 = arith.constant dense<0.000000e+00> : vector<32x128xf32>
    %89 = tpu.matmul %87, %88, %cst_50 {dimension_numbers = #tpu.dot_dimension_numbers<[1], [0], [0], [1], [0, 0, 1, 1], [], []>} : vector<32x128xbf16>, vector<128x128xbf16>, vector<32x128xf32> -> vector<32x128xf32>
    %c0_51 = arith.constant 0 : index
    %c0_52 = arith.constant 0 : index
    %90 = vector.load %arg9[%c0_51, %c0_52] : memref<1x128xf32, #tpu.memory_space<vmem>>, vector<1x128xf32>
    %91 = vector.broadcast %90 : vector<1x128xf32> to vector<32x128xf32>
    %92 = arith.addf %89, %91 : vector<32x128xf32>
    %c0_53 = arith.constant 0 : index
    %c0_54 = arith.constant 0 : index
    %93 = vector.load %arg10[%c0_53, %c0_54] : memref<32x128xf32, #tpu.memory_space<vmem>>, vector<32x128xf32>
    tpu.vector_store %arg10[%c0_53, %c0_54], %92 {strides = array<i32>} : memref<32x128xf32, #tpu.memory_space<vmem>>, vector<32x128xf32>,
    return
  }
  func.func @transform_0(%arg0: i32) -> (i32, i32, i32) {
    %c0_i32 = arith.constant 0 : i32
    %c0_i32_0 = arith.constant 0 : i32
    %c0_i32_1 = arith.constant 0 : i32
    return %arg0, %c0_i32, %c0_i32_0 : i32, i32, i32
  }
  func.func @transform_1(%arg0: i32) -> (i32, i32) {
    %c0_i32 = arith.constant 0 : i32
    %c0_i32_0 = arith.constant 0 : i32
    %c0_i32_1 = arith.constant 0 : i32
    return %c0_i32, %c0_i32_0 : i32, i32
  }
  func.func @transform_2(%arg0: i32) -> (i32, i32) {
    %c0_i32 = arith.constant 0 : i32
    %c0_i32_0 = arith.constant 0 : i32
    %c0_i32_1 = arith.constant 0 : i32
    return %c0_i32, %c0_i32_0 : i32, i32
  }
  func.func @transform_3(%arg0: i32) -> (i32, i32, i32) {
    %c0_i32 = arith.constant 0 : i32
    %c0_i32_0 = arith.constant 0 : i32
    %c0_i32_1 = arith.constant 0 : i32
    %c0_i32_2 = arith.constant 0 : i32
    return %c0_i32, %c0_i32_0, %c0_i32_1 : i32, i32, i32
  }
  func.func @transform_4(%arg0: i32) -> (i32, i32) {
    %c0_i32 = arith.constant 0 : i32
    %c0_i32_0 = arith.constant 0 : i32
    %c0_i32_1 = arith.constant 0 : i32
    return %c0_i32, %c0_i32_0 : i32, i32
  }
  func.func @transform_5(%arg0: i32) -> (i32, i32, i32) {
    %c0_i32 = arith.constant 0 : i32
    %c0_i32_0 = arith.constant 0 : i32
    %c0_i32_1 = arith.constant 0 : i32
    %c0_i32_2 = arith.constant 0 : i32
    return %c0_i32, %c0_i32_0, %c0_i32_1 : i32, i32, i32
  }
  func.func @transform_6(%arg0: i32) -> (i32, i32) {
    %c0_i32 = arith.constant 0 : i32
    %c0_i32_0 = arith.constant 0 : i32
    %c0_i32_1 = arith.constant 0 : i32
    return %c0_i32, %c0_i32_0 : i32, i32
  }
  func.func @transform_7(%arg0: i32) -> (i32, i32) {
    %c0_i32 = arith.constant 0 : i32
    %c0_i32_0 = arith.constant 0 : i32
    %c0_i32_1 = arith.constant 0 : i32
    return %c0_i32, %c0_i32_0 : i32, i32
  }
  func.func @transform_8(%arg0: i32) -> (i32, i32) {
    %c0_i32 = arith.constant 0 : i32
    %c0_i32_0 = arith.constant 0 : i32
    %c0_i32_1 = arith.constant 0 : i32
    return %c0_i32, %c0_i32_0 : i32, i32
  }
  func.func @transform_9(%arg0: i32) -> (i32, i32) {
    %c0_i32 = arith.constant 0 : i32
    %c0_i32_0 = arith.constant 0 : i32
    return %arg0, %c0_i32 : i32, i32
  }
}

</mosaic_0001>

<bundles_post_ra>
// kernel: simple_char_cnn_forward.1
= control target key start
LH: loop header
LB: loop body
LE: loop exit
PB: predicated region body
PF: predicated region fallthrough
CT: control target
= control target key end

     0   :  { %v9427_v1 = vmov 0   ;;  %vm569_vm0 = vcmask 785408   ;;  %s11942_s1 = inlined_call_operand.vmem [shape: bf16[96,512], index: 1, kind: input, shape index: {}]   ;;  %s11943_s0 = inlined_call_operand.vmem [shape: bf16[1,896,96], index: 0, kind: input, shape index: {}]   ;;  %s11944_s3 = inlined_call_operand.vmem [shape: bf16[3,256,512], index: 3, kind: input, shape index: {}]   ;;  %s11945_s2 = inlined_call_operand.vmem [shape: f32[1,256], index: 2, kind: input, shape index: {}]   ;;  %s11946_s5 = inlined_call_operand.vmem [shape: bf16[7,256,128], index: 5, kind: input, shape index: {}]   ;;  %s11947_s4 = inlined_call_operand.vmem [shape: f32[1,256], index: 4, kind: input, shape index: {}]   ;;  %s11948_s7 = inlined_call_operand.vmem [shape: bf16[128,128], index: 7, kind: input, shape index: {}]   ;;  %s11949_s6 = inlined_call_operand.vmem [shape: f32[1,128], index: 6, kind: input, shape index: {}]   ;;  %s11950_s8 = inlined_call_operand.vmem [shape: f32[1,128], index: 8, kind: input, shape index: {}]   ;;  %s11951_s9 = inlined_call_operand.vmem [shape: f32[32,128], index: 9, kind: output, shape index: {}]  }
   0x1   :  { %v8927_v0 = vld [vmem:[%s11942_s1 + $0x4] ss:$16 sps:$4 sm:$0xff]   ;;  %770 = vmatprep.mubr.bf16.mxu0 %v9427_v1  ;;  %1363 = vmatprep.mubr.bf16.mxu1 %v9427_v1  ;;  %v8929_v2 = vld [vmem:[%s11942_s1 + $0xc] ss:$16 sps:$4 sm:$0xff]   ;;  %v8931_v3 = vld [vmem:[%s11942_s1] ss:$16 sps:$4 sm:$0xff]  }
   0x2   :  { %738 = vmatprep.subr.bf16.mxu0 %v8927_v0  ;;  %v8932_v4 = vld [vmem:[%s11942_s1 + $0x8] ss:$16 sps:$4 sm:$0xff]   ;;  %1331 = vmatprep.subr.bf16.mxu1 %v8929_v2  ;;  %v8933_v5 = vld [vmem:[%s11942_s1 + $0x24] ss:$16 sps:$4 sm:$0xff]   ;;  %v8935_v6 = vld [vmem:[%s11942_s1 + $0x2c] ss:$16 sps:$4 sm:$0xff]  }
   0x3   :  { %739 = vmatpush1.bf16.msra.mxu0 %v8931_v3  ;;  %1332 = vmatpush1.bf16.msra.mxu1 %v8932_v4  ;;  %v8937_v7 = vld [vmem:[%s11942_s1 + $0x20] ss:$16 sps:$4 sm:$0xff]   ;;  %v8938_v8 = vld [vmem:[%s11942_s1 + $0x28] ss:$16 sps:$4 sm:$0xff]   ;;  %v8939_v9 = vld [vmem:[%s11942_s1 + $0x44] ss:$16 sps:$4 sm:$0xff]  }
   0x4   :  { %740 = vmatprep.subr.bf16.mxu0 %v8933_v5  ;;  %1333 = vmatprep.subr.bf16.mxu1 %v8935_v6  ;;  %v8941_v10 = vld [vmem:[%s11942_s1 + $0x4c] ss:$16 sps:$4 sm:$0xff]   ;;  %v8943_v11 = vld [vmem:[%s11942_s1 + $0x40] ss:$16 sps:$4 sm:$0xff]   ;;  %v8944_v12 = vld [vmem:[%s11942_s1 + $0x48] ss:$16 sps:$4 sm:$0xff]  }
   0x5   :  { %v8945_v13 = vld [vmem:[%s11942_s1 + $0x64] ss:$16 sps:$4 sm:$0xff]   ;;  %v8947_v14 = vld [vmem:[%s11942_s1 + $0x6c] ss:$16 sps:$4 sm:$0xff]   ;;  %v8949_v15 = vld [vmem:[%s11942_s1 + $0x60] ss:$16 sps:$4 sm:$0xff]  }
   0x6   :  { %v8950_v16 = vld [vmem:[%s11942_s1 + $0x68] ss:$16 sps:$4 sm:$0xff]   ;;  %v8951_v17 = vld [vmem:[%s11942_s1 + $0x84] ss:$16 sps:$4 sm:$0xff]   ;;  %v8953_v18 = vld [vmem:[%s11942_s1 + $0x8c] ss:$16 sps:$4 sm:$0xff]  }
   0x7   :  { %741 = vmatpush1.bf16.msra.mxu0 %v8937_v7  ;;  %1334 = vmatpush1.bf16.msra.mxu1 %v8938_v8  ;;  %v8955_v19 = vld [vmem:[%s11942_s1 + $0x80] ss:$16 sps:$4 sm:$0xff]   ;;  %v8956_v20 = vld [vmem:[%s11942_s1 + $0x88] ss:$16 sps:$4 sm:$0xff]   ;;  %v8957_v21 = vld [vmem:[%s11942_s1 + $0xa4] ss:$16 sps:$4 sm:$0xff]  }
   0x8   :  { %742 = vmatprep.subr.bf16.mxu0 %v8939_v9  ;;  %1335 = vmatprep.subr.bf16.mxu1 %v8941_v10  ;;  %v8959_v22 = vld [vmem:[%s11942_s1 + $0xac] ss:$16 sps:$4 sm:$0xff]   ;;  %v8961_v23 = vld [vmem:[%s11942_s1 + $0xa0] ss:$16 sps:$4 sm:$0xff]   ;;  %v8962_v24 = vld [vmem:[%s11942_s1 + $0xa8] ss:$16 sps:$4 sm:$0xff]  }
   0x9   :  { %v8966_v25 = vld [vmem:[%s11944_s3 + $0x4] ss:$16 sps:$4 sm:$0xff]   ;;  %v8969_v26 = vld [vmem:[%s11944_s3 + $0xc] ss:$16 sps:$4 sm:$0xff]   ;;  %v8964_v28 = vld [vmem:[%s11944_s3] ss:$16 sps:$4 sm:$0xff]  }
   0xa   :  { %v8963_v27 = vld [vmem:[%s11943_s0] sm:$0xff]   ;;  %v8967_v29 = vld [vmem:[%s11944_s3 + $0x8] ss:$16 sps:$4 sm:$0xff]   ;;  %v8978_v31 = vld [vmem:[%s11944_s3 + $0x2c] ss:$16 sps:$4 sm:$0xff]  }
   0xb   :  { %743 = vmatpush1.bf16.msra.mxu0 %v8943_v11  ;;  %1336 = vmatpush1.bf16.msra.mxu1 %v8944_v12  ;;  %v8975_v30 = vld [vmem:[%s11944_s3 + $0x24] ss:$16 sps:$4 sm:$0xff]   ;;  %v8973_v32 = vld [vmem:[%s11944_s3 + $0x20] ss:$16 sps:$4 sm:$0xff]   ;;  %v8976_v33 = vld [vmem:[%s11944_s3 + $0x28] ss:$16 sps:$4 sm:$0xff]  }
   0xc   :  { %744 = vmatprep.subr.bf16.mxu0 %v8945_v13  ;;  %1337 = vmatprep.subr.bf16.mxu1 %v8947_v14  ;;  %v8985_v34 = vld [vmem:[%s11944_s3 + $0x44] ss:$16 sps:$4 sm:$0xff]   ;;  %v8970_v35 = vld [vmem:[%s11943_s0 + $0x8] sm:$0xff]   ;;  %v8983_v37 = vld [vmem:[%s11944_s3 + $0x40] ss:$16 sps:$4 sm:$0xff]  }
   0xd   :  { %v8988_v36 = vld [vmem:[%s11944_s3 + $0x4c] ss:$16 sps:$4 sm:$0xff]   ;;  %v8986_v38 = vld [vmem:[%s11944_s3 + $0x48] ss:$16 sps:$4 sm:$0xff]   ;;  %v8992_v39 = vld [vmem:[%s11944_s3 + $0x60] ss:$16 sps:$4 sm:$0xff]  }
   0xe   :  { %v8994_v40 = vld [vmem:[%s11944_s3 + $0x64] ss:$16 sps:$4 sm:$0xff]   ;;  %v8995_v41 = vld [vmem:[%s11944_s3 + $0x68] ss:$16 sps:$4 sm:$0xff]   ;;  %v8997_v42 = vld [vmem:[%s11944_s3 + $0x6c] ss:$16 sps:$4 sm:$0xff]  }
   0xf   :  { %745 = vmatpush1.bf16.msra.mxu0 %v8949_v15  ;;  %1338 = vmatpush1.bf16.msra.mxu1 %v8950_v16  ;;  %v8971_v43 = vld [vmem:[%s11943_s0 + $0x10] sm:$0xff]   ;;  %v9005_v46 = vld [vmem:[%s11944_s3 + $0x88] ss:$16 sps:$4 sm:$0xff]   ;;  %v9007_v47 = vld [vmem:[%s11944_s3 + $0x8c] ss:$16 sps:$4 sm:$0xff]  }
  0x10   :  { %746 = vmatprep.subr.bf16.mxu0 %v8951_v17  ;;  %1339 = vmatprep.subr.bf16.mxu1 %v8953_v18  ;;  %v9002_v44 = vld [vmem:[%s11944_s3 + $0x80] ss:$16 sps:$4 sm:$0xff]   ;;  %v9004_v45 = vld [vmem:[%s11944_s3 + $0x84] ss:$16 sps:$4 sm:$0xff]   ;;  %v8972_v48 = vld [vmem:[%s11943_s0 + $0x18] sm:$0xff]  }
  0x11   :  { %v9013_v49 = vld [vmem:[%s11944_s3 + $0xa4] ss:$16 sps:$4 sm:$0xff]   ;;  %v9011_v50 = vld [vmem:[%s11944_s3 + $0xa0] ss:$16 sps:$4 sm:$0xff]   ;;  %v9016_v51 = vld [vmem:[%s11944_s3 + $0xac] ss:$16 sps:$4 sm:$0xff]  }
  0x12   :  { %v9014_v52 = vld [vmem:[%s11944_s3 + $0xa8] ss:$16 sps:$4 sm:$0xff]   ;;  %v8979_v53 = vld [vmem:[%s11943_s0 + $0x20] sm:$0xff]   ;;  %v9026_v58 = vld [vmem:[%s11944_s3 + $0xcc] ss:$16 sps:$4 sm:$0xff]  }
  0x13   :  { %747 = vmatpush1.bf16.msra.mxu0 %v8955_v19  ;;  %1340 = vmatpush1.bf16.msra.mxu1 %v8956_v20  ;;  %v8980_v54 = vld [vmem:[%s11943_s0 + $0x28] sm:$0xff]   ;;  %v9021_v55 = vld [vmem:[%s11944_s3 + $0xc0] ss:$16 sps:$4 sm:$0xff]   ;;  %v9023_v56 = vld [vmem:[%s11944_s3 + $0xc4] ss:$16 sps:$4 sm:$0xff]  }
  0x14   :  { %748 = vmatprep.subr.bf16.mxu0 %v8957_v21  ;;  %1341 = vmatprep.subr.bf16.mxu1 %v8959_v22  ;;  %v9024_v57 = vld [vmem:[%s11944_s3 + $0xc8] ss:$16 sps:$4 sm:$0xff]   ;;  %v8981_v59 = vld [vmem:[%s11943_s0 + $0x30] sm:$0xff]   ;;  %v8989_v61 = vld [vmem:[%s11943_s0 + $0x40] sm:$0xff]  }
  0x15   :  { %v8982_v60 = vld [vmem:[%s11943_s0 + $0x38] sm:$0xff]   ;;  %v9030_v62 = vld [vmem:[%s11944_s3 + $0xe0] ss:$16 sps:$4 sm:$0xff]   ;;  %v9032_v63 = vld [vmem:[%s11944_s3 + $0xe4] ss:$16 sps:$4 sm:$0xff]  }
  0x16   :  { %v9033_v0 = vld [vmem:[%s11944_s3 + $0xe8] ss:$16 sps:$4 sm:$0xff]   ;;  %v9035_v2 = vld [vmem:[%s11944_s3 + $0xec] ss:$16 sps:$4 sm:$0xff]   ;;  %v8991_v4 = vld [vmem:[%s11943_s0 + $0x50] sm:$0xff]  }
  0x17   :  { %749 = vmatpush1.bf16.msra.mxu0 %v8961_v23  ;;  %1342 = vmatpush1.bf16.msra.mxu1 %v8962_v24  ;;  %v8990_v3 = vld [vmem:[%s11943_s0 + $0x48] sm:$0xff]   ;;  %v8998_v5 = vld [vmem:[%s11943_s0 + $0x58] sm:$0xff]   ;;  %v8999_v6 = vld [vmem:[%s11943_s0 + $0x60] sm:$0xff]  }
  0x18   :  { %3001 = vmatprep.subr.bf16.mxu0 %v8966_v25  ;;  %3294 = vmatprep.subr.bf16.mxu1 %v8969_v26  ;;  %v9040_v7 = vld [vmem:[%s11944_s3 + $0x100] ss:$16 sps:$4 sm:$0xff]   ;;  %v9042_v8 = vld [vmem:[%s11944_s3 + $0x104] ss:$16 sps:$4 sm:$0xff]   ;;  %v9043_v9 = vld [vmem:[%s11944_s3 + $0x108] ss:$16 sps:$4 sm:$0xff]  }
  0x19   :  { %v9045_v10 = vld [vmem:[%s11944_s3 + $0x10c] ss:$16 sps:$4 sm:$0xff]   ;;  %v9001_v12 = vld [vmem:[%s11943_s0 + $0x70] sm:$0xff]   ;;  %v9009_v14 = vld [vmem:[%s11943_s0 + $0x80] sm:$0xff]  }
  0x1a   :  { %7538 = vmatmul.mubr.msk.bf16.vlgmr.msra.gmra.mrb[0].mxu0 %vm569_vm0, %v8963_v27  ;;  %7594 = vmatmul.mubr.msk.bf16.vlgmr.msra.gmra.mrb[0].mxu1 %vm569_vm0, %v8963_v27  ;;  %v9000_v11 = vld [vmem:[%s11943_s0 + $0x68] sm:$0xff]   ;;  %v9008_v13 = vld [vmem:[%s11943_s0 + $0x78] sm:$0xff]   ;;  %v9049_v15 = vld [vmem:[%s11944_s3 + $0x120] ss:$16 sps:$4 sm:$0xff]  }
  0x1b   :  { %3002 = vmatpush1.bf16.msra.mxu0 %v8964_v28  ;;  %3295 = vmatpush1.bf16.msra.mxu1 %v8967_v29  ;;  %v9051_v16 = vld [vmem:[%s11944_s3 + $0x124] ss:$16 sps:$4 sm:$0xff]   ;;  %v9054_v17 = vld [vmem:[%s11944_s3 + $0x12c] ss:$16 sps:$4 sm:$0xff]   ;;  %v9052_v18 = vld [vmem:[%s11944_s3 + $0x128] ss:$16 sps:$4 sm:$0xff]  }
  0x1c   :  { %780 = vmatprep.mubr.bf16.mxu0 %v9427_v1  ;;  %1373 = vmatprep.mubr.bf16.mxu1 %v9427_v1  ;;  %v9010_v19 = vld [vmem:[%s11943_s0 + $0x88] sm:$0xff]   ;;  %v9017_v20 = vld [vmem:[%s11943_s0 + $0x90] sm:$0xff]   ;;  %v9018_v21 = vld [vmem:[%s11943_s0 + $0x98] sm:$0xff]  }
  0x1d   :  { %3003 = vmatprep.subr.bf16.mxu0 %v8975_v30  ;;  %3296 = vmatprep.subr.bf16.mxu1 %v8978_v31  ;;  %v9059_v22 = vld [vmem:[%s11944_s3 + $0x140] ss:$16 sps:$4 sm:$0xff]   ;;  %v9061_v23 = vld [vmem:[%s11944_s3 + $0x144] ss:$16 sps:$4 sm:$0xff]   ;;  %v9062_v24 = vld [vmem:[%s11944_s3 + $0x148] ss:$16 sps:$4 sm:$0xff]  }
  0x1e   :  { %v9064_v25 = vld [vmem:[%s11944_s3 + $0x14c] ss:$16 sps:$4 sm:$0xff]   ;;  %v9019_v26 = vld [vmem:[%s11943_s0 + $0xa0] sm:$0xff]   ;;  %v9027_v28 = vld [vmem:[%s11943_s0 + $0xb0] sm:$0xff]  }
  0x1f   :  { %3004 = vmatpush1.bf16.msra.mxu0 %v8973_v32  ;;  %3297 = vmatpush1.bf16.msra.mxu1 %v8976_v33  ;;  %v9020_v27 = vld [vmem:[%s11943_s0 + $0xa8] sm:$0xff]   ;;  %v9028_v29 = vld [vmem:[%s11943_s0 + $0xb8] sm:$0xff]   ;;  %v9068_v30 = vld [vmem:[%s11944_s3 + $0x160] ss:$16 sps:$4 sm:$0xff]  }
  0x20   :  { %3005 = vmatprep.subr.bf16.mxu0 %v8985_v34  ;;  %3298 = vmatprep.subr.bf16.mxu1 %v8988_v36  ;;  %v9070_v31 = vld [vmem:[%s11944_s3 + $0x164] ss:$16 sps:$4 sm:$0xff]   ;;  %v9071_v32 = vld [vmem:[%s11944_s3 + $0x168] ss:$16 sps:$4 sm:$0xff]   ;;  %v9073_v33 = vld [vmem:[%s11944_s3 + $0x16c] ss:$16 sps:$4 sm:$0xff]  }
  0x21   :  { %v9029_v34 = vld [vmem:[%s11943_s0 + $0xc0] sm:$0xff]   ;;  %v9037_v36 = vld [vmem:[%s11943_s0 + $0xd0] sm:$0xff]  }
  0x22   :  { %7539 = vmatmul.mubr.msk.bf16.gmra.mrb[4].mxu0 %vm569_vm0, %v8970_v35  ;;  %7595 = vmatmul.mubr.msk.bf16.gmra.mrb[4].mxu1 %vm569_vm0, %v8970_v35  ;;  %v9036_v35 = vld [vmem:[%s11943_s0 + $0xc8] sm:$0xff]  }
  0x23   :  { %790 = vmatprep.mubr.bf16.mxu0 %v9427_v1  ;;  %1383 = vmatprep.mubr.bf16.mxu1 %v9427_v1 }
  0x24   :  { %3006 = vmatpush1.bf16.msra.mxu0 %v8983_v37  ;;  %3299 = vmatpush1.bf16.msra.mxu1 %v8986_v38 }
  0x25   :  { %3007 = vmatprep.subr.bf16.mxu0 %v8994_v40  ;;  %3300 = vmatprep.subr.bf16.mxu1 %v8997_v42 }
  0x28   :  { %3008 = vmatpush1.bf16.msra.mxu0 %v8992_v39  ;;  %3301 = vmatpush1.bf16.msra.mxu1 %v8995_v41  ;;  %v9038_v41 = vld [vmem:[%s11943_s0 + $0xd8] sm:$0xff]  }
  0x29   :  { %3009 = vmatprep.subr.bf16.mxu0 %v9004_v45  ;;  %3302 = vmatprep.subr.bf16.mxu1 %v9007_v47  ;;  %v9080_v47 = vld [vmem:[%s11944_s3 + $0x184] ss:$16 sps:$4 sm:$0xff]  }
  0x2a   :  { %7540 = vmatmul.mubr.msk.bf16.gmra.mrb[8].mxu0 %vm569_vm0, %v8971_v43  ;;  %7596 = vmatmul.mubr.msk.bf16.gmra.mrb[8].mxu1 %vm569_vm0, %v8971_v43 }
  0x2b   :  { %800 = vmatprep.mubr.bf16.mxu0 %v9427_v1  ;;  %1393 = vmatprep.mubr.bf16.mxu1 %v9427_v1 }
  0x2c   :  { %3010 = vmatpush1.bf16.msra.mxu0 %v9002_v44  ;;  %3303 = vmatpush1.bf16.msra.mxu1 %v9005_v46  ;;  %v9078_v46 = vld [vmem:[%s11944_s3 + $0x180] ss:$16 sps:$4 sm:$0xff]  }
  0x2d   :  { %3011 = vmatprep.subr.bf16.mxu0 %v9013_v49  ;;  %3304 = vmatprep.subr.bf16.mxu1 %v9016_v51  ;;  %v2262_v49 = vlaneseq }
  0x30   :  { %3012 = vmatpush1.bf16.msra.mxu0 %v9011_v50  ;;  %3305 = vmatpush1.bf16.msra.mxu1 %v9014_v52  ;;  %v9083_v50 = vld [vmem:[%s11944_s3 + $0x18c] ss:$16 sps:$4 sm:$0xff]  }
  0x31   :  { %3013 = vmatprep.subr.bf16.mxu0 %v9023_v56  ;;  %3306 = vmatprep.subr.bf16.mxu1 %v9026_v58  ;;  %v9915_v56 = vshrl.u32 %v2262_v49, 7 }
  0x32   :  { %7541 = vmatmul.mubr.msk.bf16.gmra.mrb[12].mxu0 %vm569_vm0, %v8972_v48  ;;  %7597 = vmatmul.mubr.msk.bf16.gmra.mrb[12].mxu1 %vm569_vm0, %v8972_v48  ;;  %v9081_v48 = vld [vmem:[%s11944_s3 + $0x188] ss:$16 sps:$4 sm:$0xff]  }
  0x33   :  { %810 = vmatprep.mubr.bf16.mxu0 %v9427_v1  ;;  %1403 = vmatprep.mubr.bf16.mxu1 %v9427_v1  ;;  %12008 = vst [vmem:[#allocation2_spill] sm:$0xff] %v9915_v56 }
  0x34   :  { %3014 = vmatpush1.bf16.msra.mxu0 %v9021_v55  ;;  %3307 = vmatpush1.bf16.msra.mxu1 %v9024_v57  ;;  %v9039_v55 = vld [vmem:[%s11943_s0 + $0xe0] sm:$0xff]  }
  0x35   :  { %3015 = vmatprep.subr.bf16.mxu0 %v9032_v63  ;;  %3308 = vmatprep.subr.bf16.mxu1 %v9035_v2  ;;  %v11952_v63 = vsub.s32 1, %v9915_v56 }
  0x38   :  { %3016 = vmatpush1.bf16.msra.mxu0 %v9030_v62  ;;  %3309 = vmatpush1.bf16.msra.mxu1 %v9033_v0  ;;  %v2260_v62 = vld [vmem:[%s11945_s2] sm:$0x3] }
  0x39   :  { %3017 = vmatprep.subr.bf16.mxu0 %v9042_v8  ;;  %3310 = vmatprep.subr.bf16.mxu1 %v9045_v10  ;;  %v9046_v8 = vld [vmem:[%s11943_s0 + $0xe8] sm:$0xff]  }
  0x3a   :  { %7542 = vmatmul.mubr.msk.bf16.gmra.mrb[16].mxu0 %vm569_vm0, %v8979_v53  ;;  %7598 = vmatmul.mubr.msk.bf16.gmra.mrb[16].mxu1 %vm569_vm0, %v8979_v53 }
  0x3b   :  { %820 = vmatprep.mubr.bf16.mxu0 %v9427_v1  ;;  %1413 = vmatprep.mubr.bf16.mxu1 %v9427_v1 }
  0x3c   :  { %3018 = vmatpush1.bf16.msra.mxu0 %v9040_v7  ;;  %3311 = vmatpush1.bf16.msra.mxu1 %v9043_v9 }
  0x3d   :  { %3019 = vmatprep.subr.bf16.mxu0 %v9051_v16  ;;  %3312 = vmatprep.subr.bf16.mxu1 %v9054_v17 }
  0x40   :  { %3020 = vmatpush1.bf16.msra.mxu0 %v9049_v15  ;;  %3313 = vmatpush1.bf16.msra.mxu1 %v9052_v18 }
  0x41   :  { %3021 = vmatprep.subr.bf16.mxu0 %v9061_v23  ;;  %3314 = vmatprep.subr.bf16.mxu1 %v9064_v25 }
  0x42   :  { %7543 = vmatmul.mubr.msk.bf16.gmra.mrb[20].mxu0 %vm569_vm0, %v8980_v54  ;;  %7599 = vmatmul.mubr.msk.bf16.gmra.mrb[20].mxu1 %vm569_vm0, %v8980_v54 }
  0x43   :  { %830 = vmatprep.mubr.bf16.mxu0 %v9427_v1  ;;  %1423 = vmatprep.mubr.bf16.mxu1 %v9427_v1 }
  0x44   :  { %3022 = vmatpush1.bf16.msra.mxu0 %v9059_v22  ;;  %3315 = vmatpush1.bf16.msra.mxu1 %v9062_v24 }
  0x45   :  { %3023 = vmatprep.subr.bf16.mxu0 %v9070_v31  ;;  %3316 = vmatprep.subr.bf16.mxu1 %v9073_v33 }
  0x48   :  { %3024 = vmatpush1.bf16.msra.mxu0 %v9068_v30  ;;  %3317 = vmatpush1.bf16.msra.mxu1 %v9071_v32 }
  0x49   :  { %3025 = vmatprep.subr.bf16.mxu0 %v9080_v47  ;;  %3318 = vmatprep.subr.bf16.mxu1 %v9083_v50 }
  0x4a   :  { %7544 = vmatmul.mubr.msk.bf16.gmra.mrb[24].mxu0 %vm569_vm0, %v8981_v59  ;;  %7600 = vmatmul.mubr.msk.bf16.gmra.mrb[24].mxu1 %vm569_vm0, %v8981_v59 }
  0x4b   :  { %840 = vmatprep.mubr.bf16.mxu0 %v9427_v1  ;;  %1433 = vmatprep.mubr.bf16.mxu1 %v9427_v1 }
  0x4c   :  { %3026 = vmatpush1.bf16.msra.mxu0 %v9078_v46  ;;  %3319 = vmatpush1.bf16.msra.mxu1 %v9081_v48 }
  0x52   :  { %7545 = vmatmul.mubr.msk.bf16.gmra.mrb[28].mxu0 %vm569_vm0, %v8982_v60  ;;  %7601 = vmatmul.mubr.msk.bf16.gmra.mrb[28].mxu1 %vm569_vm0, %v8982_v60 }
  0x53   :  { %850 = vmatprep.mubr.bf16.mxu0 %v9427_v1  ;;  %1443 = vmatprep.mubr.bf16.mxu1 %v9427_v1 }
  0x5a   :  { %7546 = vmatmul.mubr.msk.bf16.gmra.mrb[32].mxu0 %vm569_vm0, %v8989_v61  ;;  %7602 = vmatmul.mubr.msk.bf16.gmra.mrb[32].mxu1 %vm569_vm0, %v8989_v61  ;;  %v11953_v61 = vsub.s32 0, %v9915_v56 }
  0x5b   :  { %860 = vmatprep.mubr.bf16.mxu0 %v9427_v1  ;;  %1453 = vmatprep.mubr.bf16.mxu1 %v9427_v1 }
  0x62   :  { %7547 = vmatmul.mubr.msk.bf16.gmra.mrb[36].mxu0 %vm569_vm0, %v8990_v3  ;;  %7603 = vmatmul.mubr.msk.bf16.gmra.mrb[36].mxu1 %vm569_vm0, %v8990_v3 }
  0x63   :  { %870 = vmatprep.mubr.bf16.mxu0 %v9427_v1  ;;  %1463 = vmatprep.mubr.bf16.mxu1 %v9427_v1 }
  0x6a   :  { %7548 = vmatmul.mubr.msk.bf16.gmra.mrb[40].mxu0 %vm569_vm0, %v8991_v4  ;;  %7604 = vmatmul.mubr.msk.bf16.gmra.mrb[40].mxu1 %vm569_vm0, %v8991_v4 }
  0x6b   :  { %880 = vmatprep.mubr.bf16.mxu0 %v9427_v1  ;;  %1473 = vmatprep.mubr.bf16.mxu1 %v9427_v1 }
  0x72   :  { %7549 = vmatmul.mubr.msk.bf16.gmra.mrb[44].mxu0 %vm569_vm0, %v8998_v5  ;;  %7605 = vmatmul.mubr.msk.bf16.gmra.mrb[44].mxu1 %vm569_vm0, %v8998_v5  ;;  %v9936_v5 = vrot.slane %v2260_v62, %v11953_v61 }
  0x73   :  { %890 = vmatprep.mubr.bf16.mxu0 %v9427_v1  ;;  %1483 = vmatprep.mubr.bf16.mxu1 %v9427_v1 }
  0x7a   :  { %7550 = vmatmul.mubr.msk.bf16.gmra.mrb[48].mxu0 %vm569_vm0, %v8999_v6  ;;  %7606 = vmatmul.mubr.msk.bf16.gmra.mrb[48].mxu1 %vm569_vm0, %v8999_v6 }
  0x7b   :  { %900 = vmatprep.mubr.bf16.mxu0 %v9427_v1  ;;  %1493 = vmatprep.mubr.bf16.mxu1 %v9427_v1 }
  0x82   :  { %7551 = vmatmul.mubr.msk.bf16.gmra.mrb[52].mxu0 %vm569_vm0, %v9000_v11  ;;  %7607 = vmatmul.mubr.msk.bf16.gmra.mrb[52].mxu1 %vm569_vm0, %v9000_v11 }
  0x83   :  { %910 = vmatprep.mubr.bf16.mxu0 %v9427_v1  ;;  %1503 = vmatprep.mubr.bf16.mxu1 %v9427_v1 }
  0x8a   :  { %7552 = vmatmul.mubr.msk.bf16.gmra.mrb[56].mxu0 %vm569_vm0, %v9001_v12  ;;  %7608 = vmatmul.mubr.msk.bf16.gmra.mrb[56].mxu1 %vm569_vm0, %v9001_v12 }
  0x8b   :  { %920 = vmatprep.mubr.bf16.mxu0 %v9427_v1  ;;  %1513 = vmatprep.mubr.bf16.mxu1 %v9427_v1 }
  0x92   :  { %7553 = vmatmul.mubr.msk.bf16.gmra.mrb[60].mxu0 %vm569_vm0, %v9008_v13  ;;  %7609 = vmatmul.mubr.msk.bf16.gmra.mrb[60].mxu1 %vm569_vm0, %v9008_v13  ;;  %v9943_v13 = vrot.slane %v2260_v62, %v11952_v63 }
  0x93   :  { %930 = vmatprep.mubr.bf16.mxu0 %v9427_v1  ;;  %1523 = vmatprep.mubr.bf16.mxu1 %v9427_v1 }
  0x9a   :  { %7554 = vmatmul.mubr.msk.bf16.gmra.mrb[64].mxu0 %vm569_vm0, %v9009_v14  ;;  %7610 = vmatmul.mubr.msk.bf16.gmra.mrb[64].mxu1 %vm569_vm0, %v9009_v14 }
  0x9b   :  { %940 = vmatprep.mubr.bf16.mxu0 %v9427_v1  ;;  %1533 = vmatprep.mubr.bf16.mxu1 %v9427_v1 }
  0xa2   :  { %7555 = vmatmul.mubr.msk.bf16.gmra.mrb[68].mxu0 %vm569_vm0, %v9010_v19  ;;  %7611 = vmatmul.mubr.msk.bf16.gmra.mrb[68].mxu1 %vm569_vm0, %v9010_v19 }
  0xa3   :  { %950 = vmatprep.mubr.bf16.mxu0 %v9427_v1  ;;  %1543 = vmatprep.mubr.bf16.mxu1 %v9427_v1 }
  0xaa   :  { %7556 = vmatmul.mubr.msk.bf16.gmra.mrb[72].mxu0 %vm569_vm0, %v9017_v20  ;;  %7612 = vmatmul.mubr.msk.bf16.gmra.mrb[72].mxu1 %vm569_vm0, %v9017_v20 }
  0xab   :  { %960 = vmatprep.mubr.bf16.mxu0 %v9427_v1  ;;  %1553 = vmatprep.mubr.bf16.mxu1 %v9427_v1 }
  0xb2   :  { %7557 = vmatmul.mubr.msk.bf16.gmra.mrb[76].mxu0 %vm569_vm0, %v9018_v21  ;;  %7613 = vmatmul.mubr.msk.bf16.gmra.mrb[76].mxu1 %vm569_vm0, %v9018_v21 }
  0xb3   :  { %970 = vmatprep.mubr.bf16.mxu0 %v9427_v1  ;;  %1563 = vmatprep.mubr.bf16.mxu1 %v9427_v1 }
  0xba   :  { %7558 = vmatmul.mubr.msk.bf16.gmra.mrb[80].mxu0 %vm569_vm0, %v9019_v26  ;;  %7614 = vmatmul.mubr.msk.bf16.gmra.mrb[80].mxu1 %vm569_vm0, %v9019_v26 }
  0xbb   :  { %980 = vmatprep.mubr.bf16.mxu0 %v9427_v1  ;;  %1573 = vmatprep.mubr.bf16.mxu1 %v9427_v1 }
  0xc2   :  { %7559 = vmatmul.mubr.msk.bf16.gmra.mrb[84].mxu0 %vm569_vm0, %v9020_v27  ;;  %7615 = vmatmul.mubr.msk.bf16.gmra.mrb[84].mxu1 %vm569_vm0, %v9020_v27 }
  0xc3   :  { %990 = vmatprep.mubr.bf16.mxu0 %v9427_v1  ;;  %1583 = vmatprep.mubr.bf16.mxu1 %v9427_v1 }
  0xca   :  { %7560 = vmatmul.mubr.msk.bf16.gmra.mrb[88].mxu0 %vm569_vm0, %v9027_v28  ;;  %7616 = vmatmul.mubr.msk.bf16.gmra.mrb[88].mxu1 %vm569_vm0, %v9027_v28 }
  0xcb   :  { %1000 = vmatprep.mubr.bf16.mxu0 %v9427_v1  ;;  %1593 = vmatprep.mubr.bf16.mxu1 %v9427_v1 }
  0xd2   :  { %7561 = vmatmul.mubr.msk.bf16.gmra.mrb[92].mxu0 %vm569_vm0, %v9028_v29  ;;  %7617 = vmatmul.mubr.msk.bf16.gmra.mrb[92].mxu1 %vm569_vm0, %v9028_v29 }
  0xd3   :  { %1010 = vmatprep.mubr.bf16.mxu0 %v9427_v1  ;;  %1603 = vmatprep.mubr.bf16.mxu1 %v9427_v1 }
  0xda   :  { %7562 = vmatmul.mubr.msk.bf16.gmra.mrb[96].mxu0 %vm569_vm0, %v9029_v34  ;;  %7618 = vmatmul.mubr.msk.bf16.gmra.mrb[96].mxu1 %vm569_vm0, %v9029_v34 }
  0xdb   :  { %1020 = vmatprep.mubr.bf16.mxu0 %v9427_v1  ;;  %1613 = vmatprep.mubr.bf16.mxu1 %v9427_v1 }
  0xe2   :  { %7563 = vmatmul.mubr.msk.bf16.gmra.mrb[100].mxu0 %vm569_vm0, %v9036_v35  ;;  %7619 = vmatmul.mubr.msk.bf16.gmra.mrb[100].mxu1 %vm569_vm0, %v9036_v35 }
  0xe3   :  { %1030 = vmatprep.mubr.bf16.mxu0 %v9427_v1  ;;  %1623 = vmatprep.mubr.bf16.mxu1 %v9427_v1 }
  0xea   :  { %7564 = vmatmul.mubr.msk.bf16.gmra.mrb[104].mxu0 %vm569_vm0, %v9037_v36  ;;  %7620 = vmatmul.mubr.msk.bf16.gmra.mrb[104].mxu1 %vm569_vm0, %v9037_v36  ;;  %v9047_v36 = vld [vmem:[%s11943_s0 + $0xf0] sm:$0xff]  }
  0xeb   :  { %1040 = vmatprep.mubr.bf16.mxu0 %v9427_v1  ;;  %1633 = vmatprep.mubr.bf16.mxu1 %v9427_v1 }
  0xed   :  { %v772_v37 = vpop.f32.mrb[0].mxu0  ;;  %v1365_v38 = vpop.f32.mrb[0].mxu1 }
  0xee   :  { %v774_v39 = vpop.f32.mrb[1].mxu0  ;;  %v1367_v40 = vpop.f32.mrb[1].mxu1 }
  0xef   :  { %v776_v42 = vpop.f32.mrb[2].mxu0  ;;  %v1369_v43 = vpop.f32.mrb[2].mxu1 }
  0xf0   :  { %v778_v44 = vpop.f32.mrb[3].mxu0  ;;  %v1371_v45 = vpop.f32.mrb[3].mxu1 }
  0xf2   :  { %7565 = vmatmul.mubr.msk.bf16.gmra.mrb[108].mxu0 %vm569_vm0, %v9038_v41  ;;  %7621 = vmatmul.mubr.msk.bf16.gmra.mrb[108].mxu1 %vm569_vm0, %v9038_v41 }
  0xf3   :  { %1050 = vmatprep.mubr.bf16.mxu0 %v9427_v1  ;;  %1643 = vmatprep.mubr.bf16.mxu1 %v9427_v1 }
  0xf5   :  { %v9904_v51 = vpop.f32.mrb[4].mxu0  ;;  %v9906_v52 = vpop.f32.mrb[4].mxu1 }
  0xf6   :  { %v9908_v53 = vpop.f32.mrb[5].mxu0  ;;  %v9910_v54 = vpop.f32.mrb[5].mxu1 }
  0xf7   :  { %v9917_v57 = vpop.f32.mrb[6].mxu0  ;;  %v9919_v58 = vpop.f32.mrb[6].mxu1 }
  0xf8   :  { %v9921_v59 = vpop.f32.mrb[7].mxu0  ;;  %v9923_v60 = vpop.f32.mrb[7].mxu1 }
  0xfa   :  { %7566 = vmatmul.mubr.msk.bf16.gmra.mrb[112].mxu0 %vm569_vm0, %v9039_v55  ;;  %7622 = vmatmul.mubr.msk.bf16.gmra.mrb[112].mxu1 %vm569_vm0, %v9039_v55 }
  0xfb   :  { %1060 = vmatprep.mubr.bf16.mxu0 %v9427_v1  ;;  %1653 = vmatprep.mubr.bf16.mxu1 %v9427_v1 }
  0xfd   :  { %v792_v0 = vpop.f32.mrb[8].mxu0  ;;  %v1385_v2 = vpop.f32.mrb[8].mxu1 }
  0xfe   :  { %v1924_v3 = vmax.f32 %v772_v37, %v792_v0  ;;  %v1926_v4 = vmax.f32 %v1365_v38, %v1385_v2  ;;  %v794_v6 = vpop.f32.mrb[9].mxu0  ;;  %v1387_v7 = vpop.f32.mrb[9].mxu1  ;;  %v9087_v0 = vld [vmem:[%s11944_s3 + $0x1a0] ss:$16 sps:$4 sm:$0xff]   ;;  %v9089_v2 = vld [vmem:[%s11944_s3 + $0x1a4] ss:$16 sps:$4 sm:$0xff]  }
  0xff   :  { %v1925_v9 = vmax.f32 %v774_v39, %v794_v6  ;;  %v1927_v10 = vmax.f32 %v1367_v40, %v1387_v7  ;;  %v796_v11 = vpop.f32.mrb[10].mxu0  ;;  %v1389_v12 = vpop.f32.mrb[10].mxu1  ;;  %v9090_v7 = vld [vmem:[%s11944_s3 + $0x1a8] ss:$16 sps:$4 sm:$0xff]   ;;  %3027 = vmatprep.subr.bf16.mxu0 %v9089_v2 }
 0x100   :  { %v2148_v14 = vmax.f32 %v1924_v3, %v1926_v4  ;;  %v1928_v15 = vmax.f32 %v776_v42, %v796_v11  ;;  %v1930_v16 = vmax.f32 %v1369_v43, %v1389_v12  ;;  %v798_v17 = vpop.f32.mrb[11].mxu0  ;;  %v1391_v18 = vpop.f32.mrb[11].mxu1  ;;  %3028 = vmatpush1.bf16.msra.mxu0 %v9087_v0 }
 0x101   :  { %v2149_v19 = vmax.f32 %v1925_v9, %v1927_v10  ;;  %v1929_v20 = vmax.f32 %v778_v44, %v798_v17  ;;  %v1931_v21 = vmax.f32 %v1371_v45, %v1391_v18 }
 0x102   :  { %v2272_v22 = vadd.f32 %v9936_v5, %v2148_v14  ;;  %v2150_v23 = vmax.f32 %v1928_v15, %v1930_v16  ;;  %7567 = vmatmul.mubr.msk.bf16.gmra.mrb[116].mxu0 %vm569_vm0, %v9046_v8  ;;  %7623 = vmatmul.mubr.msk.bf16.gmra.mrb[116].mxu1 %vm569_vm0, %v9046_v8  ;;  %v9092_v8 = vld [vmem:[%s11944_s3 + $0x1ac] ss:$16 sps:$4 sm:$0xff]  }
 0x103   :  { %v2151_v24 = vmax.f32 %v1929_v20, %v1931_v21  ;;  %1070 = vmatprep.mubr.bf16.mxu0 %v9427_v1  ;;  %1663 = vmatprep.mubr.bf16.mxu1 %v9427_v1  ;;  %v2273_v25 = vadd.f32 %v9943_v13, %v2149_v19 }
 0x104   :  { %v2274_v26 = vadd.f32 %v9936_v5, %v2150_v23  ;;  %v2384_v30 = vmax.f32 %v2272_v22, 0.0  ;;  %3320 = vmatprep.subr.bf16.mxu1 %v9092_v8 }
 0x105   :  { %v802_v27 = vpop.f32.mrb[12].mxu0  ;;  %v1395_v28 = vpop.f32.mrb[12].mxu1  ;;  %v2275_v29 = vadd.f32 %v9943_v13, %v2151_v24  ;;  %v2385_v41 = vmax.f32 %v2273_v25, 0.0  ;;  %3321 = vmatpush1.bf16.msra.mxu1 %v9090_v7  ;;  %v9055_v24 = vld [vmem:[%s11943_s0 + $0x100] sm:$0xff]  }
 0x106   :  { %v2386_v31 = vmax.f32 %v2274_v26, 0.0  ;;  %v1932_v32 = vmax.f32 %v9904_v51, %v802_v27  ;;  %v1934_v33 = vmax.f32 %v9906_v52, %v1395_v28  ;;  %v804_v34 = vpop.f32.mrb[13].mxu0  ;;  %v1397_v35 = vpop.f32.mrb[13].mxu1 }
 0x107   :  { %v1933_v37 = vmax.f32 %v9908_v53, %v804_v34  ;;  %v1935_v38 = vmax.f32 %v9910_v54, %v1397_v35  ;;  %v806_v39 = vpop.f32.mrb[14].mxu0  ;;  %v1399_v40 = vpop.f32.mrb[14].mxu1  ;;  %v2387_v42 = vmax.f32 %v2275_v29, 0.0  ;;  %v9056_v35 = vld [vmem:[%s11943_s0 + $0x108] sm:$0xff]  }
 0x108   :  { %v2152_v43 = vmax.f32 %v1932_v32, %v1934_v33  ;;  %v1936_v44 = vmax.f32 %v9917_v57, %v806_v39  ;;  %v1938_v45 = vmax.f32 %v9919_v58, %v1399_v40  ;;  %v808_v46 = vpop.f32.mrb[15].mxu0  ;;  %v1401_v47 = vpop.f32.mrb[15].mxu1  ;;  %v9962_v48 = vpack.c.bf16 %v2386_v31, %v2384_v30  ;;  %v9048_v58 = vld [vmem:[%s11943_s0 + $0xf8] sm:$0xff]  }
 0x109   :  { %v2153_v49 = vmax.f32 %v1933_v37, %v1935_v38  ;;  %v1937_v50 = vmax.f32 %v9921_v59, %v808_v46  ;;  %v1939_v51 = vmax.f32 %v9923_v60, %v1401_v47  ;;  %v9966_v52 = vpack.c.bf16 %v2387_v42, %v2385_v41 }
 0x10a   :  { %12009 = vst [vmem:[#allocation3_spill] sm:$0xff] %v9962_v48  ;;  %v2154_v53 = vmax.f32 %v1936_v44, %v1938_v45  ;;  %7568 = vmatmul.mubr.msk.bf16.gmra.mrb[120].mxu0 %vm569_vm0, %v9047_v36  ;;  %7624 = vmatmul.mubr.msk.bf16.gmra.mrb[120].mxu1 %vm569_vm0, %v9047_v36  ;;  %v2276_v57 = vadd.f32 %v9936_v5, %v2152_v43 }
 0x10b   :  { %v2155_v54 = vmax.f32 %v1937_v50, %v1939_v51  ;;  %1080 = vmatprep.mubr.bf16.mxu0 %v9427_v1  ;;  %1673 = vmatprep.mubr.bf16.mxu1 %v9427_v1  ;;  %v2277_v55 = vadd.f32 %v9943_v13, %v2153_v49 }
 0x10c   :  { %v2278_v59 = vadd.f32 %v9936_v5, %v2154_v53  ;;  %v2388_v14 = vmax.f32 %v2276_v57, 0.0 }
 0x10d   :  { %v812_v60 = vpop.f32.mrb[16].mxu0  ;;  %v1405_v62 = vpop.f32.mrb[16].mxu1  ;;  %v2279_v3 = vadd.f32 %v9943_v13, %v2155_v54  ;;  %v2389_v11 = vmax.f32 %v2277_v55, 0.0 }
 0x10e   :  { %v814_v4 = vpop.f32.mrb[17].mxu0  ;;  %v1407_v6 = vpop.f32.mrb[17].mxu1  ;;  %v2390_v15 = vmax.f32 %v2278_v59, 0.0 }
 0x10f   :  { %v816_v9 = vpop.f32.mrb[18].mxu0  ;;  %v1409_v10 = vpop.f32.mrb[18].mxu1  ;;  %v2391_v12 = vmax.f32 %v2279_v3, 0.0 }
 0x110   :  { %v818_v16 = vpop.f32.mrb[19].mxu0  ;;  %v1411_v17 = vpop.f32.mrb[19].mxu1  ;;  %v9993_v19 = vpack.c.bf16 %v2390_v15, %v2388_v14 }
 0x111   :  { %v9991_v18 = vpack.c.bf16 %v2391_v12, %v2389_v11 }
 0x112   :  { %7569 = vmatmul.mubr.msk.bf16.gmra.mrb[124].mxu0 %vm569_vm0, %v9048_v58  ;;  %7625 = vmatmul.mubr.msk.bf16.gmra.mrb[124].mxu1 %vm569_vm0, %v9048_v58 }
 0x113   :  { %12010 = vst [vmem:[#allocation4_spill] sm:$0xff] %v9991_v18  ;;  %1090 = vmatprep.mubr.bf16.mxu0 %v9427_v1  ;;  %1683 = vmatprep.mubr.bf16.mxu1 %v9427_v1 }
 0x115   :  { %v822_v20 = vpop.f32.mrb[20].mxu0  ;;  %v1415_v21 = vpop.f32.mrb[20].mxu1 }
 0x116   :  { %v9999_v22 = vpop.f32.mrb[21].mxu0  ;;  %v1417_v23 = vpop.f32.mrb[21].mxu1 }
 0x117   :  { %v10004_v25 = vpop.f32.mrb[22].mxu0  ;;  %v10006_v26 = vpop.f32.mrb[22].mxu1 }
 0x118   :  { %v10008_v27 = vpop.f32.mrb[23].mxu0  ;;  %v10010_v28 = vpop.f32.mrb[23].mxu1 }
 0x11a   :  { %7570 = vmatmul.mubr.msk.bf16.gmra.mrb[128].mxu0 %vm569_vm0, %v9055_v24  ;;  %7626 = vmatmul.mubr.msk.bf16.gmra.mrb[128].mxu1 %vm569_vm0, %v9055_v24 }
 0x11b   :  { %1100 = vmatprep.mubr.bf16.mxu0 %v9427_v1  ;;  %1693 = vmatprep.mubr.bf16.mxu1 %v9427_v1 }
 0x11d   :  { %v832_v29 = vpop.f32.mrb[24].mxu0  ;;  %v1425_v30 = vpop.f32.mrb[24].mxu1 }
 0x11e   :  { %v1940_v31 = vmax.f32 %v812_v60, %v832_v29  ;;  %v1942_v32 = vmax.f32 %v1405_v62, %v1425_v30  ;;  %v834_v33 = vpop.f32.mrb[25].mxu0  ;;  %v1427_v34 = vpop.f32.mrb[25].mxu1 }
 0x11f   :  { %v1941_v36 = vmax.f32 %v814_v4, %v834_v33  ;;  %v1943_v37 = vmax.f32 %v1407_v6, %v1427_v34  ;;  %v836_v38 = vpop.f32.mrb[26].mxu0  ;;  %v1429_v39 = vpop.f32.mrb[26].mxu1  ;;  %v9057_v4 = vld [vmem:[%s11943_s0 + $0x110] sm:$0xff]  }
 0x120   :  { %v2156_v40 = vmax.f32 %v1940_v31, %v1942_v32  ;;  %v1944_v41 = vmax.f32 %v816_v9, %v836_v38  ;;  %v1946_v42 = vmax.f32 %v1409_v10, %v1429_v39  ;;  %v838_v43 = vpop.f32.mrb[27].mxu0  ;;  %v1431_v44 = vpop.f32.mrb[27].mxu1 }
 0x121   :  { %v2157_v45 = vmax.f32 %v1941_v36, %v1943_v37  ;;  %v1945_v46 = vmax.f32 %v818_v16, %v838_v43  ;;  %v1947_v47 = vmax.f32 %v1411_v17, %v1431_v44 }
 0x122   :  { %v2280_v49 = vadd.f32 %v9936_v5, %v2156_v40  ;;  %v2158_v50 = vmax.f32 %v1944_v41, %v1946_v42  ;;  %7571 = vmatmul.mubr.msk.bf16.gmra.mrb[132].mxu0 %vm569_vm0, %v9056_v35  ;;  %7627 = vmatmul.mubr.msk.bf16.gmra.mrb[132].mxu1 %vm569_vm0, %v9056_v35  ;;  %v9058_v41 = vld [vmem:[%s11943_s0 + $0x118] sm:$0xff]  }
 0x123   :  { %v2281_v51 = vadd.f32 %v9943_v13, %v2157_v45  ;;  %v2159_v53 = vmax.f32 %v1945_v46, %v1947_v47  ;;  %1110 = vmatprep.mubr.bf16.mxu0 %v9427_v1  ;;  %1703 = vmatprep.mubr.bf16.mxu1 %v9427_v1 }
 0x124   :  { %v2282_v54 = vadd.f32 %v9936_v5, %v2158_v50  ;;  %v2392_v59 = vmax.f32 %v2280_v49, 0.0 }
 0x125   :  { %v2283_v55 = vadd.f32 %v9943_v13, %v2159_v53  ;;  %v842_v57 = vpop.f32.mrb[28].mxu0  ;;  %v1435_v58 = vpop.f32.mrb[28].mxu1  ;;  %v2393_v6 = vmax.f32 %v2281_v51, 0.0 }
 0x126   :  { %v2394_v60 = vmax.f32 %v2282_v54, 0.0  ;;  %v1948_v62 = vmax.f32 %v822_v20, %v842_v57  ;;  %v1950_v0 = vmax.f32 %v1415_v21, %v1435_v58  ;;  %v844_v2 = vpop.f32.mrb[29].mxu0  ;;  %v1437_v3 = vpop.f32.mrb[29].mxu1  ;;  %v9065_v57 = vld [vmem:[%s11943_s0 + $0x120] sm:$0xff]  }
 0x127   :  { %v2395_v7 = vmax.f32 %v2283_v55, 0.0  ;;  %v1949_v8 = vmax.f32 %v9999_v22, %v844_v2  ;;  %v1951_v9 = vmax.f32 %v1417_v23, %v1437_v3  ;;  %v846_v10 = vpop.f32.mrb[30].mxu0  ;;  %v1439_v11 = vpop.f32.mrb[30].mxu1  ;;  %v9097_v22 = vld [vmem:[%s11944_s3 + $0x1c0] ss:$16 sps:$4 sm:$0xff]  }
 0x128   :  { %v10031_v12 = vpack.c.bf16 %v2394_v60, %v2392_v59  ;;  %v2160_v14 = vmax.f32 %v1948_v62, %v1950_v0  ;;  %v1952_v15 = vmax.f32 %v10004_v25, %v846_v10  ;;  %v1954_v16 = vmax.f32 %v10006_v26, %v1439_v11  ;;  %v848_v17 = vpop.f32.mrb[31].mxu0  ;;  %v1441_v20 = vpop.f32.mrb[31].mxu1  ;;  %v9099_v23 = vld [vmem:[%s11944_s3 + $0x1c4] ss:$16 sps:$4 sm:$0xff]   ;;  %v9100_v25 = vld [vmem:[%s11944_s3 + $0x1c8] ss:$16 sps:$4 sm:$0xff]  }
 0x129   :  { %v10035_v21 = vpack.c.bf16 %v2395_v7, %v2393_v6  ;;  %v2161_v24 = vmax.f32 %v1949_v8, %v1951_v9  ;;  %v1953_v29 = vmax.f32 %v10008_v27, %v848_v17  ;;  %v1955_v30 = vmax.f32 %v10010_v28, %v1441_v20  ;;  %v9102_v27 = vld [vmem:[%s11944_s3 + $0x1cc] ss:$16 sps:$4 sm:$0xff]   ;;  %3029 = vmatprep.subr.bf16.mxu0 %v9099_v23 }
 0x12a   :  { %v2284_v26 = vadd.f32 %v9936_v5, %v2160_v14  ;;  %v2162_v31 = vmax.f32 %v1952_v15, %v1954_v16  ;;  %7572 = vmatmul.mubr.msk.bf16.gmra.mrb[136].mxu0 %vm569_vm0, %v9057_v4  ;;  %7628 = vmatmul.mubr.msk.bf16.gmra.mrb[136].mxu1 %vm569_vm0, %v9057_v4  ;;  %v9066_v8 = vld [vmem:[%s11943_s0 + $0x128] sm:$0xff]  }
 0x12b   :  { %v2285_v28 = vadd.f32 %v9943_v13, %v2161_v24  ;;  %v2163_v32 = vmax.f32 %v1953_v29, %v1955_v30  ;;  %1120 = vmatprep.mubr.bf16.mxu0 %v9427_v1  ;;  %1713 = vmatprep.mubr.bf16.mxu1 %v9427_v1 }
 0x12c   :  { %v2286_v33 = vadd.f32 %v9936_v5, %v2162_v31  ;;  %3322 = vmatprep.subr.bf16.mxu1 %v9102_v27  ;;  %3030 = vmatpush1.bf16.msra.mxu0 %v9097_v22  ;;  %v2396_v37 = vmax.f32 %v2284_v26, 0.0 }
 0x12d   :  { %v2287_v34 = vadd.f32 %v9943_v13, %v2163_v32  ;;  %v852_v35 = vpop.f32.mrb[32].mxu0  ;;  %v1445_v36 = vpop.f32.mrb[32].mxu1  ;;  %3323 = vmatpush1.bf16.msra.mxu1 %v9100_v25  ;;  %v2397_v42 = vmax.f32 %v2285_v28, 0.0 }
 0x12e   :  { %v2398_v38 = vmax.f32 %v2286_v33, 0.0  ;;  %v854_v39 = vpop.f32.mrb[33].mxu0  ;;  %v1447_v40 = vpop.f32.mrb[33].mxu1 }
 0x12f   :  { %v2399_v43 = vmax.f32 %v2287_v34, 0.0  ;;  %v856_v44 = vpop.f32.mrb[34].mxu0  ;;  %v1449_v45 = vpop.f32.mrb[34].mxu1  ;;  %v9067_v34 = vld [vmem:[%s11943_s0 + $0x130] sm:$0xff]  }
 0x130   :  { %v10062_v46 = vpack.c.bf16 %v2398_v38, %v2396_v37  ;;  %v858_v47 = vpop.f32.mrb[35].mxu0  ;;  %v1451_v49 = vpop.f32.mrb[35].mxu1 }
 0x131   :  { %v10064_v50 = vpack.c.bf16 %v2399_v43, %v2397_v42  ;;  %v9108_v42 = vld [vmem:[%s11944_s3 + $0x1e4] ss:$16 sps:$4 sm:$0xff]  }
 0x132   :  { %7573 = vmatmul.mubr.msk.bf16.gmra.mrb[140].mxu0 %vm569_vm0, %v9058_v41  ;;  %7629 = vmatmul.mubr.msk.bf16.gmra.mrb[140].mxu1 %vm569_vm0, %v9058_v41 }
 0x133   :  { %1130 = vmatprep.mubr.bf16.mxu0 %v9427_v1  ;;  %1723 = vmatprep.mubr.bf16.mxu1 %v9427_v1 }
 0x134   :  { %3031 = vmatprep.subr.bf16.mxu0 %v9108_v42  ;;  %v9120_v42 = vld [vmem:[%s11944_s3 + $0x20c] ss:$16 sps:$4 sm:$0xff]  }
 0x135   :  { %v862_v51 = vpop.f32.mrb[36].mxu0  ;;  %v1455_v53 = vpop.f32.mrb[36].mxu1 }
 0x136   :  { %v10070_v54 = vpop.f32.mrb[37].mxu0  ;;  %v10072_v55 = vpop.f32.mrb[37].mxu1 }
 0x137   :  { %v10077_v58 = vpop.f32.mrb[38].mxu0  ;;  %v10079_v59 = vpop.f32.mrb[38].mxu1 }
 0x138   :  { %v10081_v60 = vpop.f32.mrb[39].mxu0  ;;  %v10083_v62 = vpop.f32.mrb[39].mxu1 }
 0x13a   :  { %7574 = vmatmul.mubr.msk.bf16.gmra.mrb[144].mxu0 %vm569_vm0, %v9065_v57  ;;  %7630 = vmatmul.mubr.msk.bf16.gmra.mrb[144].mxu1 %vm569_vm0, %v9065_v57 }
 0x13b   :  { %1140 = vmatprep.mubr.bf16.mxu0 %v9427_v1  ;;  %1733 = vmatprep.mubr.bf16.mxu1 %v9427_v1 }
 0x13d   :  { %v872_v0 = vpop.f32.mrb[40].mxu0  ;;  %v1465_v2 = vpop.f32.mrb[40].mxu1 }
 0x13e   :  { %v1956_v3 = vmax.f32 %v852_v35, %v872_v0  ;;  %v1958_v4 = vmax.f32 %v1445_v36, %v1465_v2  ;;  %v874_v6 = vpop.f32.mrb[41].mxu0  ;;  %v1467_v7 = vpop.f32.mrb[41].mxu1  ;;  %v9106_v35 = vld [vmem:[%s11944_s3 + $0x1e0] ss:$16 sps:$4 sm:$0xff]  }
 0x13f   :  { %v1957_v9 = vmax.f32 %v854_v39, %v874_v6  ;;  %v1959_v10 = vmax.f32 %v1447_v40, %v1467_v7  ;;  %v876_v11 = vpop.f32.mrb[42].mxu0  ;;  %v1469_v14 = vpop.f32.mrb[42].mxu1  ;;  %v9111_v6 = vld [vmem:[%s11944_s3 + $0x1ec] ss:$16 sps:$4 sm:$0xff]   ;;  %3032 = vmatpush1.bf16.msra.mxu0 %v9106_v35 }
 0x140   :  { %v2164_v15 = vmax.f32 %v1956_v3, %v1958_v4  ;;  %v1960_v16 = vmax.f32 %v856_v44, %v876_v11  ;;  %v1962_v17 = vmax.f32 %v1449_v45, %v1469_v14  ;;  %v878_v20 = vpop.f32.mrb[43].mxu0  ;;  %v1471_v24 = vpop.f32.mrb[43].mxu1  ;;  %3324 = vmatprep.subr.bf16.mxu1 %v9111_v6 }
 0x141   :  { %v2165_v29 = vmax.f32 %v1957_v9, %v1959_v10  ;;  %v1961_v30 = vmax.f32 %v858_v47, %v878_v20  ;;  %v1963_v22 = vmax.f32 %v1451_v49, %v1471_v24 }
 0x142   :  { %v2288_v23 = vadd.f32 %v9936_v5, %v2164_v15  ;;  %v2166_v25 = vmax.f32 %v1960_v16, %v1962_v17  ;;  %7575 = vmatmul.mubr.msk.bf16.gmra.mrb[148].mxu0 %vm569_vm0, %v9066_v8  ;;  %7631 = vmatmul.mubr.msk.bf16.gmra.mrb[148].mxu1 %vm569_vm0, %v9066_v8 }
 0x143   :  { %v2289_v26 = vadd.f32 %v9943_v13, %v2165_v29  ;;  %v2167_v31 = vmax.f32 %v1961_v30, %v1963_v22  ;;  %1150 = vmatprep.mubr.bf16.mxu0 %v9427_v1  ;;  %1743 = vmatprep.mubr.bf16.mxu1 %v9427_v1  ;;  %v9074_v29 = vld [vmem:[%s11943_s0 + $0x138] sm:$0xff]  }
 0x144   :  { %v2290_v27 = vadd.f32 %v9936_v5, %v2166_v25  ;;  %v2400_v36 = vmax.f32 %v2288_v23, 0.0 }
 0x145   :  { %v2291_v28 = vadd.f32 %v9943_v13, %v2167_v31  ;;  %v882_v32 = vpop.f32.mrb[44].mxu0  ;;  %v1475_v33 = vpop.f32.mrb[44].mxu1  ;;  %v2401_v43 = vmax.f32 %v2289_v26, 0.0 }
 0x146   :  { %v2402_v37 = vmax.f32 %v2290_v27, 0.0  ;;  %v1964_v38 = vmax.f32 %v862_v51, %v882_v32  ;;  %v1966_v39 = vmax.f32 %v1455_v53, %v1475_v33  ;;  %v884_v40 = vpop.f32.mrb[45].mxu0  ;;  %v1477_v41 = vpop.f32.mrb[45].mxu1 }
 0x147   :  { %v2403_v44 = vmax.f32 %v2291_v28, 0.0  ;;  %v1965_v45 = vmax.f32 %v10070_v54, %v884_v40  ;;  %v1967_v47 = vmax.f32 %v10072_v55, %v1477_v41  ;;  %v886_v49 = vpop.f32.mrb[46].mxu0  ;;  %v1479_v57 = vpop.f32.mrb[46].mxu1  ;;  %v9117_v41 = vld [vmem:[%s11944_s3 + $0x204] ss:$16 sps:$4 sm:$0xff]  }
 0x148   :  { %v10111_v0 = vpack.c.bf16 %v2402_v37, %v2400_v36  ;;  %v2168_v2 = vmax.f32 %v1964_v38, %v1966_v39  ;;  %v1968_v51 = vmax.f32 %v10077_v58, %v886_v49  ;;  %v1970_v53 = vmax.f32 %v10079_v59, %v1479_v57  ;;  %v888_v3 = vpop.f32.mrb[47].mxu0  ;;  %v1481_v4 = vpop.f32.mrb[47].mxu1  ;;  %v9109_v58 = vld [vmem:[%s11944_s3 + $0x1e8] ss:$16 sps:$4 sm:$0xff]   ;;  %v9075_v36 = vld [vmem:[%s11943_s0 + $0x140] sm:$0xff]   ;;  %3907 = vmatprep.subr.bf16.mxu0 %v9117_v41 }
 0x149   :  { %v10118_v7 = vpack.c.bf16 %v2403_v44, %v2401_v43  ;;  %v2169_v54 = vmax.f32 %v1965_v45, %v1967_v47  ;;  %v1969_v55 = vmax.f32 %v10081_v60, %v888_v3  ;;  %v1971_v8 = vmax.f32 %v10083_v62, %v1481_v4  ;;  %3325 = vmatpush1.bf16.msra.mxu1 %v9109_v58 }
 0x14a   :  { %12011 = vst [vmem:[#allocation5_spill] sm:$0xff] %v10111_v0  ;;  %v2292_v59 = vadd.f32 %v9936_v5, %v2168_v2  ;;  %v2170_v9 = vmax.f32 %v1968_v51, %v1970_v53  ;;  %7576 = vmatmul.mubr.msk.bf16.gmra.mrb[152].mxu0 %vm569_vm0, %v9067_v34  ;;  %7632 = vmatmul.mubr.msk.bf16.gmra.mrb[152].mxu1 %vm569_vm0, %v9067_v34  ;;  %v9076_v2 = vld [vmem:[%s11943_s0 + $0x148] sm:$0xff]  }
 0x14b   :  { %12012 = vst [vmem:[#allocation6_spill] sm:$0xff] %v10118_v7  ;;  %v2293_v10 = vadd.f32 %v9943_v13, %v2169_v54  ;;  %v2171_v11 = vmax.f32 %v1969_v55, %v1971_v8  ;;  %1160 = vmatprep.mubr.bf16.mxu0 %v9427_v1  ;;  %1753 = vmatprep.mubr.bf16.mxu1 %v9427_v1 }
 0x14c   :  { %v2294_v60 = vadd.f32 %v9936_v5, %v2170_v9  ;;  %v2404_v16 = vmax.f32 %v2292_v59, 0.0  ;;  %4220 = vmatprep.subr.bf16.mxu1 %v9120_v42 }
 0x14d   :  { %v2295_v62 = vadd.f32 %v9943_v13, %v2171_v11  ;;  %v892_v14 = vpop.f32.mrb[48].mxu0  ;;  %v1485_v15 = vpop.f32.mrb[48].mxu1  ;;  %v2405_v30 = vmax.f32 %v2293_v10, 0.0 }
 0x14e   :  { %v2406_v17 = vmax.f32 %v2294_v60, 0.0  ;;  %v894_v20 = vpop.f32.mrb[49].mxu0  ;;  %v1487_v24 = vpop.f32.mrb[49].mxu1 }
 0x14f   :  { %v2407_v22 = vmax.f32 %v2295_v62, 0.0  ;;  %v896_v23 = vpop.f32.mrb[50].mxu0  ;;  %v1489_v25 = vpop.f32.mrb[50].mxu1 }
 0x150   :  { %v10136_v26 = vpack.c.bf16 %v2406_v17, %v2404_v16  ;;  %v898_v31 = vpop.f32.mrb[51].mxu0  ;;  %v1491_v27 = vpop.f32.mrb[51].mxu1 }
 0x151   :  { %v10138_v28 = vpack.c.bf16 %v2407_v22, %v2405_v30 }
 0x152   :  { %7577 = vmatmul.mubr.msk.bf16.gmra.mrb[156].mxu0 %vm569_vm0, %v9074_v29  ;;  %7633 = vmatmul.mubr.msk.bf16.gmra.mrb[156].mxu1 %vm569_vm0, %v9074_v29 }
 0x153   :  { %12013 = vst [vmem:[#allocation7_spill] sm:$0xff] %v10138_v28  ;;  %1170 = vmatprep.mubr.bf16.mxu0 %v9427_v1  ;;  %1763 = vmatprep.mubr.bf16.mxu1 %v9427_v1 }
 0x155   :  { %v10144_v32 = vpop.f32.mrb[52].mxu0  ;;  %v1495_v33 = vpop.f32.mrb[52].mxu1 }
 0x156   :  { %v10146_v34 = vpop.f32.mrb[53].mxu0  ;;  %v10148_v35 = vpop.f32.mrb[53].mxu1 }
 0x157   :  { %v10153_v37 = vpop.f32.mrb[54].mxu0  ;;  %v10155_v38 = vpop.f32.mrb[54].mxu1 }
 0x158   :  { %v10157_v39 = vpop.f32.mrb[55].mxu0  ;;  %v10159_v40 = vpop.f32.mrb[55].mxu1 }
 0x15a   :  { %7578 = vmatmul.mubr.msk.bf16.gmra.mrb[160].mxu0 %vm569_vm0, %v9075_v36  ;;  %7634 = vmatmul.mubr.msk.bf16.gmra.mrb[160].mxu1 %vm569_vm0, %v9075_v36 }
 0x15b   :  { %1180 = vmatprep.mubr.bf16.mxu0 %v9427_v1  ;;  %1773 = vmatprep.mubr.bf16.mxu1 %v9427_v1 }
 0x15d   :  { %v912_v43 = vpop.f32.mrb[56].mxu0  ;;  %v1505_v44 = vpop.f32.mrb[56].mxu1 }
 0x15e   :  { %v1972_v45 = vmax.f32 %v892_v14, %v912_v43  ;;  %v1974_v47 = vmax.f32 %v1485_v15, %v1505_v44  ;;  %v914_v49 = vpop.f32.mrb[57].mxu0  ;;  %v1507_v57 = vpop.f32.mrb[57].mxu1 }
 0x15f   :  { %v1973_v51 = vmax.f32 %v894_v20, %v914_v49  ;;  %v1975_v53 = vmax.f32 %v1487_v24, %v1507_v57  ;;  %v916_v3 = vpop.f32.mrb[58].mxu0  ;;  %v1509_v4 = vpop.f32.mrb[58].mxu1 }
 0x160   :  { %v2172_v6 = vmax.f32 %v1972_v45, %v1974_v47  ;;  %v1976_v54 = vmax.f32 %v896_v23, %v916_v3  ;;  %v1978_v55 = vmax.f32 %v1489_v25, %v1509_v4  ;;  %v918_v8 = vpop.f32.mrb[59].mxu0  ;;  %v1511_v58 = vpop.f32.mrb[59].mxu1 }
 0x161   :  { %v2173_v59 = vmax.f32 %v1973_v51, %v1975_v53  ;;  %v1977_v9 = vmax.f32 %v898_v31, %v918_v8  ;;  %v1979_v10 = vmax.f32 %v1491_v27, %v1511_v58  ;;  %v9077_v31 = vld [vmem:[%s11943_s0 + $0x150] sm:$0xff]  }
 0x162   :  { %v2296_v11 = vadd.f32 %v9936_v5, %v2172_v6  ;;  %v2174_v60 = vmax.f32 %v1976_v54, %v1978_v55  ;;  %7579 = vmatmul.mubr.msk.bf16.gmra.mrb[164].mxu0 %vm569_vm0, %v9076_v2  ;;  %7635 = vmatmul.mubr.msk.bf16.gmra.mrb[164].mxu1 %vm569_vm0, %v9076_v2 }
 0x163   :  { %v2297_v62 = vadd.f32 %v9943_v13, %v2173_v59  ;;  %v2175_v14 = vmax.f32 %v1977_v9, %v1979_v10  ;;  %1190 = vmatprep.mubr.bf16.mxu0 %v9427_v1  ;;  %1783 = vmatprep.mubr.bf16.mxu1 %v9427_v1  ;;  %v9084_v59 = vld [vmem:[%s11943_s0 + $0x158] sm:$0xff]  }
 0x164   :  { %v2298_v15 = vadd.f32 %v9936_v5, %v2174_v60  ;;  %v2408_v24 = vmax.f32 %v2296_v11, 0.0 }
 0x165   :  { %v2299_v16 = vadd.f32 %v9943_v13, %v2175_v14  ;;  %v922_v17 = vpop.f32.mrb[60].mxu0  ;;  %v1515_v20 = vpop.f32.mrb[60].mxu1  ;;  %v2409_v27 = vmax.f32 %v2297_v62, 0.0 }
 0x166   :  { %v2410_v29 = vmax.f32 %v2298_v15, 0.0  ;;  %v1980_v30 = vmax.f32 %v10144_v32, %v922_v17  ;;  %v1982_v22 = vmax.f32 %v1495_v33, %v1515_v20  ;;  %v924_v23 = vpop.f32.mrb[61].mxu0  ;;  %v1517_v25 = vpop.f32.mrb[61].mxu1 }
 0x167   :  { %v2411_v36 = vmax.f32 %v2299_v16, 0.0  ;;  %v1981_v41 = vmax.f32 %v10146_v34, %v924_v23  ;;  %v1983_v42 = vmax.f32 %v10148_v35, %v1517_v25  ;;  %v926_v43 = vpop.f32.mrb[62].mxu0  ;;  %v1519_v44 = vpop.f32.mrb[62].mxu1 }
 0x168   :  { %v10188_v45 = vpack.c.bf16 %v2410_v29, %v2408_v24  ;;  %v2176_v47 = vmax.f32 %v1980_v30, %v1982_v22  ;;  %v1984_v32 = vmax.f32 %v10153_v37, %v926_v43  ;;  %v1986_v33 = vmax.f32 %v10155_v38, %v1519_v44  ;;  %v928_v49 = vpop.f32.mrb[63].mxu0  ;;  %v1521_v57 = vpop.f32.mrb[63].mxu1  ;;  %v9085_v30 = vld [vmem:[%s11943_s0 + $0x160] sm:$0xff]  }
 0x169   :  { %v10192_v2 = vpack.c.bf16 %v2411_v36, %v2409_v27  ;;  %v2177_v51 = vmax.f32 %v1981_v41, %v1983_v42  ;;  %v1985_v53 = vmax.f32 %v10157_v39, %v928_v49  ;;  %v1987_v34 = vmax.f32 %v10159_v40, %v1521_v57 }
 0x16a   :  { %v2300_v35 = vadd.f32 %v9936_v5, %v2176_v47  ;;  %v2178_v3 = vmax.f32 %v1984_v32, %v1986_v33  ;;  %7580 = vmatmul.mubr.msk.bf16.gmra.mrb[168].mxu0 %vm569_vm0, %v9077_v31  ;;  %7636 = vmatmul.mubr.msk.bf16.gmra.mrb[168].mxu1 %vm569_vm0, %v9077_v31  ;;  %v9086_v47 = vld [vmem:[%s11943_s0 + $0x168] sm:$0xff]  }
 0x16b   :  { %v2301_v37 = vadd.f32 %v9943_v13, %v2177_v51  ;;  %v2179_v4 = vmax.f32 %v1985_v53, %v1987_v34  ;;  %1200 = vmatprep.mubr.bf16.mxu0 %v9427_v1  ;;  %1793 = vmatprep.mubr.bf16.mxu1 %v9427_v1 }
 0x16c   :  { %v2302_v38 = vadd.f32 %v9936_v5, %v2178_v3  ;;  %v2412_v54 = vmax.f32 %v2300_v35, 0.0 }
 0x16d   :  { %v2303_v39 = vadd.f32 %v9943_v13, %v2179_v4  ;;  %v932_v6 = vpop.f32.mrb[64].mxu0  ;;  %v1525_v40 = vpop.f32.mrb[64].mxu1  ;;  %v2413_v9 = vmax.f32 %v2301_v37, 0.0 }
 0x16e   :  { %v2414_v55 = vmax.f32 %v2302_v38, 0.0  ;;  %v934_v8 = vpop.f32.mrb[65].mxu0  ;;  %v1527_v58 = vpop.f32.mrb[65].mxu1 }
 0x16f   :  { %v2415_v10 = vmax.f32 %v2303_v39, 0.0  ;;  %v936_v11 = vpop.f32.mrb[66].mxu0  ;;  %v1529_v60 = vpop.f32.mrb[66].mxu1 }
 0x170   :  { %v10207_v62 = vpack.c.bf16 %v2414_v55, %v2412_v54  ;;  %v938_v14 = vpop.f32.mrb[67].mxu0  ;;  %v1531_v15 = vpop.f32.mrb[67].mxu1 }
 0x171   :  { %v10209_v16 = vpack.c.bf16 %v2415_v10, %v2413_v9 }
 0x172   :  { %12014 = vst [vmem:[#allocation8_spill] sm:$0xff] %v10207_v62  ;;  %7581 = vmatmul.mubr.msk.bf16.gmra.mrb[172].mxu0 %vm569_vm0, %v9084_v59  ;;  %7637 = vmatmul.mubr.msk.bf16.gmra.mrb[172].mxu1 %vm569_vm0, %v9084_v59 }
 0x173   :  { %12015 = vst [vmem:[#allocation9_spill] sm:$0xff] %v10209_v16  ;;  %1210 = vmatprep.mubr.bf16.mxu0 %v9427_v1  ;;  %1803 = vmatprep.mubr.bf16.mxu1 %v9427_v1 }
 0x175   :  { %v942_v17 = vpop.f32.mrb[68].mxu0  ;;  %v1535_v20 = vpop.f32.mrb[68].mxu1 }
 0x176   :  { %v10215_v24 = vpop.f32.mrb[69].mxu0  ;;  %v1537_v29 = vpop.f32.mrb[69].mxu1 }
 0x177   :  { %v10220_v22 = vpop.f32.mrb[70].mxu0  ;;  %v10222_v23 = vpop.f32.mrb[70].mxu1 }
 0x178   :  { %v10224_v25 = vpop.f32.mrb[71].mxu0  ;;  %v10226_v31 = vpop.f32.mrb[71].mxu1 }
 0x17a   :  { %7582 = vmatmul.mubr.msk.bf16.gmra.mrb[176].mxu0 %vm569_vm0, %v9085_v30  ;;  %7638 = vmatmul.mubr.msk.bf16.gmra.mrb[176].mxu1 %vm569_vm0, %v9085_v30  ;;  %v9093_v30 = vld [vmem:[%s11943_s0 + $0x170] sm:$0xff]  }
 0x17b   :  { %1220 = vmatprep.mubr.bf16.mxu0 %v9427_v1  ;;  %1813 = vmatprep.mubr.bf16.mxu1 %v9427_v1 }
 0x17d   :  { %v952_v27 = vpop.f32.mrb[72].mxu0  ;;  %v1545_v36 = vpop.f32.mrb[72].mxu1 }
 0x17e   :  { %v1988_v41 = vmax.f32 %v932_v6, %v952_v27  ;;  %v1990_v42 = vmax.f32 %v1525_v40, %v1545_v36  ;;  %v954_v43 = vpop.f32.mrb[73].mxu0  ;;  %v1547_v44 = vpop.f32.mrb[73].mxu1 }
 0x17f   :  { %v1989_v32 = vmax.f32 %v934_v8, %v954_v43  ;;  %v1991_v33 = vmax.f32 %v1527_v58, %v1547_v44  ;;  %v956_v49 = vpop.f32.mrb[74].mxu0  ;;  %v1549_v57 = vpop.f32.mrb[74].mxu1 }
 0x180   :  { %v2180_v51 = vmax.f32 %v1988_v41, %v1990_v42  ;;  %v1992_v53 = vmax.f32 %v936_v11, %v956_v49  ;;  %v1994_v34 = vmax.f32 %v1529_v60, %v1549_v57  ;;  %v958_v35 = vpop.f32.mrb[75].mxu0  ;;  %v1551_v3 = vpop.f32.mrb[75].mxu1 }
 0x181   :  { %v2181_v37 = vmax.f32 %v1989_v32, %v1991_v33  ;;  %v1993_v4 = vmax.f32 %v938_v14, %v958_v35  ;;  %v1995_v38 = vmax.f32 %v1531_v15, %v1551_v3 }
 0x182   :  { %v2304_v39 = vadd.f32 %v9936_v5, %v2180_v51  ;;  %v2182_v6 = vmax.f32 %v1992_v53, %v1994_v34  ;;  %7583 = vmatmul.mubr.msk.bf16.gmra.mrb[180].mxu0 %vm569_vm0, %v9086_v47  ;;  %7639 = vmatmul.mubr.msk.bf16.gmra.mrb[180].mxu1 %vm569_vm0, %v9086_v47 }
 0x183   :  { %v2305_v40 = vadd.f32 %v9943_v13, %v2181_v37  ;;  %v2183_v54 = vmax.f32 %v1993_v4, %v1995_v38  ;;  %1230 = vmatprep.mubr.bf16.mxu0 %v9427_v1  ;;  %1823 = vmatprep.mubr.bf16.mxu1 %v9427_v1 }
 0x184   :  { %v2306_v55 = vadd.f32 %v9936_v5, %v2182_v6  ;;  %v2416_v9 = vmax.f32 %v2304_v39, 0.0  ;;  %v9094_v6 = vld [vmem:[%s11943_s0 + $0x178] sm:$0xff]  }
 0x185   :  { %v2307_v8 = vadd.f32 %v9943_v13, %v2183_v54  ;;  %v962_v58 = vpop.f32.mrb[76].mxu0  ;;  %v1555_v59 = vpop.f32.mrb[76].mxu1  ;;  %v2417_v27 = vmax.f32 %v2305_v40, 0.0 }
 0x186   :  { %v2418_v10 = vmax.f32 %v2306_v55, 0.0  ;;  %v1996_v11 = vmax.f32 %v942_v17, %v962_v58  ;;  %v1998_v60 = vmax.f32 %v1535_v20, %v1555_v59  ;;  %v964_v14 = vpop.f32.mrb[77].mxu0  ;;  %v1557_v15 = vpop.f32.mrb[77].mxu1 }
 0x187   :  { %v2419_v36 = vmax.f32 %v2307_v8, 0.0  ;;  %v1997_v41 = vmax.f32 %v10215_v24, %v964_v14  ;;  %v1999_v42 = vmax.f32 %v1537_v29, %v1557_v15  ;;  %v966_v43 = vpop.f32.mrb[78].mxu0  ;;  %v1559_v44 = vpop.f32.mrb[78].mxu1 }
 0x188   :  { %v10247_v47 = vpack.c.bf16 %v2418_v10, %v2416_v9  ;;  %v2184_v32 = vmax.f32 %v1996_v11, %v1998_v60  ;;  %v2000_v33 = vmax.f32 %v10220_v22, %v966_v43  ;;  %v2002_v17 = vmax.f32 %v10222_v23, %v1559_v44  ;;  %v968_v20 = vpop.f32.mrb[79].mxu0  ;;  %v1561_v49 = vpop.f32.mrb[79].mxu1 }
 0x189   :  { %v10251_v57 = vpack.c.bf16 %v2419_v36, %v2417_v27  ;;  %v2185_v51 = vmax.f32 %v1997_v41, %v1999_v42  ;;  %v2001_v53 = vmax.f32 %v10224_v25, %v968_v20  ;;  %v2003_v34 = vmax.f32 %v10226_v31, %v1561_v49  ;;  %v9096_v49 = vld [vmem:[%s11943_s0 + $0x188] sm:$0xff]  }
 0x18a   :  { %12016 = vst [vmem:[#allocation10_spill] sm:$0xff] %v10247_v47  ;;  %v2308_v24 = vadd.f32 %v9936_v5, %v2184_v32  ;;  %v2186_v29 = vmax.f32 %v2000_v33, %v2002_v17  ;;  %7584 = vmatmul.mubr.msk.bf16.gmra.mrb[184].mxu0 %vm569_vm0, %v9093_v30  ;;  %7640 = vmatmul.mubr.msk.bf16.gmra.mrb[184].mxu1 %vm569_vm0, %v9093_v30  ;;  %v9095_v30 = vld [vmem:[%s11943_s0 + $0x180] sm:$0xff]  }
 0x18b   :  { %12017 = vst [vmem:[#allocation11_spill] sm:$0xff] %v10251_v57  ;;  %v2309_v22 = vadd.f32 %v9943_v13, %v2185_v51  ;;  %v2187_v35 = vmax.f32 %v2001_v53, %v2003_v34  ;;  %1240 = vmatprep.mubr.bf16.mxu0 %v9427_v1  ;;  %1833 = vmatprep.mubr.bf16.mxu1 %v9427_v1 }
 0x18c   :  { %v2310_v23 = vadd.f32 %v9936_v5, %v2186_v29  ;;  %v2420_v37 = vmax.f32 %v2308_v24, 0.0 }
 0x18d   :  { %v2311_v25 = vadd.f32 %v9943_v13, %v2187_v35  ;;  %v972_v3 = vpop.f32.mrb[80].mxu0  ;;  %v1565_v31 = vpop.f32.mrb[80].mxu1  ;;  %v2421_v40 = vmax.f32 %v2309_v22, 0.0 }
 0x18e   :  { %v2422_v4 = vmax.f32 %v2310_v23, 0.0  ;;  %v974_v38 = vpop.f32.mrb[81].mxu0  ;;  %v1567_v39 = vpop.f32.mrb[81].mxu1 }
 0x18f   :  { %v2423_v54 = vmax.f32 %v2311_v25, 0.0  ;;  %v976_v55 = vpop.f32.mrb[82].mxu0  ;;  %v1569_v8 = vpop.f32.mrb[82].mxu1 }
 0x190   :  { %v10266_v58 = vpack.c.bf16 %v2422_v4, %v2420_v37  ;;  %v978_v59 = vpop.f32.mrb[83].mxu0  ;;  %v1571_v9 = vpop.f32.mrb[83].mxu1 }
 0x191   :  { %v10268_v10 = vpack.c.bf16 %v2423_v54, %v2421_v40 }
 0x192   :  { %7585 = vmatmul.mubr.msk.bf16.gmra.mrb[188].mxu0 %vm569_vm0, %v9094_v6  ;;  %7641 = vmatmul.mubr.msk.bf16.gmra.mrb[188].mxu1 %vm569_vm0, %v9094_v6 }
 0x193   :  { %12018 = vst [vmem:[#allocation12_spill] sm:$0xff] %v10268_v10  ;;  %1250 = vmatprep.mubr.bf16.mxu0 %v9427_v1  ;;  %1843 = vmatprep.mubr.bf16.mxu1 %v9427_v1 }
 0x195   :  { %v982_v11 = vpop.f32.mrb[84].mxu0  ;;  %v1575_v60 = vpop.f32.mrb[84].mxu1 }
 0x196   :  { %v10274_v14 = vpop.f32.mrb[85].mxu0  ;;  %v1577_v15 = vpop.f32.mrb[85].mxu1 }
 0x197   :  { %v10279_v27 = vpop.f32.mrb[86].mxu0  ;;  %v10281_v36 = vpop.f32.mrb[86].mxu1 }
 0x198   :  { %v10283_v41 = vpop.f32.mrb[87].mxu0  ;;  %v10285_v42 = vpop.f32.mrb[87].mxu1 }
 0x19a   :  { %7586 = vmatmul.mubr.msk.bf16.gmra.mrb[192].mxu0 %vm569_vm0, %v9095_v30  ;;  %7642 = vmatmul.mubr.msk.bf16.gmra.mrb[192].mxu1 %vm569_vm0, %v9095_v30 }
 0x19b   :  { %1260 = vmatprep.mubr.bf16.mxu0 %v9427_v1  ;;  %1853 = vmatprep.mubr.bf16.mxu1 %v9427_v1 }
 0x19d   :  { %v992_v43 = vpop.f32.mrb[88].mxu0  ;;  %v1585_v44 = vpop.f32.mrb[88].mxu1 }
 0x19e   :  { %v2004_v32 = vmax.f32 %v972_v3, %v992_v43  ;;  %v2006_v33 = vmax.f32 %v1565_v31, %v1585_v44  ;;  %v994_v17 = vpop.f32.mrb[89].mxu0  ;;  %v1587_v20 = vpop.f32.mrb[89].mxu1 }
 0x19f   :  { %v2005_v51 = vmax.f32 %v974_v38, %v994_v17  ;;  %v2007_v53 = vmax.f32 %v1567_v39, %v1587_v20  ;;  %v996_v34 = vpop.f32.mrb[90].mxu0  ;;  %v1589_v24 = vpop.f32.mrb[90].mxu1 }
 0x1a0   :  { %v2188_v29 = vmax.f32 %v2004_v32, %v2006_v33  ;;  %v2008_v22 = vmax.f32 %v976_v55, %v996_v34  ;;  %v2010_v35 = vmax.f32 %v1569_v8, %v1589_v24  ;;  %v998_v23 = vpop.f32.mrb[91].mxu0  ;;  %v1591_v25 = vpop.f32.mrb[91].mxu1  ;;  %v9103_v33 = vld [vmem:[%s11943_s0 + $0x190] sm:$0xff]  }
 0x1a1   :  { %v2189_v37 = vmax.f32 %v2005_v51, %v2007_v53  ;;  %v2009_v4 = vmax.f32 %v978_v59, %v998_v23  ;;  %v2011_v6 = vmax.f32 %v1571_v9, %v1591_v25 }
 0x1a2   :  { %v2312_v3 = vadd.f32 %v9936_v5, %v2188_v29  ;;  %v2190_v31 = vmax.f32 %v2008_v22, %v2010_v35  ;;  %7587 = vmatmul.mubr.msk.bf16.gmra.mrb[196].mxu0 %vm569_vm0, %v9096_v49  ;;  %7643 = vmatmul.mubr.msk.bf16.gmra.mrb[196].mxu1 %vm569_vm0, %v9096_v49 }
 0x1a3   :  { %v2313_v38 = vadd.f32 %v9943_v13, %v2189_v37  ;;  %v2191_v39 = vmax.f32 %v2009_v4, %v2011_v6  ;;  %1270 = vmatprep.mubr.bf16.mxu0 %v9427_v1  ;;  %1863 = vmatprep.mubr.bf16.mxu1 %v9427_v1 }
 0x1a4   :  { %v2314_v40 = vadd.f32 %v9936_v5, %v2190_v31  ;;  %v2424_v59 = vmax.f32 %v2312_v3, 0.0 }
 0x1a5   :  { %v2315_v54 = vadd.f32 %v9943_v13, %v2191_v39  ;;  %v1002_v55 = vpop.f32.mrb[92].mxu0  ;;  %v1595_v8 = vpop.f32.mrb[92].mxu1  ;;  %v2425_v17 = vmax.f32 %v2313_v38, 0.0 }
 0x1a6   :  { %v2426_v9 = vmax.f32 %v2314_v40, 0.0  ;;  %v2012_v30 = vmax.f32 %v982_v11, %v1002_v55  ;;  %v2014_v43 = vmax.f32 %v1575_v60, %v1595_v8  ;;  %v1004_v44 = vpop.f32.mrb[93].mxu0  ;;  %v1597_v32 = vpop.f32.mrb[93].mxu1 }
 0x1a7   :  { %v2427_v20 = vmax.f32 %v2315_v54, 0.0  ;;  %v2013_v49 = vmax.f32 %v10274_v14, %v1004_v44  ;;  %v2015_v51 = vmax.f32 %v1577_v15, %v1597_v32  ;;  %v1006_v53 = vpop.f32.mrb[94].mxu0  ;;  %v1599_v34 = vpop.f32.mrb[94].mxu1  ;;  %v9104_v54 = vld [vmem:[%s11943_s0 + $0x198] sm:$0xff]  }
 0x1a8   :  { %v10306_v24 = vpack.c.bf16 %v2426_v9, %v2424_v59  ;;  %v2192_v29 = vmax.f32 %v2012_v30, %v2014_v43  ;;  %v2016_v22 = vmax.f32 %v10279_v27, %v1006_v53  ;;  %v2018_v11 = vmax.f32 %v10281_v36, %v1599_v34  ;;  %v1008_v60 = vpop.f32.mrb[95].mxu0  ;;  %v1601_v35 = vpop.f32.mrb[95].mxu1 }
 0x1a9   :  { %v10310_v23 = vpack.c.bf16 %v2427_v20, %v2425_v17  ;;  %v2193_v25 = vmax.f32 %v2013_v49, %v2015_v51  ;;  %v2017_v37 = vmax.f32 %v10283_v41, %v1008_v60  ;;  %v2019_v4 = vmax.f32 %v10285_v42, %v1601_v35  ;;  %v9105_v51 = vld [vmem:[%s11943_s0 + $0x1a0] sm:$0xff]  }
 0x1aa   :  { %v2316_v14 = vadd.f32 %v9936_v5, %v2192_v29  ;;  %v2194_v15 = vmax.f32 %v2016_v22, %v2018_v11  ;;  %7588 = vmatmul.mubr.msk.bf16.gmra.mrb[200].mxu0 %vm569_vm0, %v9103_v33  ;;  %7644 = vmatmul.mubr.msk.bf16.gmra.mrb[200].mxu1 %vm569_vm0, %v9103_v33 }
 0x1ab   :  { %v2317_v27 = vadd.f32 %v9943_v13, %v2193_v25  ;;  %v2195_v6 = vmax.f32 %v2017_v37, %v2019_v4  ;;  %1280 = vmatprep.mubr.bf16.mxu0 %v9427_v1  ;;  %1873 = vmatprep.mubr.bf16.mxu1 %v9427_v1 }
 0x1ac   :  { %v2318_v36 = vadd.f32 %v9936_v5, %v2194_v15  ;;  %v2428_v31 = vmax.f32 %v2316_v14, 0.0  ;;  %v9112_v14 = vld [vmem:[%s11943_s0 + $0x1a8] sm:$0xff]  }
 0x1ad   :  { %v2319_v41 = vadd.f32 %v9943_v13, %v2195_v6  ;;  %v1012_v3 = vpop.f32.mrb[96].mxu0  ;;  %v1605_v42 = vpop.f32.mrb[96].mxu1  ;;  %v2429_v55 = vmax.f32 %v2317_v27, 0.0 }
 0x1ae   :  { %v2430_v38 = vmax.f32 %v2318_v36, 0.0  ;;  %v1014_v39 = vpop.f32.mrb[97].mxu0  ;;  %v1607_v40 = vpop.f32.mrb[97].mxu1 }
 0x1af   :  { %v2431_v8 = vmax.f32 %v2319_v41, 0.0  ;;  %v1016_v59 = vpop.f32.mrb[98].mxu0  ;;  %v1609_v9 = vpop.f32.mrb[98].mxu1 }
 0x1b0   :  { %v10325_v30 = vpack.c.bf16 %v2430_v38, %v2428_v31  ;;  %v1018_v43 = vpop.f32.mrb[99].mxu0  ;;  %v1611_v44 = vpop.f32.mrb[99].mxu1 }
 0x1b1   :  { %v10327_v32 = vpack.c.bf16 %v2431_v8, %v2429_v55 }
 0x1b2   :  { %12019 = vst [vmem:[#allocation13_spill] sm:$0xff] %v10325_v30  ;;  %7589 = vmatmul.mubr.msk.bf16.gmra.mrb[204].mxu0 %vm569_vm0, %v9104_v54  ;;  %7645 = vmatmul.mubr.msk.bf16.gmra.mrb[204].mxu1 %vm569_vm0, %v9104_v54 }
 0x1b3   :  { %1290 = vmatprep.mubr.bf16.mxu0 %v9427_v1  ;;  %1883 = vmatprep.mubr.bf16.mxu1 %v9427_v1 }
 0x1b5   :  { %v1022_v33 = vpop.f32.mrb[100].mxu0  ;;  %v1615_v17 = vpop.f32.mrb[100].mxu1 }
 0x1b6   :  { %v10333_v20 = vpop.f32.mrb[101].mxu0  ;;  %v1617_v49 = vpop.f32.mrb[101].mxu1 }
 0x1b7   :  { %v10338_v53 = vpop.f32.mrb[102].mxu0  ;;  %v10340_v34 = vpop.f32.mrb[102].mxu1 }
 0x1b8   :  { %v10342_v29 = vpop.f32.mrb[103].mxu0  ;;  %v10344_v22 = vpop.f32.mrb[103].mxu1 }
 0x1ba   :  { %7590 = vmatmul.mubr.msk.bf16.gmra.mrb[208].mxu0 %vm569_vm0, %v9105_v51  ;;  %7646 = vmatmul.mubr.msk.bf16.gmra.mrb[208].mxu1 %vm569_vm0, %v9105_v51 }
 0x1bb   :  { %1300 = vmatprep.mubr.bf16.mxu0 %v9427_v1  ;;  %1893 = vmatprep.mubr.bf16.mxu1 %v9427_v1 }
 0x1bd   :  { %v1032_v11 = vpop.f32.mrb[104].mxu0  ;;  %v1625_v60 = vpop.f32.mrb[104].mxu1 }
 0x1be   :  { %v2020_v35 = vmax.f32 %v1012_v3, %v1032_v11  ;;  %v2022_v25 = vmax.f32 %v1605_v42, %v1625_v60  ;;  %v1034_v37 = vpop.f32.mrb[105].mxu0  ;;  %v1627_v4 = vpop.f32.mrb[105].mxu1 }
 0x1bf   :  { %v2021_v15 = vmax.f32 %v1014_v39, %v1034_v37  ;;  %v2023_v27 = vmax.f32 %v1607_v40, %v1627_v4  ;;  %v1036_v6 = vpop.f32.mrb[106].mxu0  ;;  %v1629_v36 = vpop.f32.mrb[106].mxu1 }
 0x1c0   :  { %v2196_v41 = vmax.f32 %v2020_v35, %v2022_v25  ;;  %v2024_v31 = vmax.f32 %v1016_v59, %v1036_v6  ;;  %v2026_v38 = vmax.f32 %v1609_v9, %v1629_v36  ;;  %v1038_v54 = vpop.f32.mrb[107].mxu0  ;;  %v1631_v55 = vpop.f32.mrb[107].mxu1 }
 0x1c1   :  { %v2197_v8 = vmax.f32 %v2021_v15, %v2023_v27  ;;  %v2025_v51 = vmax.f32 %v1018_v43, %v1038_v54  ;;  %v2027_v63 = vmax.f32 %v1611_v44, %v1631_v55 }
 0x1c2   :  { %v2320_v3 = vadd.f32 %v9936_v5, %v2196_v41  ;;  %v2198_v42 = vmax.f32 %v2024_v31, %v2026_v38  ;;  %7591 = vmatmul.mubr.msk.bf16.gmra.mrb[212].mxu0 %vm569_vm0, %v9112_v14  ;;  %7647 = vmatmul.mubr.msk.bf16.gmra.mrb[212].mxu1 %vm569_vm0, %v9112_v14 }
 0x1c3   :  { %v2321_v39 = vadd.f32 %v9943_v13, %v2197_v8  ;;  %v2199_v40 = vmax.f32 %v2025_v51, %v2027_v63  ;;  %1310 = vmatprep.mubr.bf16.mxu0 %v9427_v1  ;;  %1903 = vmatprep.mubr.bf16.mxu1 %v9427_v1  ;;  %v9113_v63 = vld [vmem:[%s11943_s0 + $0x1b0] sm:$0xff]  }
 0x1c4   :  { %v2322_v59 = vadd.f32 %v9936_v5, %v2198_v42  ;;  %v2432_v11 = vmax.f32 %v2320_v3, 0.0 }
 0x1c5   :  { %v2323_v9 = vadd.f32 %v9943_v13, %v2199_v40  ;;  %v1042_v43 = vpop.f32.mrb[108].mxu0  ;;  %v1635_v44 = vpop.f32.mrb[108].mxu1  ;;  %v2433_v14 = vmax.f32 %v2321_v39, 0.0 }
 0x1c6   :  { %v2434_v60 = vmax.f32 %v2322_v59, 0.0  ;;  %v2028_v35 = vmax.f32 %v1022_v33, %v1042_v43  ;;  %v2030_v25 = vmax.f32 %v1615_v17, %v1635_v44  ;;  %v1044_v37 = vpop.f32.mrb[109].mxu0  ;;  %v1637_v4 = vpop.f32.mrb[109].mxu1 }
 0x1c7   :  { %v2435_v15 = vmax.f32 %v2323_v9, 0.0  ;;  %v2029_v27 = vmax.f32 %v10333_v20, %v1044_v37  ;;  %v2031_v6 = vmax.f32 %v1617_v49, %v1637_v4  ;;  %v1046_v36 = vpop.f32.mrb[110].mxu0  ;;  %v1639_v41 = vpop.f32.mrb[110].mxu1 }
 0x1c8   :  { %v10365_v31 = vpack.c.bf16 %v2434_v60, %v2432_v11  ;;  %v2200_v38 = vmax.f32 %v2028_v35, %v2030_v25  ;;  %v2032_v54 = vmax.f32 %v10338_v53, %v1046_v36  ;;  %v2034_v33 = vmax.f32 %v10340_v34, %v1639_v41  ;;  %v1048_v17 = vpop.f32.mrb[111].mxu0  ;;  %v1641_v55 = vpop.f32.mrb[111].mxu1  ;;  %v9114_v11 = vld [vmem:[%s11943_s0 + $0x1b8] sm:$0xff]  }
 0x1c9   :  { %v10369_v8 = vpack.c.bf16 %v2435_v15, %v2433_v14  ;;  %v2201_v51 = vmax.f32 %v2029_v27, %v2031_v6  ;;  %v2033_v3 = vmax.f32 %v10342_v29, %v1048_v17  ;;  %v2035_v42 = vmax.f32 %v10344_v22, %v1641_v55  ;;  %v9115_v17 = vld [vmem:[%s11944_s3 + $0x200] ss:$16 sps:$4 sm:$0xff]   ;;  %v9118_v55 = vld [vmem:[%s11944_s3 + $0x208] ss:$16 sps:$4 sm:$0xff]  }
 0x1ca   :  { %12020 = vst [vmem:[#allocation14_spill] sm:$0xff] %v10365_v31  ;;  %v2324_v20 = vadd.f32 %v9936_v5, %v2200_v38  ;;  %v2202_v49 = vmax.f32 %v2032_v54, %v2034_v33  ;;  %7592 = vmatmul.mubr.msk.bf16.gmra.mrb[216].mxu0 %vm569_vm0, %v9113_v63  ;;  %7648 = vmatmul.mubr.msk.bf16.gmra.mrb[216].mxu1 %vm569_vm0, %v9113_v63 }
 0x1cb   :  { %12021 = vst [vmem:[#allocation15_spill] sm:$0xff] %v10369_v8  ;;  %v2325_v53 = vadd.f32 %v9943_v13, %v2201_v51  ;;  %v2203_v39 = vmax.f32 %v2033_v3, %v2035_v42  ;;  %1320 = vmatprep.mubr.bf16.mxu0 %v9427_v1  ;;  %1913 = vmatprep.mubr.bf16.mxu1 %v9427_v1  ;;  %v9123_v51 = vld [vmem:[%s11944_s3 + $0x224] ss:$16 sps:$4 sm:$0xff]   ;;  %v9126_v3 = vld [vmem:[%s11944_s3 + $0x22c] ss:$16 sps:$4 sm:$0xff]  }
 0x1cc   :  { %v2326_v34 = vadd.f32 %v9936_v5, %v2202_v49  ;;  %v2436_v59 = vmax.f32 %v2324_v20, 0.0  ;;  %v9121_v42 = vld [vmem:[%s11944_s3 + $0x220] ss:$16 sps:$4 sm:$0xff]   ;;  %v9124_v20 = vld [vmem:[%s11944_s3 + $0x228] ss:$16 sps:$4 sm:$0xff]  }
 0x1cd   :  { %v2327_v29 = vadd.f32 %v9943_v13, %v2203_v39  ;;  %v1052_v40 = vpop.f32.mrb[112].mxu0  ;;  %v1645_v22 = vpop.f32.mrb[112].mxu1  ;;  %v2437_v60 = vmax.f32 %v2325_v53, 0.0  ;;  %v9129_v39 = vld [vmem:[%s11944_s3 + $0x244] ss:$16 sps:$4 sm:$0xff]  }
 0x1ce   :  { %v2438_v9 = vmax.f32 %v2326_v34, 0.0  ;;  %v1054_v43 = vpop.f32.mrb[113].mxu0  ;;  %v1647_v44 = vpop.f32.mrb[113].mxu1  ;;  %v9132_v34 = vld [vmem:[%s11944_s3 + $0x24c] ss:$16 sps:$4 sm:$0xff]  }
 0x1cf   :  { %v2439_v35 = vmax.f32 %v2327_v29, 0.0  ;;  %v1056_v25 = vpop.f32.mrb[114].mxu0  ;;  %v1649_v37 = vpop.f32.mrb[114].mxu1 }
 0x1d0   :  { %v10384_v4 = vpack.c.bf16 %v2438_v9, %v2436_v59  ;;  %v10386_v1 = vpop.f32.mrb[115].mxu0  ;;  %v1651_v63 = vpop.f32.mrb[115].mxu1 }
 0x1d1   :  { %v10388_v14 = vpack.c.bf16 %v2439_v35, %v2437_v60 }
 0x1d2   :  { %7593 = vmatmul.mubr.msk.bf16.gmra.mrb[220].mxu0 %vm569_vm0, %v9114_v11  ;;  %7649 = vmatmul.mubr.msk.bf16.gmra.mrb[220].mxu1 %vm569_vm0, %v9114_v11 }
 0x1d3   :  { %12022 = vst [vmem:[#allocation16_spill] sm:$0xff] %v10388_v14  ;;  %3033 = vmatprep.mubr.bf16.mxu0 %v9966_v52  ;;  %3326 = vmatprep.mubr.bf16.mxu1 %v9966_v52 }
 0x1d5   :  { %v10394_v15 = vpop.f32.mrb[116].mxu0  ;;  %v10396_v27 = vpop.f32.mrb[116].mxu1 }
 0x1d6   :  { %v10398_v6 = vpop.f32.mrb[117].mxu0  ;;  %v10400_v36 = vpop.f32.mrb[117].mxu1 }
 0x1d7   :  { %v10402_v41 = vpop.f32.mrb[118].mxu0  ;;  %v10404_v38 = vpop.f32.mrb[118].mxu1 }
 0x1d8   :  { %v10406_v54 = vpop.f32.mrb[119].mxu0  ;;  %v10408_v33 = vpop.f32.mrb[119].mxu1 }
 0x1da   :  { %3034 = vmatmul.mubr.bf16.vlgmr.msra.gmra.mrb[224].mxu0 %v9962_v48  ;;  %3327 = vmatmul.mubr.bf16.vlgmr.msra.gmra.mrb[224].mxu1 %v9962_v48  ;;  %v9127_v48 = vld [vmem:[%s11944_s3 + $0x240] ss:$16 sps:$4 sm:$0xff]  }
 0x1db   :  { %3043 = vmatprep.mubr.bf16.mxu0 %v9991_v18  ;;  %3336 = vmatprep.mubr.bf16.mxu1 %v9991_v18 }
 0x1dc   :  { %3908 = vmatpush1.bf16.msra.mxu0 %v9115_v17  ;;  %4221 = vmatpush1.bf16.msra.mxu1 %v9118_v55 }
 0x1dd   :  { %v1072_v49 = vpop.f32.mrb[120].mxu0  ;;  %v1665_v53 = vpop.f32.mrb[120].mxu1  ;;  %3909 = vmatprep.subr.bf16.mxu0 %v9123_v51  ;;  %4222 = vmatprep.subr.bf16.mxu1 %v9126_v3 }
 0x1de   :  { %v2036_v29 = vmax.f32 %v1052_v40, %v1072_v49  ;;  %v2038_v59 = vmax.f32 %v1645_v22, %v1665_v53  ;;  %v1074_v9 = vpop.f32.mrb[121].mxu0  ;;  %v1667_v11 = vpop.f32.mrb[121].mxu1  ;;  %v9130_v40 = vld [vmem:[%s11944_s3 + $0x248] ss:$16 sps:$4 sm:$0xff]  }
 0x1df   :  { %v2037_v60 = vmax.f32 %v1054_v43, %v1074_v9  ;;  %v2039_v35 = vmax.f32 %v1647_v44, %v1667_v11  ;;  %v1076_v17 = vpop.f32.mrb[122].mxu0  ;;  %v1669_v55 = vpop.f32.mrb[122].mxu1 }
 0x1e0   :  { %v2204_v61 = vmax.f32 %v2036_v29, %v2038_v59  ;;  %v2040_v56 = vmax.f32 %v1056_v25, %v1076_v17  ;;  %v2042_v51 = vmax.f32 %v1649_v37, %v1669_v55  ;;  %v1078_v3 = vpop.f32.mrb[123].mxu0  ;;  %v1671_v18 = vpop.f32.mrb[123].mxu1  ;;  %3910 = vmatpush1.bf16.msra.mxu0 %v9121_v42  ;;  %4223 = vmatpush1.bf16.msra.mxu1 %v9124_v20  ;;  %v9135_v25 = vld [vmem:[%s11944_s3 + $0x264] ss:$16 sps:$4 sm:$0xff]   ;;  %v9138_v37 = vld [vmem:[%s11944_s3 + $0x26c] ss:$16 sps:$4 sm:$0xff]  }
 0x1e1   :  { %v2205_v22 = vmax.f32 %v2037_v60, %v2039_v35  ;;  %v2041_v43 = vmax.f32 %v10386_v1, %v1078_v3  ;;  %v2043_v44 = vmax.f32 %v1651_v63, %v1671_v18  ;;  %3911 = vmatprep.subr.bf16.mxu0 %v9129_v39  ;;  %4224 = vmatprep.subr.bf16.mxu1 %v9132_v34  ;;  %v9136_v39 = vld [vmem:[%s11944_s3 + $0x268] ss:$16 sps:$4 sm:$0xff]  }
 0x1e2   :  { %v2328_v42 = vadd.f32 %v9936_v5, %v2204_v61  ;;  %v2206_v20 = vmax.f32 %v2040_v56, %v2042_v51  ;;  %3044 = vmatmul.mubr.bf16.gmra.mrb[228].mxu0 %v9993_v19  ;;  %3337 = vmatmul.mubr.bf16.gmra.mrb[228].mxu1 %v9993_v19  ;;  %v9133_v61 = vld [vmem:[%s11944_s3 + $0x260] ss:$16 sps:$4 sm:$0xff]  }
 0x1e3   :  { %v2329_v1 = vadd.f32 %v9943_v13, %v2205_v22  ;;  %v2207_v18 = vmax.f32 %v2041_v43, %v2043_v44  ;;  %3053 = vmatprep.mubr.bf16.mxu0 %v10035_v21  ;;  %3346 = vmatprep.mubr.bf16.mxu1 %v10035_v21 }
 0x1e4   :  { %v2330_v63 = vadd.f32 %v9936_v5, %v2206_v20  ;;  %3912 = vmatpush1.bf16.msra.mxu0 %v9127_v48  ;;  %4225 = vmatpush1.bf16.msra.mxu1 %v9130_v40  ;;  %v2440_v34 = vmax.f32 %v2328_v42, 0.0  ;;  %v9142_v20 = vld [vmem:[%s11944_s3 + $0x288] ss:$16 sps:$4 sm:$0xff]  }
 0x1e5   :  { %v2331_v56 = vadd.f32 %v9943_v13, %v2207_v18  ;;  %v1082_v49 = vpop.f32.mrb[124].mxu0  ;;  %v1675_v53 = vpop.f32.mrb[124].mxu1  ;;  %3913 = vmatprep.subr.bf16.mxu0 %v9135_v25  ;;  %4226 = vmatprep.subr.bf16.mxu1 %v9138_v37  ;;  %v2441_v60 = vmax.f32 %v2329_v1, 0.0 }
 0x1e6   :  { %v2442_v29 = vmax.f32 %v2330_v63, 0.0  ;;  %v2044_v59 = vmax.f32 %v10394_v15, %v1082_v49  ;;  %v2046_v48 = vmax.f32 %v10396_v27, %v1675_v53  ;;  %v1084_v9 = vpop.f32.mrb[125].mxu0  ;;  %v1677_v11 = vpop.f32.mrb[125].mxu1  ;;  %v9141_v27 = vld [vmem:[%s11944_s3 + $0x284] ss:$16 sps:$4 sm:$0xff]  }
 0x1e7   :  { %v2443_v35 = vmax.f32 %v2331_v56, 0.0  ;;  %v2045_v17 = vmax.f32 %v10398_v6, %v1084_v9  ;;  %v2047_v55 = vmax.f32 %v10400_v36, %v1677_v11  ;;  %v1086_v51 = vpop.f32.mrb[126].mxu0  ;;  %v1679_v3 = vpop.f32.mrb[126].mxu1  ;;  %v9144_v6 = vld [vmem:[%s11944_s3 + $0x28c] ss:$16 sps:$4 sm:$0xff]  }
 0x1e8   :  { %v10469_v40 = vpack.c.bf16 %v2442_v29, %v2440_v34  ;;  %v2208_v22 = vmax.f32 %v2044_v59, %v2046_v48  ;;  %v2048_v43 = vmax.f32 %v10402_v41, %v1086_v51  ;;  %v2050_v44 = vmax.f32 %v10404_v38, %v1679_v3  ;;  %v1088_v15 = vpop.f32.mrb[127].mxu0  ;;  %v1681_v25 = vpop.f32.mrb[127].mxu1  ;;  %3914 = vmatpush1.bf16.msra.mxu0 %v9133_v61  ;;  %v9139_v38 = vld [vmem:[%s11944_s3 + $0x280] ss:$16 sps:$4 sm:$0xff]   ;;  %v9148_v29 = vld [vmem:[%s11944_s3 + $0x2a8] ss:$16 sps:$4 sm:$0xff]  }
 0x1e9   :  { %v10479_v36 = vpack.c.bf16 %v2443_v35, %v2441_v60  ;;  %v2209_v37 = vmax.f32 %v2045_v17, %v2047_v55  ;;  %v2049_v42 = vmax.f32 %v10406_v54, %v1088_v15  ;;  %v2051_v41 = vmax.f32 %v10408_v33, %v1681_v25  ;;  %4227 = vmatpush1.bf16.msra.mxu1 %v9136_v39  ;;  %v9147_v54 = vld [vmem:[%s11944_s3 + $0x2a4] ss:$16 sps:$4 sm:$0xff]   ;;  %v9150_v33 = vld [vmem:[%s11944_s3 + $0x2ac] ss:$16 sps:$4 sm:$0xff]   ;;  %v9145_v34 = vld [vmem:[%s11944_s3 + $0x2a0] ss:$16 sps:$4 sm:$0xff]  }
 0x1ea   :  { %v2332_v1 = vadd.f32 %v9936_v5, %v2208_v22  ;;  %v2210_v18 = vmax.f32 %v2048_v43, %v2050_v44  ;;  %3054 = vmatmul.mubr.bf16.gmra.mrb[232].mxu0 %v10031_v12  ;;  %3347 = vmatmul.mubr.bf16.gmra.mrb[232].mxu1 %v10031_v12  ;;  %v9153_v43 = vld [vmem:[%s11944_s3 + $0x2c4] ss:$16 sps:$4 sm:$0xff]   ;;  %v9156_v44 = vld [vmem:[%s11944_s3 + $0x2cc] ss:$16 sps:$4 sm:$0xff]   ;;  %v9151_v25 = vld [vmem:[%s11944_s3 + $0x2c0] ss:$16 sps:$4 sm:$0xff]  }
 0x1eb   :  { %v2333_v63 = vadd.f32 %v9943_v13, %v2209_v37  ;;  %v2211_v61 = vmax.f32 %v2049_v42, %v2051_v41  ;;  %3063 = vmatprep.mubr.bf16.mxu0 %v10064_v50  ;;  %3356 = vmatprep.mubr.bf16.mxu1 %v10064_v50  ;;  %v9162_v37 = vld [vmem:[%s11944_s3 + $0x2ec] ss:$16 sps:$4 sm:$0xff]  }
 0x1ec   :  { %v2334_v56 = vadd.f32 %v9936_v5, %v2210_v18  ;;  %3915 = vmatprep.subr.bf16.mxu0 %v9141_v27  ;;  %4228 = vmatprep.subr.bf16.mxu1 %v9144_v6  ;;  %v2444_v59 = vmax.f32 %v2332_v1, 0.0  ;;  %v9154_v27 = vld [vmem:[%s11944_s3 + $0x2c8] ss:$16 sps:$4 sm:$0xff]   ;;  %v9159_v6 = vld [vmem:[%s11944_s3 + $0x2e4] ss:$16 sps:$4 sm:$0xff]  }
 0x1ed   :  { %v2335_v49 = vadd.f32 %v9943_v13, %v2211_v61  ;;  %v10503_v53 = vpop.f32.mrb[128].mxu0  ;;  %v10505_v39 = vpop.f32.mrb[128].mxu1  ;;  %3916 = vmatpush1.bf16.msra.mxu0 %v9139_v38  ;;  %4229 = vmatpush1.bf16.msra.mxu1 %v9142_v20  ;;  %v2445_v60 = vmax.f32 %v2333_v63, 0.0  ;;  %v9157_v38 = vld [vmem:[%s11944_s3 + $0x2e0] ss:$16 sps:$4 sm:$0xff]  }
 0x1ee   :  { %v2446_v48 = vmax.f32 %v2334_v56, 0.0  ;;  %v10513_v9 = vpop.f32.mrb[129].mxu0  ;;  %v10515_v11 = vpop.f32.mrb[129].mxu1  ;;  %3917 = vmatprep.subr.bf16.mxu0 %v9147_v54  ;;  %4230 = vmatprep.subr.bf16.mxu1 %v9150_v33  ;;  %v9160_v20 = vld [vmem:[%s11944_s3 + $0x2e8] ss:$16 sps:$4 sm:$0xff]  }
 0x1ef   :  { %v2447_v35 = vmax.f32 %v2335_v49, 0.0  ;;  %v10517_v17 = vpop.f32.mrb[130].mxu0  ;;  %v10519_v55 = vpop.f32.mrb[130].mxu1  ;;  %v9165_v56 = vld [vmem:[%s11944_s3 + $0x304] ss:$16 sps:$4 sm:$0xff]  }
 0x1f0   :  { %v10521_v51 = vpack.c.bf16 %v2446_v48, %v2444_v59  ;;  %v10523_v3 = vpop.f32.mrb[131].mxu0  ;;  %v10525_v22 = vpop.f32.mrb[131].mxu1  ;;  %v9168_v49 = vld [vmem:[%s11944_s3 + $0x30c] ss:$16 sps:$4 sm:$0xff]   ;;  %v9171_v59 = vld [vmem:[%s11944_s3 + $0x324] ss:$16 sps:$4 sm:$0xff]  }
 0x1f1   :  { %v10533_v15 = vpack.c.bf16 %v2447_v35, %v2445_v60  ;;  %3918 = vmatpush1.bf16.msra.mxu0 %v9145_v34  ;;  %4231 = vmatpush1.bf16.msra.mxu1 %v9148_v29  ;;  %v9163_v34 = vld [vmem:[%s11944_s3 + $0x300] ss:$16 sps:$4 sm:$0xff]   ;;  %v9166_v29 = vld [vmem:[%s11944_s3 + $0x308] ss:$16 sps:$4 sm:$0xff]   ;;  %v9174_v48 = vld [vmem:[%s11944_s3 + $0x32c] ss:$16 sps:$4 sm:$0xff]  }
 0x1f2   :  { %12023 = vst [vmem:[#allocation17_spill] sm:$0xff] %v10521_v51  ;;  %3064 = vmatmul.mubr.bf16.gmra.mrb[236].mxu0 %v10062_v46  ;;  %3357 = vmatmul.mubr.bf16.gmra.mrb[236].mxu1 %v10062_v46 }
 0x1f3   :  { %3073 = vmatprep.mubr.bf16.mxu0 %v10118_v7  ;;  %3366 = vmatprep.mubr.bf16.mxu1 %v10118_v7 }
 0x1f4   :  { %3919 = vmatprep.subr.bf16.mxu0 %v9153_v43  ;;  %4232 = vmatprep.subr.bf16.mxu1 %v9156_v44  ;;  %v9169_v43 = vld [vmem:[%s11944_s3 + $0x320] ss:$16 sps:$4 sm:$0xff]   ;;  %v9172_v44 = vld [vmem:[%s11944_s3 + $0x328] ss:$16 sps:$4 sm:$0xff]  }
 0x1f5   :  { %v10551_v42 = vpop.f32.mrb[132].mxu0  ;;  %v10553_v41 = vpop.f32.mrb[132].mxu1  ;;  %3920 = vmatpush1.bf16.msra.mxu0 %v9151_v25  ;;  %4233 = vmatpush1.bf16.msra.mxu1 %v9154_v27 }
 0x1f6   :  { %v10561_v1 = vpop.f32.mrb[133].mxu0  ;;  %v10563_v18 = vpop.f32.mrb[133].mxu1  ;;  %3921 = vmatprep.subr.bf16.mxu0 %v9159_v6  ;;  %4234 = vmatprep.subr.bf16.mxu1 %v9162_v37 }
 0x1f7   :  { %v10565_v54 = vpop.f32.mrb[134].mxu0  ;;  %v10567_v33 = vpop.f32.mrb[134].mxu1 }
 0x1f8   :  { %v10569_v63 = vpop.f32.mrb[135].mxu0  ;;  %v10571_v61 = vpop.f32.mrb[135].mxu1 }
 0x1f9   :  { %3922 = vmatpush1.bf16.msra.mxu0 %v9157_v38  ;;  %4235 = vmatpush1.bf16.msra.mxu1 %v9160_v20 }
 0x1fa   :  { %3074 = vmatmul.mubr.bf16.gmra.mrb[240].mxu0 %v10111_v0  ;;  %3367 = vmatmul.mubr.bf16.gmra.mrb[240].mxu1 %v10111_v0 }
 0x1fb   :  { %3083 = vmatprep.mubr.bf16.mxu0 %v10138_v28  ;;  %3376 = vmatprep.mubr.bf16.mxu1 %v10138_v28 }
 0x1fc   :  { %3923 = vmatprep.subr.bf16.mxu0 %v9165_v56  ;;  %4236 = vmatprep.subr.bf16.mxu1 %v9168_v49 }
 0x1fd   :  { %v1112_v60 = vpop.f32.mrb[136].mxu0  ;;  %v1705_v35 = vpop.f32.mrb[136].mxu1  ;;  %3924 = vmatpush1.bf16.msra.mxu0 %v9163_v34  ;;  %4237 = vmatpush1.bf16.msra.mxu1 %v9166_v29 }
 0x1fe   :  { %v2052_v25 = vmax.f32 %v10503_v53, %v1112_v60  ;;  %v2054_v27 = vmax.f32 %v10505_v39, %v1705_v35  ;;  %v1114_v6 = vpop.f32.mrb[137].mxu0  ;;  %v1707_v37 = vpop.f32.mrb[137].mxu1  ;;  %3925 = vmatprep.subr.bf16.mxu0 %v9171_v59  ;;  %4238 = vmatprep.subr.bf16.mxu1 %v9174_v48  ;;  %v9177_v53 = vld [vmem:[%s11944_s3 + $0x344] ss:$16 sps:$4 sm:$0xff]   ;;  %v9180_v39 = vld [vmem:[%s11944_s3 + $0x34c] ss:$16 sps:$4 sm:$0xff]  }
 0x1ff   :  { %v2053_v38 = vmax.f32 %v10513_v9, %v1114_v6  ;;  %v2055_v20 = vmax.f32 %v10515_v11, %v1707_v37  ;;  %v1116_v56 = vpop.f32.mrb[138].mxu0  ;;  %v1709_v49 = vpop.f32.mrb[138].mxu1 }
 0x200   :  { %v2212_v34 = vmax.f32 %v2052_v25, %v2054_v27  ;;  %v2056_v29 = vmax.f32 %v10517_v17, %v1116_v56  ;;  %v2058_v28 = vmax.f32 %v10519_v55, %v1709_v49  ;;  %v1118_v0 = vpop.f32.mrb[139].mxu0  ;;  %v1711_v7 = vpop.f32.mrb[139].mxu1  ;;  %v9175_v17 = vld [vmem:[%s11944_s3 + $0x340] ss:$16 sps:$4 sm:$0xff]   ;;  %v9178_v55 = vld [vmem:[%s11944_s3 + $0x348] ss:$16 sps:$4 sm:$0xff]  }
 0x201   :  { %v2213_v9 = vmax.f32 %v2053_v38, %v2055_v20  ;;  %v2057_v11 = vmax.f32 %v10523_v3, %v1118_v0  ;;  %v2059_v59 = vmax.f32 %v10525_v22, %v1711_v7  ;;  %3926 = vmatpush1.bf16.msra.mxu0 %v9169_v43  ;;  %4239 = vmatpush1.bf16.msra.mxu1 %v9172_v44  ;;  %v9183_v0 = vld [vmem:[%s11944_s3 + $0x364] ss:$16 sps:$4 sm:$0xff]   ;;  %v9186_v7 = vld [vmem:[%s11944_s3 + $0x36c] ss:$16 sps:$4 sm:$0xff]   ;;  %v9181_v25 = vld [vmem:[%s11944_s3 + $0x360] ss:$16 sps:$4 sm:$0xff]  }
 0x202   :  { %v2336_v48 = vadd.f32 %v9936_v5, %v2212_v34  ;;  %v2214_v60 = vmax.f32 %v2056_v29, %v2058_v28  ;;  %3084 = vmatmul.mubr.bf16.gmra.mrb[244].mxu0 %v10136_v26  ;;  %3377 = vmatmul.mubr.bf16.gmra.mrb[244].mxu1 %v10136_v26 }
 0x203   :  { %v2337_v3 = vadd.f32 %v9943_v13, %v2213_v9  ;;  %v2215_v22 = vmax.f32 %v2057_v11, %v2059_v59  ;;  %3093 = vmatprep.mubr.bf16.mxu0 %v10192_v2  ;;  %3386 = vmatprep.mubr.bf16.mxu1 %v10192_v2 }
 0x204   :  { %v2338_v28 = vadd.f32 %v9936_v5, %v2214_v60  ;;  %3927 = vmatprep.subr.bf16.mxu0 %v9177_v53  ;;  %4240 = vmatprep.subr.bf16.mxu1 %v9180_v39  ;;  %v2448_v27 = vmax.f32 %v2336_v48, 0.0  ;;  %v9184_v48 = vld [vmem:[%s11944_s3 + $0x368] ss:$16 sps:$4 sm:$0xff]  }
 0x205   :  { %v2339_v35 = vadd.f32 %v9943_v13, %v2215_v22  ;;  %v1122_v43 = vpop.f32.mrb[140].mxu0  ;;  %v1715_v44 = vpop.f32.mrb[140].mxu1  ;;  %3928 = vmatpush1.bf16.msra.mxu0 %v9175_v17  ;;  %4241 = vmatpush1.bf16.msra.mxu1 %v9178_v55  ;;  %v2449_v49 = vmax.f32 %v2337_v3, 0.0 }
 0x206   :  { %v2450_v6 = vmax.f32 %v2338_v28, 0.0  ;;  %v2060_v37 = vmax.f32 %v10551_v42, %v1122_v43  ;;  %v2062_v38 = vmax.f32 %v10553_v41, %v1715_v44  ;;  %v1124_v20 = vpop.f32.mrb[141].mxu0  ;;  %v1717_v56 = vpop.f32.mrb[141].mxu1  ;;  %3929 = vmatprep.subr.bf16.mxu0 %v9183_v0  ;;  %4242 = vmatprep.subr.bf16.mxu1 %v9186_v7  ;;  %v9190_v43 = vld [vmem:[%s11944_s3 + $0x388] ss:$16 sps:$4 sm:$0xff]  }
 0x207   :  { %v2451_v34 = vmax.f32 %v2339_v35, 0.0  ;;  %v2061_v29 = vmax.f32 %v10561_v1, %v1124_v20  ;;  %v2063_v53 = vmax.f32 %v10563_v18, %v1717_v56  ;;  %v1126_v39 = vpop.f32.mrb[142].mxu0  ;;  %v1719_v9 = vpop.f32.mrb[142].mxu1  ;;  %v9189_v1 = vld [vmem:[%s11944_s3 + $0x384] ss:$16 sps:$4 sm:$0xff]  }
 0x208   :  { %v10642_v11 = vpack.c.bf16 %v2450_v6, %v2448_v27  ;;  %v2216_v59 = vmax.f32 %v2060_v37, %v2062_v38  ;;  %v2064_v17 = vmax.f32 %v10565_v54, %v1126_v39  ;;  %v2066_v42 = vmax.f32 %v10567_v33, %v1719_v9  ;;  %v1128_v41 = vpop.f32.mrb[143].mxu0  ;;  %v1721_v55 = vpop.f32.mrb[143].mxu1  ;;  %v9187_v54 = vld [vmem:[%s11944_s3 + $0x380] ss:$16 sps:$4 sm:$0xff]   ;;  %v9192_v33 = vld [vmem:[%s11944_s3 + $0x38c] ss:$16 sps:$4 sm:$0xff]  }
 0x209   :  { %v10652_v18 = vpack.c.bf16 %v2451_v34, %v2449_v49  ;;  %v2217_v60 = vmax.f32 %v2061_v29, %v2063_v53  ;;  %v2065_v0 = vmax.f32 %v10569_v63, %v1128_v41  ;;  %v2067_v7 = vmax.f32 %v10571_v61, %v1721_v55  ;;  %3930 = vmatpush1.bf16.msra.mxu0 %v9181_v25  ;;  %v9195_v63 = vld [vmem:[%s11944_s3 + $0x3a4] ss:$16 sps:$4 sm:$0xff]   ;;  %v9193_v6 = vld [vmem:[%s11944_s3 + $0x3a0] ss:$16 sps:$4 sm:$0xff]   ;;  %v9198_v37 = vld [vmem:[%s11944_s3 + $0x3ac] ss:$16 sps:$4 sm:$0xff]  }
 0x20a   :  { %12024 = vst [vmem:[#allocation18_spill] sm:$0xff] %v10642_v11  ;;  %v2340_v3 = vadd.f32 %v9936_v5, %v2216_v59  ;;  %v2218_v22 = vmax.f32 %v2064_v17, %v2066_v42  ;;  %3094 = vmatmul.mubr.bf16.gmra.mrb[248].mxu0 %v10188_v45  ;;  %3387 = vmatmul.mubr.bf16.gmra.mrb[248].mxu1 %v10188_v45  ;;  %v9196_v42 = vld [vmem:[%s11944_s3 + $0x3a8] ss:$16 sps:$4 sm:$0xff]   ;;  %v9199_v55 = vld [vmem:[%s11944_s3 + $0x3c0] ss:$16 sps:$4 sm:$0xff]  }
 0x20b   :  { %12025 = vst [vmem:[#allocation19_spill] sm:$0xff] %v10652_v18  ;;  %v2341_v61 = vadd.f32 %v9943_v13, %v2217_v60  ;;  %v2219_v28 = vmax.f32 %v2065_v0, %v2067_v7  ;;  %3103 = vmatprep.mubr.bf16.mxu0 %v10209_v16  ;;  %3396 = vmatprep.mubr.bf16.mxu1 %v10209_v16  ;;  %v9202_v60 = vld [vmem:[%s11944_s3 + $0x3c8] ss:$16 sps:$4 sm:$0xff]  }
 0x20c   :  { %v2342_v35 = vadd.f32 %v9936_v5, %v2218_v22  ;;  %4243 = vmatpush1.bf16.msra.mxu1 %v9184_v48  ;;  %3931 = vmatprep.subr.bf16.mxu0 %v9189_v1  ;;  %v2452_v38 = vmax.f32 %v2340_v3, 0.0  ;;  %v9201_v48 = vld [vmem:[%s11944_s3 + $0x3c4] ss:$16 sps:$4 sm:$0xff]   ;;  %v9204_v1 = vld [vmem:[%s11944_s3 + $0x3cc] ss:$16 sps:$4 sm:$0xff]  }
 0x20d   :  { %v2343_v44 = vadd.f32 %v9943_v13, %v2219_v28  ;;  %v1132_v25 = vpop.f32.mrb[144].mxu0  ;;  %v1725_v27 = vpop.f32.mrb[144].mxu1  ;;  %4244 = vmatprep.subr.bf16.mxu1 %v9192_v33  ;;  %3932 = vmatpush1.bf16.msra.mxu0 %v9187_v54  ;;  %v2453_v34 = vmax.f32 %v2341_v61, 0.0 }
 0x20e   :  { %v2454_v20 = vmax.f32 %v2342_v35, 0.0  ;;  %v1134_v56 = vpop.f32.mrb[145].mxu0  ;;  %v1727_v49 = vpop.f32.mrb[145].mxu1  ;;  %3933 = vmatprep.subr.bf16.mxu0 %v9195_v63 }
 0x20f   :  { %v2455_v29 = vmax.f32 %v2343_v44, 0.0  ;;  %v1136_v53 = vpop.f32.mrb[146].mxu0  ;;  %v1729_v39 = vpop.f32.mrb[146].mxu1 }
 0x210   :  { %v10682_v9 = vpack.c.bf16 %v2454_v20, %v2452_v38  ;;  %v1138_v59 = vpop.f32.mrb[147].mxu0  ;;  %v1731_v17 = vpop.f32.mrb[147].mxu1  ;;  %4245 = vmatpush1.bf16.msra.mxu1 %v9190_v43 }
 0x211   :  { %v10687_v41 = vpack.c.bf16 %v2455_v29, %v2453_v34  ;;  %4246 = vmatprep.subr.bf16.mxu1 %v9198_v37  ;;  %3934 = vmatpush1.bf16.msra.mxu0 %v9193_v6 }
 0x212   :  { %3104 = vmatmul.mubr.bf16.gmra.mrb[252].mxu0 %v10207_v62  ;;  %3397 = vmatmul.mubr.bf16.gmra.mrb[252].mxu1 %v10207_v62 }
 0x213   :  { %12026 = vst [vmem:[#allocation20_spill] sm:$0xff] %v10687_v41  ;;  %3113 = vmatprep.mubr.bf16.mxu0 %v10251_v57  ;;  %3406 = vmatprep.mubr.bf16.mxu1 %v10251_v57 }
 0x214   :  { %4247 = vmatpush1.bf16.msra.mxu1 %v9196_v42  ;;  %3935 = vmatprep.subr.bf16.mxu0 %v9201_v48 }
 0x215   :  { %v10705_v0 = vpop.f32.mrb[148].mxu0  ;;  %v10707_v7 = vpop.f32.mrb[148].mxu1  ;;  %4248 = vmatprep.subr.bf16.mxu1 %v9204_v1  ;;  %3936 = vmatpush1.bf16.msra.mxu0 %v9199_v55 }
 0x216   :  { %v10709_v54 = vpop.f32.mrb[149].mxu0  ;;  %v10711_v33 = vpop.f32.mrb[149].mxu1 }
 0x217   :  { %v10713_v3 = vpop.f32.mrb[150].mxu0  ;;  %v10715_v22 = vpop.f32.mrb[150].mxu1 }
 0x218   :  { %v10717_v63 = vpop.f32.mrb[151].mxu0  ;;  %v10719_v61 = vpop.f32.mrb[151].mxu1  ;;  %4249 = vmatpush1.bf16.msra.mxu1 %v9202_v60 }
 0x21a   :  { %3114 = vmatmul.mubr.bf16.gmra.mrb[0].mxu0 %v10247_v47  ;;  %3407 = vmatmul.mubr.bf16.gmra.mrb[0].mxu1 %v10247_v47 }
 0x21b   :  { %3123 = vmatprep.mubr.bf16.mxu0 %v10268_v10  ;;  %3416 = vmatprep.mubr.bf16.mxu1 %v10268_v10 }
 0x21d   :  { %v1152_v28 = vpop.f32.mrb[152].mxu0  ;;  %v1745_v35 = vpop.f32.mrb[152].mxu1 }
 0x21e   :  { %v2068_v43 = vmax.f32 %v1132_v25, %v1152_v28  ;;  %v2070_v44 = vmax.f32 %v1725_v27, %v1745_v35  ;;  %v1154_v6 = vpop.f32.mrb[153].mxu0  ;;  %v1747_v37 = vpop.f32.mrb[153].mxu1 }
 0x21f   :  { %v2069_v38 = vmax.f32 %v1134_v56, %v1154_v6  ;;  %v2071_v20 = vmax.f32 %v1727_v49, %v1747_v37  ;;  %v1156_v34 = vpop.f32.mrb[154].mxu0  ;;  %v1749_v29 = vpop.f32.mrb[154].mxu1  ;;  %v9205_v49 = vld [vmem:[%s11944_s3 + $0x3e0] ss:$16 sps:$4 sm:$0xff]  }
 0x220   :  { %v2220_v42 = vmax.f32 %v2068_v43, %v2070_v44  ;;  %v2072_v55 = vmax.f32 %v1136_v53, %v1156_v34  ;;  %v2074_v48 = vmax.f32 %v1729_v39, %v1749_v29  ;;  %v1158_v1 = vpop.f32.mrb[155].mxu0  ;;  %v1751_v60 = vpop.f32.mrb[155].mxu1  ;;  %v9207_v53 = vld [vmem:[%s11944_s3 + $0x3e4] ss:$16 sps:$4 sm:$0xff]   ;;  %v9210_v44 = vld [vmem:[%s11944_s3 + $0x3ec] ss:$16 sps:$4 sm:$0xff]  }
 0x221   :  { %v2221_v47 = vmax.f32 %v2069_v38, %v2071_v20  ;;  %v2073_v57 = vmax.f32 %v1138_v59, %v1158_v1  ;;  %v2075_v62 = vmax.f32 %v1731_v17, %v1751_v60  ;;  %3937 = vmatprep.subr.bf16.mxu0 %v9207_v53  ;;  %4250 = vmatprep.subr.bf16.mxu1 %v9210_v44 }
 0x222   :  { %v2344_v10 = vadd.f32 %v9936_v5, %v2220_v42  ;;  %v2222_v16 = vmax.f32 %v2072_v55, %v2074_v48  ;;  %3124 = vmatmul.mubr.bf16.gmra.mrb[4].mxu0 %v10266_v58  ;;  %3417 = vmatmul.mubr.bf16.gmra.mrb[4].mxu1 %v10266_v58 }
 0x223   :  { %v2345_v25 = vadd.f32 %v9943_v13, %v2221_v47  ;;  %v2223_v27 = vmax.f32 %v2073_v57, %v2075_v62  ;;  %3133 = vmatprep.mubr.bf16.mxu0 %v10310_v23  ;;  %3426 = vmatprep.mubr.bf16.mxu1 %v10310_v23  ;;  %v9208_v62 = vld [vmem:[%s11944_s3 + $0x3e8] ss:$16 sps:$4 sm:$0xff]  }
 0x224   :  { %v2346_v56 = vadd.f32 %v9936_v5, %v2222_v16  ;;  %v2456_v47 = vmax.f32 %v2344_v10, 0.0  ;;  %3938 = vmatpush1.bf16.msra.mxu0 %v9205_v49  ;;  %4251 = vmatpush1.bf16.msra.mxu1 %v9208_v62 }
 0x225   :  { %v2347_v39 = vadd.f32 %v9943_v13, %v2223_v27  ;;  %v1162_v59 = vpop.f32.mrb[156].mxu0  ;;  %v1755_v17 = vpop.f32.mrb[156].mxu1  ;;  %v2457_v6 = vmax.f32 %v2345_v25, 0.0 }
 0x226   :  { %v2458_v57 = vmax.f32 %v2346_v56, 0.0  ;;  %v2076_v16 = vmax.f32 %v10705_v0, %v1162_v59  ;;  %v2078_v28 = vmax.f32 %v10707_v7, %v1755_v17  ;;  %v1164_v35 = vpop.f32.mrb[157].mxu0  ;;  %v1757_v43 = vpop.f32.mrb[157].mxu1 }
 0x227   :  { %v2459_v37 = vmax.f32 %v2347_v39, 0.0  ;;  %v2077_v38 = vmax.f32 %v10709_v54, %v1164_v35  ;;  %v2079_v20 = vmax.f32 %v10711_v33, %v1757_v43  ;;  %v1166_v34 = vpop.f32.mrb[158].mxu0  ;;  %v1759_v10 = vpop.f32.mrb[158].mxu1 }
 0x228   :  { %v10749_v29 = vpack.c.bf16 %v2458_v57, %v2456_v47  ;;  %v2224_v0 = vmax.f32 %v2076_v16, %v2078_v28  ;;  %v2080_v7 = vmax.f32 %v10713_v3, %v1166_v34  ;;  %v2082_v42 = vmax.f32 %v10715_v22, %v1759_v10  ;;  %v1168_v55 = vpop.f32.mrb[159].mxu0  ;;  %v1761_v48 = vpop.f32.mrb[159].mxu1 }
 0x229   :  { %v10753_v1 = vpack.c.bf16 %v2459_v37, %v2457_v6  ;;  %v2225_v60 = vmax.f32 %v2077_v38, %v2079_v20  ;;  %v2081_v54 = vmax.f32 %v10717_v63, %v1168_v55  ;;  %v2083_v33 = vmax.f32 %v10719_v61, %v1761_v48  ;;  %v9213_v6 = vld [vmem:[%s11944_s3 + $0x404] ss:$16 sps:$4 sm:$0xff]   ;;  %v9216_v37 = vld [vmem:[%s11944_s3 + $0x40c] ss:$16 sps:$4 sm:$0xff]  }
 0x22a   :  { %v2348_v25 = vadd.f32 %v9936_v5, %v2224_v0  ;;  %v2226_v27 = vmax.f32 %v2080_v7, %v2082_v42  ;;  %3134 = vmatmul.mubr.bf16.gmra.mrb[8].mxu0 %v10306_v24  ;;  %3427 = vmatmul.mubr.bf16.gmra.mrb[8].mxu1 %v10306_v24 }
 0x22b   :  { %v2349_v3 = vadd.f32 %v9943_v13, %v2225_v60  ;;  %v2227_v22 = vmax.f32 %v2081_v54, %v2083_v33  ;;  %3143 = vmatprep.mubr.bf16.mxu0 %v10327_v32  ;;  %3436 = vmatprep.mubr.bf16.mxu1 %v10327_v32 }
 0x22c   :  { %v2350_v56 = vadd.f32 %v9936_v5, %v2226_v27  ;;  %v2460_v53 = vmax.f32 %v2348_v25, 0.0  ;;  %4918 = vmatprep.subr.bf16.mxu0 %v9213_v6  ;;  %5211 = vmatprep.subr.bf16.mxu1 %v9216_v37 }
 0x22d   :  { %v2351_v63 = vadd.f32 %v9943_v13, %v2227_v22  ;;  %v1172_v61 = vpop.f32.mrb[160].mxu0  ;;  %v1765_v49 = vpop.f32.mrb[160].mxu1  ;;  %v2461_v62 = vmax.f32 %v2349_v3, 0.0 }
 0x22e   :  { %v2462_v39 = vmax.f32 %v2350_v56, 0.0  ;;  %v1174_v59 = vpop.f32.mrb[161].mxu0  ;;  %v1767_v17 = vpop.f32.mrb[161].mxu1 }
 0x22f   :  { %v2463_v47 = vmax.f32 %v2351_v63, 0.0  ;;  %v1176_v57 = vpop.f32.mrb[162].mxu0  ;;  %v1769_v16 = vpop.f32.mrb[162].mxu1 }
 0x230   :  { %v10765_v28 = vpack.c.bf16 %v2462_v39, %v2460_v53  ;;  %v1178_v35 = vpop.f32.mrb[163].mxu0  ;;  %v1771_v43 = vpop.f32.mrb[163].mxu1 }
 0x231   :  { %v10767_v44 = vpack.c.bf16 %v2463_v47, %v2461_v62 }
 0x232   :  { %12027 = vst [vmem:[#allocation21_spill] sm:$0xff] %v10765_v28  ;;  %3144 = vmatmul.mubr.bf16.gmra.mrb[12].mxu0 %v10325_v30  ;;  %3437 = vmatmul.mubr.bf16.gmra.mrb[12].mxu1 %v10325_v30 }
 0x233   :  { %3153 = vmatprep.mubr.bf16.mxu0 %v10369_v8  ;;  %3446 = vmatprep.mubr.bf16.mxu1 %v10369_v8 }
 0x235   :  { %v1182_v38 = vpop.f32.mrb[164].mxu0  ;;  %v1775_v20 = vpop.f32.mrb[164].mxu1 }
 0x236   :  { %v1184_v34 = vpop.f32.mrb[165].mxu0  ;;  %v1777_v10 = vpop.f32.mrb[165].mxu1 }
 0x237   :  { %v1186_v0 = vpop.f32.mrb[166].mxu0  ;;  %v1779_v7 = vpop.f32.mrb[166].mxu1 }
 0x238   :  { %v10779_v42 = vpop.f32.mrb[167].mxu0  ;;  %v10781_v55 = vpop.f32.mrb[167].mxu1 }
 0x23a   :  { %3154 = vmatmul.mubr.bf16.gmra.mrb[16].mxu0 %v10365_v31  ;;  %3447 = vmatmul.mubr.bf16.gmra.mrb[16].mxu1 %v10365_v31 }
 0x23b   :  { %3163 = vmatprep.mubr.bf16.mxu0 %v10388_v14  ;;  %3456 = vmatprep.mubr.bf16.mxu1 %v10388_v14 }
 0x23d   :  { %v1192_v48 = vpop.f32.mrb[168].mxu0  ;;  %v1785_v60 = vpop.f32.mrb[168].mxu1 }
 0x23e   :  { %v2084_v54 = vmax.f32 %v1172_v61, %v1192_v48  ;;  %v2086_v33 = vmax.f32 %v1765_v49, %v1785_v60  ;;  %v1194_v25 = vpop.f32.mrb[169].mxu0  ;;  %v1787_v27 = vpop.f32.mrb[169].mxu1 }
 0x23f   :  { %v2085_v3 = vmax.f32 %v1174_v59, %v1194_v25  ;;  %v2087_v22 = vmax.f32 %v1767_v17, %v1787_v27  ;;  %v1196_v56 = vpop.f32.mrb[170].mxu0  ;;  %v1789_v63 = vpop.f32.mrb[170].mxu1 }
 0x240   :  { %v2228_v53 = vmax.f32 %v2084_v54, %v2086_v33  ;;  %v2088_v39 = vmax.f32 %v1176_v57, %v1196_v56  ;;  %v2090_v62 = vmax.f32 %v1769_v16, %v1789_v63  ;;  %v1198_v47 = vpop.f32.mrb[171].mxu0  ;;  %v1791_v6 = vpop.f32.mrb[171].mxu1 }
 0x241   :  { %v2229_v37 = vmax.f32 %v2085_v3, %v2087_v22  ;;  %v2089_v31 = vmax.f32 %v1178_v35, %v1198_v47  ;;  %v2091_v8 = vmax.f32 %v1771_v43, %v1791_v6 }
 0x242   :  { %v2352_v14 = vadd.f32 %v9936_v5, %v2228_v53  ;;  %v2230_v30 = vmax.f32 %v2088_v39, %v2090_v62  ;;  %3164 = vmatmul.mubr.bf16.gmra.mrb[20].mxu0 %v10384_v4  ;;  %3457 = vmatmul.mubr.bf16.gmra.mrb[20].mxu1 %v10384_v4 }
 0x243   :  { %v2353_v61 = vadd.f32 %v9943_v13, %v2229_v37  ;;  %v2231_v49 = vmax.f32 %v2089_v31, %v2091_v8  ;;  %3173 = vmatprep.mubr.bf16.mxu0 %v10479_v36  ;;  %3466 = vmatprep.mubr.bf16.mxu1 %v10479_v36 }
 0x244   :  { %v2354_v59 = vadd.f32 %v9936_v5, %v2230_v30  ;;  %v2464_v35 = vmax.f32 %v2352_v14, 0.0 }
 0x245   :  { %v2355_v17 = vadd.f32 %v9943_v13, %v2231_v49  ;;  %v1202_v57 = vpop.f32.mrb[172].mxu0  ;;  %v1795_v16 = vpop.f32.mrb[172].mxu1  ;;  %v2465_v25 = vmax.f32 %v2353_v61, 0.0 }
 0x246   :  { %v2466_v43 = vmax.f32 %v2354_v59, 0.0  ;;  %v2092_v48 = vmax.f32 %v1182_v38, %v1202_v57  ;;  %v2094_v60 = vmax.f32 %v1775_v20, %v1795_v16  ;;  %v1204_v54 = vpop.f32.mrb[173].mxu0  ;;  %v1797_v33 = vpop.f32.mrb[173].mxu1 }
 0x247   :  { %v2467_v27 = vmax.f32 %v2355_v17, 0.0  ;;  %v2093_v3 = vmax.f32 %v1184_v34, %v1204_v54  ;;  %v2095_v31 = vmax.f32 %v1777_v10, %v1797_v33  ;;  %v1206_v8 = vpop.f32.mrb[174].mxu0  ;;  %v1799_v22 = vpop.f32.mrb[174].mxu1 }
 0x248   :  { %v10795_v56 = vpack.c.bf16 %v2466_v43, %v2464_v35  ;;  %v2232_v63 = vmax.f32 %v2092_v48, %v2094_v60  ;;  %v2096_v30 = vmax.f32 %v1186_v0, %v1206_v8  ;;  %v2098_v53 = vmax.f32 %v1779_v7, %v1799_v22  ;;  %v1208_v39 = vpop.f32.mrb[175].mxu0  ;;  %v1801_v62 = vpop.f32.mrb[175].mxu1 }
 0x249   :  { %v10797_v47 = vpack.c.bf16 %v2467_v27, %v2465_v25  ;;  %v2233_v14 = vmax.f32 %v2093_v3, %v2095_v31  ;;  %v2097_v38 = vmax.f32 %v10779_v42, %v1208_v39  ;;  %v2099_v20 = vmax.f32 %v10781_v55, %v1801_v62 }
 0x24a   :  { %12028 = vst [vmem:[#allocation22_spill] sm:$0xff] %v10795_v56  ;;  %v2356_v6 = vadd.f32 %v9936_v5, %v2232_v63  ;;  %v2234_v34 = vmax.f32 %v2096_v30, %v2098_v53  ;;  %3174 = vmatmul.mubr.bf16.gmra.mrb[24].mxu0 %v10469_v40  ;;  %3467 = vmatmul.mubr.bf16.gmra.mrb[24].mxu1 %v10469_v40 }
 0x24b   :  { %12029 = vst [vmem:[#allocation23_spill] sm:$0xff] %v10797_v47  ;;  %v2357_v10 = vadd.f32 %v9943_v13, %v2233_v14  ;;  %v2235_v0 = vmax.f32 %v2097_v38, %v2099_v20  ;;  %3183 = vmatprep.mubr.bf16.mxu0 %v10533_v15  ;;  %3476 = vmatprep.mubr.bf16.mxu1 %v10533_v15 }
 0x24c   :  { %v2358_v7 = vadd.f32 %v9936_v5, %v2234_v34  ;;  %v2468_v61 = vmax.f32 %v2356_v6, 0.0 }
 0x24d   :  { %v2359_v42 = vadd.f32 %v9943_v13, %v2235_v0  ;;  %v1212_v37 = vpop.f32.mrb[176].mxu0  ;;  %v1805_v55 = vpop.f32.mrb[176].mxu1  ;;  %v2469_v57 = vmax.f32 %v2357_v10, 0.0 }
 0x24e   :  { %v2470_v49 = vmax.f32 %v2358_v7, 0.0  ;;  %v1214_v59 = vpop.f32.mrb[177].mxu0  ;;  %v1807_v17 = vpop.f32.mrb[177].mxu1 }
 0x24f   :  { %v2471_v16 = vmax.f32 %v2359_v42, 0.0  ;;  %v1216_v35 = vpop.f32.mrb[178].mxu0  ;;  %v1809_v43 = vpop.f32.mrb[178].mxu1 }
 0x250   :  { %v10809_v48 = vpack.c.bf16 %v2470_v49, %v2468_v61  ;;  %v1218_v60 = vpop.f32.mrb[179].mxu0  ;;  %v1811_v54 = vpop.f32.mrb[179].mxu1 }
 0x251   :  { %v10811_v33 = vpack.c.bf16 %v2471_v16, %v2469_v57 }
 0x252   :  { %3184 = vmatmul.mubr.bf16.gmra.mrb[28].mxu0 %v10521_v51  ;;  %3477 = vmatmul.mubr.bf16.gmra.mrb[28].mxu1 %v10521_v51 }
 0x253   :  { %12030 = vst [vmem:[#allocation24_spill] sm:$0xff] %v10811_v33  ;;  %3193 = vmatprep.mubr.bf16.mxu0 %v10652_v18  ;;  %3486 = vmatprep.mubr.bf16.mxu1 %v10652_v18 }
 0x255   :  { %v1222_v25 = vpop.f32.mrb[180].mxu0  ;;  %v1815_v27 = vpop.f32.mrb[180].mxu1 }
 0x256   :  { %v1224_v3 = vpop.f32.mrb[181].mxu0  ;;  %v1817_v31 = vpop.f32.mrb[181].mxu1 }
 0x257   :  { %v1226_v8 = vpop.f32.mrb[182].mxu0  ;;  %v1819_v22 = vpop.f32.mrb[182].mxu1 }
 0x258   :  { %v10817_v63 = vpop.f32.mrb[183].mxu0  ;;  %v10819_v30 = vpop.f32.mrb[183].mxu1 }
 0x25a   :  { %3194 = vmatmul.mubr.bf16.gmra.mrb[32].mxu0 %v10642_v11  ;;  %3487 = vmatmul.mubr.bf16.gmra.mrb[32].mxu1 %v10642_v11 }
 0x25b   :  { %3203 = vmatprep.mubr.bf16.mxu0 %v10687_v41  ;;  %3496 = vmatprep.mubr.bf16.mxu1 %v10687_v41 }
 0x25d   :  { %v1232_v53 = vpop.f32.mrb[184].mxu0  ;;  %v1825_v39 = vpop.f32.mrb[184].mxu1 }
 0x25e   :  { %v2100_v62 = vmax.f32 %v1212_v37, %v1232_v53  ;;  %v2102_v14 = vmax.f32 %v1805_v55, %v1825_v39  ;;  %v1234_v38 = vpop.f32.mrb[185].mxu0  ;;  %v1827_v20 = vpop.f32.mrb[185].mxu1 }
 0x25f   :  { %v2101_v6 = vmax.f32 %v1214_v59, %v1234_v38  ;;  %v2103_v34 = vmax.f32 %v1807_v17, %v1827_v20  ;;  %v1236_v10 = vpop.f32.mrb[186].mxu0  ;;  %v1829_v0 = vpop.f32.mrb[186].mxu1 }
 0x260   :  { %v2236_v7 = vmax.f32 %v2100_v62, %v2102_v14  ;;  %v2104_v42 = vmax.f32 %v1216_v35, %v1236_v10  ;;  %v2106_v61 = vmax.f32 %v1809_v43, %v1829_v0  ;;  %v1238_v49 = vpop.f32.mrb[187].mxu0  ;;  %v1831_v57 = vpop.f32.mrb[187].mxu1 }
 0x261   :  { %v2237_v16 = vmax.f32 %v2101_v6, %v2103_v34  ;;  %v2105_v11 = vmax.f32 %v1218_v60, %v1238_v49  ;;  %v2107_v18 = vmax.f32 %v1811_v54, %v1831_v57 }
 0x262   :  { %v2360_v41 = vadd.f32 %v9936_v5, %v2236_v7  ;;  %v2238_v51 = vmax.f32 %v2104_v42, %v2106_v61  ;;  %3204 = vmatmul.mubr.bf16.gmra.mrb[36].mxu0 %v10682_v9  ;;  %3497 = vmatmul.mubr.bf16.gmra.mrb[36].mxu1 %v10682_v9 }
 0x263   :  { %v2361_v37 = vadd.f32 %v9943_v13, %v2237_v16  ;;  %v2239_v55 = vmax.f32 %v2105_v11, %v2107_v18  ;;  %3213 = vmatprep.mubr.bf16.mxu0 %v10753_v1  ;;  %3506 = vmatprep.mubr.bf16.mxu1 %v10753_v1 }
 0x264   :  { %v2362_v59 = vadd.f32 %v9936_v5, %v2238_v51  ;;  %v2472_v60 = vmax.f32 %v2360_v41, 0.0 }
 0x265   :  { %v2363_v17 = vadd.f32 %v9943_v13, %v2239_v55  ;;  %v1242_v35 = vpop.f32.mrb[188].mxu0  ;;  %v1835_v43 = vpop.f32.mrb[188].mxu1  ;;  %v2473_v38 = vmax.f32 %v2361_v37, 0.0 }
 0x266   :  { %v2474_v54 = vmax.f32 %v2362_v59, 0.0  ;;  %v2108_v53 = vmax.f32 %v1222_v25, %v1242_v35  ;;  %v2110_v39 = vmax.f32 %v1815_v27, %v1835_v43  ;;  %v1244_v62 = vpop.f32.mrb[189].mxu0  ;;  %v1837_v14 = vpop.f32.mrb[189].mxu1 }
 0x267   :  { %v2475_v20 = vmax.f32 %v2363_v17, 0.0  ;;  %v2109_v6 = vmax.f32 %v1224_v3, %v1244_v62  ;;  %v2111_v11 = vmax.f32 %v1817_v31, %v1837_v14  ;;  %v1246_v18 = vpop.f32.mrb[190].mxu0  ;;  %v1839_v34 = vpop.f32.mrb[190].mxu1 }
 0x268   :  { %v10833_v10 = vpack.c.bf16 %v2474_v54, %v2472_v60  ;;  %v2240_v0 = vmax.f32 %v2108_v53, %v2110_v39  ;;  %v2112_v51 = vmax.f32 %v1226_v8, %v1246_v18  ;;  %v2114_v7 = vmax.f32 %v1819_v22, %v1839_v34  ;;  %v1248_v42 = vpop.f32.mrb[191].mxu0  ;;  %v1841_v61 = vpop.f32.mrb[191].mxu1 }
 0x269   :  { %v10835_v49 = vpack.c.bf16 %v2475_v20, %v2473_v38  ;;  %v2241_v41 = vmax.f32 %v2109_v6, %v2111_v11  ;;  %v2113_v25 = vmax.f32 %v10817_v63, %v1248_v42  ;;  %v2115_v27 = vmax.f32 %v10819_v30, %v1841_v61 }
 0x26a   :  { %v2364_v57 = vadd.f32 %v9936_v5, %v2240_v0  ;;  %v2242_v3 = vmax.f32 %v2112_v51, %v2114_v7  ;;  %3214 = vmatmul.mubr.bf16.gmra.mrb[40].mxu0 %v10749_v29  ;;  %3507 = vmatmul.mubr.bf16.gmra.mrb[40].mxu1 %v10749_v29 }
 0x26b   :  { %v2365_v31 = vadd.f32 %v9943_v13, %v2241_v41  ;;  %v2243_v8 = vmax.f32 %v2113_v25, %v2115_v27  ;;  %3223 = vmatprep.mubr.bf16.mxu0 %v10767_v44  ;;  %3516 = vmatprep.mubr.bf16.mxu1 %v10767_v44 }
 0x26c   :  { %v2366_v22 = vadd.f32 %v9936_v5, %v2242_v3  ;;  %v2476_v37 = vmax.f32 %v2364_v57, 0.0 }
 0x26d   :  { %v2367_v63 = vadd.f32 %v9943_v13, %v2243_v8  ;;  %v1252_v16 = vpop.f32.mrb[192].mxu0  ;;  %v1845_v30 = vpop.f32.mrb[192].mxu1  ;;  %v2477_v35 = vmax.f32 %v2365_v31, 0.0 }
 0x26e   :  { %v2478_v55 = vmax.f32 %v2366_v22, 0.0  ;;  %v1254_v59 = vpop.f32.mrb[193].mxu0  ;;  %v1847_v17 = vpop.f32.mrb[193].mxu1 }
 0x26f   :  { %v2479_v43 = vmax.f32 %v2367_v63, 0.0  ;;  %v1256_v60 = vpop.f32.mrb[194].mxu0  ;;  %v1849_v54 = vpop.f32.mrb[194].mxu1 }
 0x270   :  { %v10847_v53 = vpack.c.bf16 %v2478_v55, %v2476_v37  ;;  %v1258_v39 = vpop.f32.mrb[195].mxu0  ;;  %v1851_v62 = vpop.f32.mrb[195].mxu1 }
 0x271   :  { %v10849_v14 = vpack.c.bf16 %v2479_v43, %v2477_v35 }
 0x272   :  { %12031 = vst [vmem:[#allocation25_spill] sm:$0xff] %v10847_v53  ;;  %3224 = vmatmul.mubr.bf16.gmra.mrb[44].mxu0 %v10765_v28  ;;  %3517 = vmatmul.mubr.bf16.gmra.mrb[44].mxu1 %v10765_v28 }
 0x273   :  { %3233 = vmatprep.mubr.bf16.mxu0 %v10797_v47  ;;  %3526 = vmatprep.mubr.bf16.mxu1 %v10797_v47 }
 0x275   :  { %v1262_v38 = vpop.f32.mrb[196].mxu0  ;;  %v1855_v20 = vpop.f32.mrb[196].mxu1 }
 0x276   :  { %v1264_v6 = vpop.f32.mrb[197].mxu0  ;;  %v1857_v11 = vpop.f32.mrb[197].mxu1 }
 0x277   :  { %v1266_v18 = vpop.f32.mrb[198].mxu0  ;;  %v1859_v34 = vpop.f32.mrb[198].mxu1 }
 0x278   :  { %v10855_v0 = vpop.f32.mrb[199].mxu0  ;;  %v10857_v51 = vpop.f32.mrb[199].mxu1 }
 0x27a   :  { %3234 = vmatmul.mubr.bf16.gmra.mrb[48].mxu0 %v10795_v56  ;;  %3527 = vmatmul.mubr.bf16.gmra.mrb[48].mxu1 %v10795_v56 }
 0x27b   :  { %3243 = vmatprep.mubr.bf16.mxu0 %v10811_v33  ;;  %3536 = vmatprep.mubr.bf16.mxu1 %v10811_v33 }
 0x27d   :  { %v1272_v7 = vpop.f32.mrb[200].mxu0  ;;  %v1865_v42 = vpop.f32.mrb[200].mxu1 }
 0x27e   :  { %v2116_v61 = vmax.f32 %v1252_v16, %v1272_v7  ;;  %v2118_v41 = vmax.f32 %v1845_v30, %v1865_v42  ;;  %v1274_v25 = vpop.f32.mrb[201].mxu0  ;;  %v1867_v27 = vpop.f32.mrb[201].mxu1 }
 0x27f   :  { %v2117_v57 = vmax.f32 %v1254_v59, %v1274_v25  ;;  %v2119_v3 = vmax.f32 %v1847_v17, %v1867_v27  ;;  %v1276_v31 = vpop.f32.mrb[202].mxu0  ;;  %v1869_v8 = vpop.f32.mrb[202].mxu1 }
 0x280   :  { %v2244_v22 = vmax.f32 %v2116_v61, %v2118_v41  ;;  %v2120_v63 = vmax.f32 %v1256_v60, %v1276_v31  ;;  %v2122_v37 = vmax.f32 %v1849_v54, %v1869_v8  ;;  %v1278_v55 = vpop.f32.mrb[203].mxu0  ;;  %v1871_v35 = vpop.f32.mrb[203].mxu1 }
 0x281   :  { %v2245_v43 = vmax.f32 %v2117_v57, %v2119_v3  ;;  %v2121_v56 = vmax.f32 %v1258_v39, %v1278_v55  ;;  %v2123_v47 = vmax.f32 %v1851_v62, %v1871_v35 }
 0x282   :  { %v2368_v33 = vadd.f32 %v9936_v5, %v2244_v22  ;;  %v2246_v28 = vmax.f32 %v2120_v63, %v2122_v37  ;;  %3244 = vmatmul.mubr.bf16.gmra.mrb[52].mxu0 %v10809_v48  ;;  %3537 = vmatmul.mubr.bf16.gmra.mrb[52].mxu1 %v10809_v48 }
 0x283   :  { %v2369_v16 = vadd.f32 %v9943_v13, %v2245_v43  ;;  %v2247_v30 = vmax.f32 %v2121_v56, %v2123_v47  ;;  %3253 = vmatprep.mubr.bf16.mxu0 %v10835_v49  ;;  %3546 = vmatprep.mubr.bf16.mxu1 %v10835_v49 }
 0x284   :  { %v2370_v59 = vadd.f32 %v9936_v5, %v2246_v28  ;;  %v2480_v39 = vmax.f32 %v2368_v33, 0.0 }
 0x285   :  { %v2371_v17 = vadd.f32 %v9943_v13, %v2247_v30  ;;  %v1282_v60 = vpop.f32.mrb[204].mxu0  ;;  %v1875_v54 = vpop.f32.mrb[204].mxu1  ;;  %v2481_v25 = vmax.f32 %v2369_v16, 0.0 }
 0x286   :  { %v2482_v62 = vmax.f32 %v2370_v59, 0.0  ;;  %v2124_v7 = vmax.f32 %v1262_v38, %v1282_v60  ;;  %v2126_v42 = vmax.f32 %v1855_v20, %v1875_v54  ;;  %v1284_v61 = vpop.f32.mrb[205].mxu0  ;;  %v1877_v41 = vpop.f32.mrb[205].mxu1 }
 0x287   :  { %v2483_v27 = vmax.f32 %v2371_v17, 0.0  ;;  %v2125_v57 = vmax.f32 %v1264_v6, %v1284_v61  ;;  %v2127_v56 = vmax.f32 %v1857_v11, %v1877_v41  ;;  %v1286_v47 = vpop.f32.mrb[206].mxu0  ;;  %v1879_v3 = vpop.f32.mrb[206].mxu1 }
 0x288   :  { %v10871_v31 = vpack.c.bf16 %v2482_v62, %v2480_v39  ;;  %v2248_v8 = vmax.f32 %v2124_v7, %v2126_v42  ;;  %v2128_v28 = vmax.f32 %v1266_v18, %v1286_v47  ;;  %v2130_v22 = vmax.f32 %v1859_v34, %v1879_v3  ;;  %v1288_v63 = vpop.f32.mrb[207].mxu0  ;;  %v1881_v37 = vpop.f32.mrb[207].mxu1 }
 0x289   :  { %v10873_v55 = vpack.c.bf16 %v2483_v27, %v2481_v25  ;;  %v2249_v33 = vmax.f32 %v2125_v57, %v2127_v56  ;;  %v2129_v38 = vmax.f32 %v10855_v0, %v1288_v63  ;;  %v2131_v20 = vmax.f32 %v10857_v51, %v1881_v37 }
 0x28a   :  { %12032 = vst [vmem:[#allocation26_spill] sm:$0xff] %v10871_v31  ;;  %v2372_v35 = vadd.f32 %v9936_v5, %v2248_v8  ;;  %v2250_v6 = vmax.f32 %v2128_v28, %v2130_v22  ;;  %3254 = vmatmul.mubr.bf16.gmra.mrb[56].mxu0 %v10833_v10  ;;  %3547 = vmatmul.mubr.bf16.gmra.mrb[56].mxu1 %v10833_v10 }
 0x28b   :  { %12033 = vst [vmem:[#allocation27_spill] sm:$0xff] %v10873_v55  ;;  %v2373_v11 = vadd.f32 %v9943_v13, %v2249_v33  ;;  %v2251_v18 = vmax.f32 %v2129_v38, %v2131_v20  ;;  %3263 = vmatprep.mubr.bf16.mxu0 %v10849_v14  ;;  %3556 = vmatprep.mubr.bf16.mxu1 %v10849_v14 }
 0x28c   :  { %v2374_v34 = vadd.f32 %v9936_v5, %v2250_v6  ;;  %v2484_v16 = vmax.f32 %v2372_v35, 0.0 }
 0x28d   :  { %v2375_v0 = vadd.f32 %v9943_v13, %v2251_v18  ;;  %v1292_v43 = vpop.f32.mrb[208].mxu0  ;;  %v1885_v51 = vpop.f32.mrb[208].mxu1  ;;  %v2485_v60 = vmax.f32 %v2373_v11, 0.0 }
 0x28e   :  { %v2486_v30 = vmax.f32 %v2374_v34, 0.0  ;;  %v1294_v59 = vpop.f32.mrb[209].mxu0  ;;  %v1887_v17 = vpop.f32.mrb[209].mxu1 }
 0x28f   :  { %v2487_v54 = vmax.f32 %v2375_v0, 0.0  ;;  %v1296_v39 = vpop.f32.mrb[210].mxu0  ;;  %v1889_v62 = vpop.f32.mrb[210].mxu1 }
 0x290   :  { %v10885_v7 = vpack.c.bf16 %v2486_v30, %v2484_v16  ;;  %v1298_v42 = vpop.f32.mrb[211].mxu0  ;;  %v1891_v61 = vpop.f32.mrb[211].mxu1 }
 0x291   :  { %v10887_v41 = vpack.c.bf16 %v2487_v54, %v2485_v60 }
 0x292   :  { %3264 = vmatmul.mubr.bf16.gmra.mrb[60].mxu0 %v10847_v53  ;;  %3557 = vmatmul.mubr.bf16.gmra.mrb[60].mxu1 %v10847_v53 }
 0x293   :  { %12034 = vst [vmem:[#allocation28_spill] sm:$0xff] %v10887_v41  ;;  %3273 = vmatprep.mubr.bf16.mxu0 %v10873_v55  ;;  %3566 = vmatprep.mubr.bf16.mxu1 %v10873_v55 }
 0x295   :  { %v1302_v25 = vpop.f32.mrb[212].mxu0  ;;  %v1895_v27 = vpop.f32.mrb[212].mxu1 }
 0x296   :  { %v1304_v57 = vpop.f32.mrb[213].mxu0  ;;  %v1897_v56 = vpop.f32.mrb[213].mxu1 }
 0x297   :  { %v10893_v47 = vpop.f32.mrb[214].mxu0  ;;  %v10895_v3 = vpop.f32.mrb[214].mxu1 }
 0x298   :  { %v10897_v8 = vpop.f32.mrb[215].mxu0  ;;  %v10899_v28 = vpop.f32.mrb[215].mxu1 }
 0x29a   :  { %3274 = vmatmul.mubr.bf16.gmra.mrb[64].mxu0 %v10871_v31  ;;  %3567 = vmatmul.mubr.bf16.gmra.mrb[64].mxu1 %v10871_v31 }
 0x29b   :  { %3283 = vmatprep.mubr.bf16.mxu0 %v10887_v41  ;;  %3576 = vmatprep.mubr.bf16.mxu1 %v10887_v41 }
 0x29d   :  { %v1312_v22 = vpop.f32.mrb[216].mxu0  ;;  %v1905_v63 = vpop.f32.mrb[216].mxu1 }
 0x29e   :  { %v2132_v37 = vmax.f32 %v1292_v43, %v1312_v22  ;;  %v2134_v33 = vmax.f32 %v1885_v51, %v1905_v63  ;;  %v1314_v38 = vpop.f32.mrb[217].mxu0  ;;  %v1907_v20 = vpop.f32.mrb[217].mxu1 }
 0x29f   :  { %v2133_v35 = vmax.f32 %v1294_v59, %v1314_v38  ;;  %v2135_v6 = vmax.f32 %v1887_v17, %v1907_v20  ;;  %v1316_v11 = vpop.f32.mrb[218].mxu0  ;;  %v1909_v18 = vpop.f32.mrb[218].mxu1 }
 0x2a0   :  { %v2252_v34 = vmax.f32 %v2132_v37, %v2134_v33  ;;  %v2136_v0 = vmax.f32 %v1296_v39, %v1316_v11  ;;  %v2138_v16 = vmax.f32 %v1889_v62, %v1909_v18  ;;  %v1318_v30 = vpop.f32.mrb[219].mxu0  ;;  %v1911_v60 = vpop.f32.mrb[219].mxu1 }
 0x2a1   :  { %v2253_v54 = vmax.f32 %v2133_v35, %v2135_v6  ;;  %v2137_v31 = vmax.f32 %v1298_v42, %v1318_v30  ;;  %v2139_v55 = vmax.f32 %v1891_v61, %v1911_v60 }
 0x2a2   :  { %v2376_v41 = vadd.f32 %v9936_v5, %v2252_v34  ;;  %v2254_v53 = vmax.f32 %v2136_v0, %v2138_v16  ;;  %3284 = vmatmul.mubr.bf16.gmra.mrb[68].mxu0 %v10885_v7  ;;  %3577 = vmatmul.mubr.bf16.gmra.mrb[68].mxu1 %v10885_v7 }
 0x2a3   :  { %v2377_v43 = vadd.f32 %v9943_v13, %v2253_v54  ;;  %v2255_v51 = vmax.f32 %v2137_v31, %v2139_v55  ;;  %3939 = vmatprep.mubr.bf16.mxu0 %v9966_v52  ;;  %4252 = vmatprep.mubr.bf16.mxu1 %v9966_v52  ;;  %v12035_v54 = vld [vmem:[#allocation3_spill] sm:$0xff] }
 0x2a4   :  { %v2378_v59 = vadd.f32 %v9936_v5, %v2254_v53  ;;  %v2488_v42 = vmax.f32 %v2376_v41, 0.0 }
 0x2a5   :  { %v2379_v17 = vadd.f32 %v9943_v13, %v2255_v51  ;;  %v1322_v39 = vpop.f32.mrb[220].mxu0  ;;  %v1915_v62 = vpop.f32.mrb[220].mxu1  ;;  %v2489_v38 = vmax.f32 %v2377_v43, 0.0  ;;  %v12036_v51 = vld [vmem:[#allocation4_spill] sm:$0xff] }
 0x2a6   :  { %v2490_v61 = vmax.f32 %v2378_v59, 0.0  ;;  %v2140_v22 = vmax.f32 %v1302_v25, %v1322_v39  ;;  %v2142_v63 = vmax.f32 %v1895_v27, %v1915_v62  ;;  %v1324_v37 = vpop.f32.mrb[221].mxu0  ;;  %v1917_v33 = vpop.f32.mrb[221].mxu1  ;;  %v9211_v25 = vld [vmem:[%s11944_s3 + $0x400] ss:$16 sps:$4 sm:$0xff]  }
 0x2a7   :  { %v2491_v20 = vmax.f32 %v2379_v17, 0.0  ;;  %v2141_v35 = vmax.f32 %v1304_v57, %v1324_v37  ;;  %v2143_v31 = vmax.f32 %v1897_v56, %v1917_v33  ;;  %v1326_v55 = vpop.f32.mrb[222].mxu0  ;;  %v1919_v6 = vpop.f32.mrb[222].mxu1  ;;  %v9214_v27 = vld [vmem:[%s11944_s3 + $0x408] ss:$16 sps:$4 sm:$0xff]  }
 0x2a8   :  { %v10913_v11 = vpack.c.bf16 %v2490_v61, %v2488_v42  ;;  %v2256_v52 = vmax.f32 %v2140_v22, %v2142_v63  ;;  %v2144_v53 = vmax.f32 %v10893_v47, %v1326_v55  ;;  %v2146_v18 = vmax.f32 %v10895_v3, %v1919_v6  ;;  %v1328_v34 = vpop.f32.mrb[223].mxu0  ;;  %v1921_v41 = vpop.f32.mrb[223].mxu1  ;;  %v9219_v47 = vld [vmem:[%s11944_s3 + $0x424] ss:$16 sps:$4 sm:$0xff]   ;;  %v9222_v3 = vld [vmem:[%s11944_s3 + $0x42c] ss:$16 sps:$4 sm:$0xff]  }
 0x2a9   :  { %v10923_v57 = vpack.c.bf16 %v2491_v20, %v2489_v38  ;;  %v2257_v56 = vmax.f32 %v2141_v35, %v2143_v31  ;;  %v2145_v0 = vmax.f32 %v10897_v8, %v1328_v34  ;;  %v2147_v16 = vmax.f32 %v10899_v28, %v1921_v41  ;;  %v9217_v59 = vld [vmem:[%s11944_s3 + $0x420] ss:$16 sps:$4 sm:$0xff]   ;;  %v9220_v17 = vld [vmem:[%s11944_s3 + $0x428] ss:$16 sps:$4 sm:$0xff]   ;;  %v9225_v62 = vld [vmem:[%s11944_s3 + $0x444] ss:$16 sps:$4 sm:$0xff]  }
 0x2aa   :  { %v2380_v30 = vadd.f32 %v9936_v5, %v2256_v52  ;;  %v2258_v60 = vmax.f32 %v2144_v53, %v2146_v18  ;;  %3940 = vmatmul.mubr.bf16.vlgmr.msra.gmra.mrb[72].mxu0 %v12035_v54  ;;  %4253 = vmatmul.mubr.bf16.vlgmr.msra.gmra.mrb[72].mxu1 %v12035_v54  ;;  %v9226_v33 = vld [vmem:[%s11944_s3 + $0x448] ss:$16 sps:$4 sm:$0xff]   ;;  %v9231_v20 = vld [vmem:[%s11944_s3 + $0x464] ss:$16 sps:$4 sm:$0xff]   ;;  %v9234_v35 = vld [vmem:[%s11944_s3 + $0x46c] ss:$16 sps:$4 sm:$0xff]  }
 0x2ab   :  { %v2381_v43 = vadd.f32 %v9943_v13, %v2257_v56  ;;  %v2259_v8 = vmax.f32 %v2145_v0, %v2147_v16  ;;  %3949 = vmatprep.mubr.bf16.mxu0 %v12036_v51  ;;  %4262 = vmatprep.mubr.bf16.mxu1 %v12036_v51  ;;  %v9229_v31 = vld [vmem:[%s11944_s3 + $0x460] ss:$16 sps:$4 sm:$0xff]   ;;  %v9232_v55 = vld [vmem:[%s11944_s3 + $0x468] ss:$16 sps:$4 sm:$0xff]   ;;  %v9240_v6 = vld [vmem:[%s11944_s3 + $0x48c] ss:$16 sps:$4 sm:$0xff]  }
 0x2ac   :  { %v2382_v28 = vadd.f32 %v9936_v5, %v2258_v60  ;;  %4919 = vmatpush1.bf16.msra.mxu0 %v9211_v25  ;;  %5212 = vmatpush1.bf16.msra.mxu1 %v9214_v27  ;;  %v9228_v5 = vld [vmem:[%s11944_s3 + $0x44c] ss:$16 sps:$4 sm:$0xff]   ;;  %v2492_v42 = vmax.f32 %v2380_v30, 0.0  ;;  %v9235_v52 = vld [vmem:[%s11944_s3 + $0x480] ss:$16 sps:$4 sm:$0xff]  }
 0x2ad   :  { %v2383_v39 = vadd.f32 %v9943_v13, %v2259_v8  ;;  %4920 = vmatprep.subr.bf16.mxu0 %v9219_v47  ;;  %5213 = vmatprep.subr.bf16.mxu1 %v9222_v3  ;;  %v2493_v22 = vmax.f32 %v2381_v43, 0.0  ;;  %v9223_v13 = vld [vmem:[%s11944_s3 + $0x440] ss:$16 sps:$4 sm:$0xff]   ;;  %v9238_v53 = vld [vmem:[%s11944_s3 + $0x488] ss:$16 sps:$4 sm:$0xff]  }
 0x2ae   :  { %v2494_v61 = vmax.f32 %v2382_v28, 0.0  ;;  %v9243_v18 = vld [vmem:[%s11944_s3 + $0x4a4] ss:$16 sps:$4 sm:$0xff]   ;;  %v9246_v34 = vld [vmem:[%s11944_s3 + $0x4ac] ss:$16 sps:$4 sm:$0xff]  }
 0x2af   :  { %v2495_v63 = vmax.f32 %v2383_v39, 0.0  ;;  %v9241_v41 = vld [vmem:[%s11944_s3 + $0x4a0] ss:$16 sps:$4 sm:$0xff]   ;;  %v9244_v25 = vld [vmem:[%s11944_s3 + $0x4a8] ss:$16 sps:$4 sm:$0xff]  }
 0x2b0   :  { %v10953_v37 = vpack.c.bf16 %v2494_v61, %v2492_v42  ;;  %4921 = vmatpush1.bf16.msra.mxu0 %v9217_v59  ;;  %5214 = vmatpush1.bf16.msra.mxu1 %v9220_v17  ;;  %v9249_v27 = vld [vmem:[%s11944_s3 + $0x4c4] ss:$16 sps:$4 sm:$0xff]   ;;  %v9252_v56 = vld [vmem:[%s11944_s3 + $0x4cc] ss:$16 sps:$4 sm:$0xff]   ;;  %v9247_v0 = vld [vmem:[%s11944_s3 + $0x4c0] ss:$16 sps:$4 sm:$0xff]  }
 0x2b1   :  { %v10961_v38 = vpack.c.bf16 %v2495_v63, %v2493_v22  ;;  %4922 = vmatprep.subr.bf16.mxu0 %v9225_v62  ;;  %5215 = vmatprep.subr.bf16.mxu1 %v9228_v5  ;;  %v9250_v16 = vld [vmem:[%s11944_s3 + $0x4c8] ss:$16 sps:$4 sm:$0xff]   ;;  %v9255_v47 = vld [vmem:[%s11944_s3 + $0x4e4] ss:$16 sps:$4 sm:$0xff]   ;;  %v9258_v3 = vld [vmem:[%s11944_s3 + $0x4ec] ss:$16 sps:$4 sm:$0xff]  }
 0x2b2   :  { %3950 = vmatmul.mubr.bf16.gmra.mrb[76].mxu0 %v9993_v19  ;;  %4263 = vmatmul.mubr.bf16.gmra.mrb[76].mxu1 %v9993_v19  ;;  %v9237_v19 = vld [vmem:[%s11944_s3 + $0x484] ss:$16 sps:$4 sm:$0xff]   ;;  %v9253_v60 = vld [vmem:[%s11944_s3 + $0x4e0] ss:$16 sps:$4 sm:$0xff]   ;;  %v9256_v54 = vld [vmem:[%s11944_s3 + $0x4e8] ss:$16 sps:$4 sm:$0xff]  }
 0x2b3   :  { %3959 = vmatprep.mubr.bf16.mxu0 %v10035_v21  ;;  %4272 = vmatprep.mubr.bf16.mxu1 %v10035_v21  ;;  %v12037_v30 = vld [vmem:[#allocation6_spill] sm:$0xff]  ;;  %v9264_v8 = vld [vmem:[%s11944_s3 + $0x50c] ss:$16 sps:$4 sm:$0xff]   ;;  %v9262_v28 = vld [vmem:[%s11944_s3 + $0x508] ss:$16 sps:$4 sm:$0xff]  }
 0x2b4   :  { %4923 = vmatpush1.bf16.msra.mxu0 %v9223_v13  ;;  %5216 = vmatpush1.bf16.msra.mxu1 %v9226_v33  ;;  %v9261_v43 = vld [vmem:[%s11944_s3 + $0x504] ss:$16 sps:$4 sm:$0xff]   ;;  %v9259_v51 = vld [vmem:[%s11944_s3 + $0x500] ss:$16 sps:$4 sm:$0xff]   ;;  %v9270_v17 = vld [vmem:[%s11944_s3 + $0x52c] ss:$16 sps:$4 sm:$0xff]  }
 0x2b5   :  { %4924 = vmatprep.subr.bf16.mxu0 %v9231_v20  ;;  %5217 = vmatprep.subr.bf16.mxu1 %v9234_v35  ;;  %v9267_v59 = vld [vmem:[%s11944_s3 + $0x524] ss:$16 sps:$4 sm:$0xff]   ;;  %v12038_v39 = vld [vmem:[#allocation5_spill] sm:$0xff]  ;;  %v12039_v62 = vld [vmem:[#allocation7_spill] sm:$0xff] }
 0x2b6   :  { %v9265_v5 = vld [vmem:[%s11944_s3 + $0x520] ss:$16 sps:$4 sm:$0xff]   ;;  %v9268_v42 = vld [vmem:[%s11944_s3 + $0x528] ss:$16 sps:$4 sm:$0xff]   ;;  %v9273_v61 = vld [vmem:[%s11944_s3 + $0x544] ss:$16 sps:$4 sm:$0xff]  }
 0x2b7   :  { %v9276_v22 = vld [vmem:[%s11944_s3 + $0x54c] ss:$16 sps:$4 sm:$0xff]   ;;  %v9271_v63 = vld [vmem:[%s11944_s3 + $0x540] ss:$16 sps:$4 sm:$0xff]   ;;  %v9274_v13 = vld [vmem:[%s11944_s3 + $0x548] ss:$16 sps:$4 sm:$0xff]  }
 0x2b8   :  { %4925 = vmatpush1.bf16.msra.mxu0 %v9229_v31  ;;  %5218 = vmatpush1.bf16.msra.mxu1 %v9232_v55  ;;  %v9279_v33 = vld [vmem:[%s11944_s3 + $0x564] ss:$16 sps:$4 sm:$0xff]   ;;  %v9282_v20 = vld [vmem:[%s11944_s3 + $0x56c] ss:$16 sps:$4 sm:$0xff]   ;;  %v9277_v35 = vld [vmem:[%s11944_s3 + $0x560] ss:$16 sps:$4 sm:$0xff]  }
 0x2b9   :  { %4926 = vmatprep.subr.bf16.mxu0 %v9237_v19  ;;  %5219 = vmatprep.subr.bf16.mxu1 %v9240_v6  ;;  %v9280_v31 = vld [vmem:[%s11944_s3 + $0x568] ss:$16 sps:$4 sm:$0xff]   ;;  %v9285_v55 = vld [vmem:[%s11944_s3 + $0x584] ss:$16 sps:$4 sm:$0xff]   ;;  %v9288_v19 = vld [vmem:[%s11944_s3 + $0x58c] ss:$16 sps:$4 sm:$0xff]  }
 0x2ba   :  { %3960 = vmatmul.mubr.bf16.gmra.mrb[224].mxu0 %v10031_v12  ;;  %4273 = vmatmul.mubr.bf16.gmra.mrb[224].mxu1 %v10031_v12  ;;  %v9283_v6 = vld [vmem:[%s11944_s3 + $0x580] ss:$16 sps:$4 sm:$0xff]  }
 0x2bb   :  { %3969 = vmatprep.mubr.bf16.mxu0 %v10064_v50  ;;  %4282 = vmatprep.mubr.bf16.mxu1 %v10064_v50 }
 0x2bc   :  { %4927 = vmatpush1.bf16.msra.mxu0 %v9235_v52  ;;  %5220 = vmatpush1.bf16.msra.mxu1 %v9238_v53  ;;  %v9286_v52 = vld [vmem:[%s11944_s3 + $0x588] ss:$16 sps:$4 sm:$0xff]  }
 0x2bd   :  { %4928 = vmatprep.subr.bf16.mxu0 %v9243_v18  ;;  %5221 = vmatprep.subr.bf16.mxu1 %v9246_v34  ;;  %v12040_v53 = vld [vmem:[#allocation9_spill] sm:$0xff]  ;;  %v9291_v18 = vld [vmem:[%s11944_s3 + $0x5a4] ss:$16 sps:$4 sm:$0xff]   ;;  %v9289_v34 = vld [vmem:[%s11944_s3 + $0x5a0] ss:$16 sps:$4 sm:$0xff]  }
 0x2c0   :  { %4929 = vmatpush1.bf16.msra.mxu0 %v9241_v41  ;;  %5222 = vmatpush1.bf16.msra.mxu1 %v9244_v25  ;;  %v9292_v41 = vld [vmem:[%s11944_s3 + $0x5a8] ss:$16 sps:$4 sm:$0xff]   ;;  %v9294_v25 = vld [vmem:[%s11944_s3 + $0x5ac] ss:$16 sps:$4 sm:$0xff]  }
 0x2c1   :  { %4930 = vmatprep.subr.bf16.mxu0 %v9249_v27  ;;  %5223 = vmatprep.subr.bf16.mxu1 %v9252_v56  ;;  %v12041_v27 = vld [vmem:[#allocation8_spill] sm:$0xff]  ;;  %v12042_v56 = vld [vmem:[#allocation11_spill] sm:$0xff] }
 0x2c2   :  { %3970 = vmatmul.mubr.bf16.gmra.mrb[228].mxu0 %v10062_v46  ;;  %4283 = vmatmul.mubr.bf16.gmra.mrb[228].mxu1 %v10062_v46 }
 0x2c3   :  { %3979 = vmatprep.mubr.bf16.mxu0 %v12037_v30  ;;  %4292 = vmatprep.mubr.bf16.mxu1 %v12037_v30 }
 0x2c4   :  { %4931 = vmatpush1.bf16.msra.mxu0 %v9247_v0  ;;  %5224 = vmatpush1.bf16.msra.mxu1 %v9250_v16  ;;  %v12043_v0 = vld [vmem:[#allocation10_spill] sm:$0xff]  ;;  %v12044_v16 = vld [vmem:[#allocation12_spill] sm:$0xff] }
 0x2c5   :  { %4932 = vmatprep.subr.bf16.mxu0 %v9255_v47  ;;  %5225 = vmatprep.subr.bf16.mxu1 %v9258_v3  ;;  %v9295_v47 = vld [vmem:[%s11944_s3 + $0x5c0] ss:$16 sps:$4 sm:$0xff]   ;;  %v9297_v3 = vld [vmem:[%s11944_s3 + $0x5c4] ss:$16 sps:$4 sm:$0xff]  }
 0x2c8   :  { %4933 = vmatpush1.bf16.msra.mxu0 %v9253_v60  ;;  %5226 = vmatpush1.bf16.msra.mxu1 %v9256_v54  ;;  %v9298_v60 = vld [vmem:[%s11944_s3 + $0x5c8] ss:$16 sps:$4 sm:$0xff]   ;;  %v9300_v54 = vld [vmem:[%s11944_s3 + $0x5cc] ss:$16 sps:$4 sm:$0xff]  }
 0x2c9   :  { %4934 = vmatprep.subr.bf16.mxu0 %v9261_v43  ;;  %5227 = vmatprep.subr.bf16.mxu1 %v9264_v8  ;;  %v9301_v43 = vld [vmem:[%s11944_s3 + $0x5e0] ss:$16 sps:$4 sm:$0xff]   ;;  %v9303_v8 = vld [vmem:[%s11944_s3 + $0x5e4] ss:$16 sps:$4 sm:$0xff]  }
 0x2ca   :  { %3980 = vmatmul.mubr.bf16.gmra.mrb[232].mxu0 %v12038_v39  ;;  %4293 = vmatmul.mubr.bf16.gmra.mrb[232].mxu1 %v12038_v39 }
 0x2cb   :  { %3989 = vmatprep.mubr.bf16.mxu0 %v12039_v62  ;;  %4302 = vmatprep.mubr.bf16.mxu1 %v12039_v62 }
 0x2cc   :  { %4935 = vmatpush1.bf16.msra.mxu0 %v9259_v51  ;;  %5228 = vmatpush1.bf16.msra.mxu1 %v9262_v28  ;;  %v9304_v51 = vld [vmem:[%s11944_s3 + $0x5e8] ss:$16 sps:$4 sm:$0xff]   ;;  %v9306_v28 = vld [vmem:[%s11944_s3 + $0x5ec] ss:$16 sps:$4 sm:$0xff]  }
 0x2cd   :  { %4936 = vmatprep.subr.bf16.mxu0 %v9267_v59  ;;  %5229 = vmatprep.subr.bf16.mxu1 %v9270_v17  ;;  %v12045_v59 = vld [vmem:[#allocation13_spill] sm:$0xff]  ;;  %v12046_v17 = vld [vmem:[#allocation15_spill] sm:$0xff] }
 0x2d0   :  { %4937 = vmatpush1.bf16.msra.mxu0 %v9265_v5  ;;  %5230 = vmatpush1.bf16.msra.mxu1 %v9268_v42  ;;  %v12047_v5 = vld [vmem:[#allocation14_spill] sm:$0xff]  ;;  %v12048_v42 = vld [vmem:[#allocation16_spill] sm:$0xff] }
 0x2d1   :  { %4938 = vmatprep.subr.bf16.mxu0 %v9273_v61  ;;  %5231 = vmatprep.subr.bf16.mxu1 %v9276_v22  ;;  %v12049_v61 = vld [vmem:[#allocation17_spill] sm:$0xff]  ;;  %v12050_v22 = vld [vmem:[#allocation19_spill] sm:$0xff] }
 0x2d2   :  { %3990 = vmatmul.mubr.bf16.gmra.mrb[236].mxu0 %v10136_v26  ;;  %4303 = vmatmul.mubr.bf16.gmra.mrb[236].mxu1 %v10136_v26 }
 0x2d3   :  { %3999 = vmatprep.mubr.bf16.mxu0 %v10192_v2  ;;  %4312 = vmatprep.mubr.bf16.mxu1 %v10192_v2 }
 0x2d4   :  { %4939 = vmatpush1.bf16.msra.mxu0 %v9271_v63  ;;  %5232 = vmatpush1.bf16.msra.mxu1 %v9274_v13  ;;  %v12051_v63 = vld [vmem:[#allocation18_spill] sm:$0xff]  ;;  %v12052_v13 = vld [vmem:[#allocation20_spill] sm:$0xff] }
 0x2d5   :  { %4940 = vmatprep.subr.bf16.mxu0 %v9279_v33  ;;  %5233 = vmatprep.subr.bf16.mxu1 %v9282_v20  ;;  %v12053_v33 = vld [vmem:[#allocation21_spill] sm:$0xff]  ;;  %v12054_v20 = vld [vmem:[#allocation23_spill] sm:$0xff] }
 0x2d8   :  { %4941 = vmatpush1.bf16.msra.mxu0 %v9277_v35  ;;  %5234 = vmatpush1.bf16.msra.mxu1 %v9280_v31  ;;  %v12055_v35 = vld [vmem:[#allocation22_spill] sm:$0xff]  ;;  %v12056_v31 = vld [vmem:[#allocation24_spill] sm:$0xff] }
 0x2d9   :  { %4942 = vmatprep.subr.bf16.mxu0 %v9285_v55  ;;  %5235 = vmatprep.subr.bf16.mxu1 %v9288_v19  ;;  %v12057_v55 = vld [vmem:[#allocation25_spill] sm:$0xff]  ;;  %v12058_v19 = vld [vmem:[#allocation27_spill] sm:$0xff] }
 0x2da   :  { %4000 = vmatmul.mubr.bf16.gmra.mrb[240].mxu0 %v10188_v45  ;;  %4313 = vmatmul.mubr.bf16.gmra.mrb[240].mxu1 %v10188_v45 }
 0x2db   :  { %4009 = vmatprep.mubr.bf16.mxu0 %v12040_v53  ;;  %4322 = vmatprep.mubr.bf16.mxu1 %v12040_v53 }
 0x2dc   :  { %4943 = vmatpush1.bf16.msra.mxu0 %v9283_v6  ;;  %5236 = vmatpush1.bf16.msra.mxu1 %v9286_v52  ;;  %v12059_v6 = vld [vmem:[#allocation26_spill] sm:$0xff]  ;;  %v12060_v52 = vld [vmem:[#allocation28_spill] sm:$0xff] }
 0x2dd   :  { %4944 = vmatprep.subr.bf16.mxu0 %v9291_v18  ;;  %5237 = vmatprep.subr.bf16.mxu1 %v9294_v25  ;;  %v9307_v18 = vld [vmem:[%s11946_s5 + $0xc0] sm:$0xff]   ;;  %v9327_v25 = vld [vmem:[%s11946_s5 + $0x68] sm:$0xff]  }
 0x2e0   :  { %4945 = vmatpush1.bf16.msra.mxu0 %v9289_v34  ;;  %5238 = vmatpush1.bf16.msra.mxu1 %v9292_v41  ;;  %v9308_v34 = vld [vmem:[%s11946_s5 + $0x80] sm:$0xff]  }
 0x2e1   :  { %4946 = vmatprep.subr.bf16.mxu0 %v9297_v3  ;;  %5239 = vmatprep.subr.bf16.mxu1 %v9300_v54  ;;  %v9326_v41 = vld [vmem:[%s11946_s5 + $0x20] sm:$0xff]  }
 0x2e2   :  { %4010 = vmatmul.mubr.bf16.gmra.mrb[244].mxu0 %v12041_v27  ;;  %4323 = vmatmul.mubr.bf16.gmra.mrb[244].mxu1 %v12041_v27  ;;  %v9339_v3 = vld [vmem:[%s11946_s5 + $0x140] sm:$0xff]  }
 0x2e3   :  { %4019 = vmatprep.mubr.bf16.mxu0 %v12042_v56  ;;  %4332 = vmatprep.mubr.bf16.mxu1 %v12042_v56 }
 0x2e4   :  { %4947 = vmatpush1.bf16.msra.mxu0 %v9295_v47  ;;  %5240 = vmatpush1.bf16.msra.mxu1 %v9298_v60  ;;  %v9334_v47 = vld [vmem:[%s11946_s5 + $0xa8] sm:$0xff]  }
 0x2e5   :  { %4948 = vmatprep.subr.bf16.mxu0 %v9303_v8  ;;  %5241 = vmatprep.subr.bf16.mxu1 %v9306_v28 }
 0x2e8   :  { %4949 = vmatpush1.bf16.msra.mxu0 %v9301_v43  ;;  %5242 = vmatpush1.bf16.msra.mxu1 %v9304_v51 }
 0x2e9   :  { %8284 = vmatprep.subr.bf16.mxu0 %v9307_v18 }
 0x2ea   :  { %4020 = vmatmul.mubr.bf16.gmra.mrb[248].mxu0 %v12043_v0  ;;  %4333 = vmatmul.mubr.bf16.gmra.mrb[248].mxu1 %v12043_v0 }
 0x2eb   :  { %4029 = vmatprep.mubr.bf16.mxu0 %v12044_v16  ;;  %4342 = vmatprep.mubr.bf16.mxu1 %v12044_v16 }
 0x2f2   :  { %4030 = vmatmul.mubr.bf16.gmra.mrb[252].mxu0 %v10266_v58  ;;  %4343 = vmatmul.mubr.bf16.gmra.mrb[252].mxu1 %v10266_v58 }
 0x2f3   :  { %4039 = vmatprep.mubr.bf16.mxu0 %v10310_v23  ;;  %4352 = vmatprep.mubr.bf16.mxu1 %v10310_v23 }
 0x2fa   :  { %4040 = vmatmul.mubr.bf16.gmra.mrb[0].mxu0 %v10306_v24  ;;  %4353 = vmatmul.mubr.bf16.gmra.mrb[0].mxu1 %v10306_v24 }
 0x2fb   :  { %4049 = vmatprep.mubr.bf16.mxu0 %v10327_v32  ;;  %4362 = vmatprep.mubr.bf16.mxu1 %v10327_v32 }
 0x302   :  { %4050 = vmatmul.mubr.bf16.gmra.mrb[4].mxu0 %v12045_v59  ;;  %4363 = vmatmul.mubr.bf16.gmra.mrb[4].mxu1 %v12045_v59 }
 0x303   :  { %4059 = vmatprep.mubr.bf16.mxu0 %v12046_v17  ;;  %4372 = vmatprep.mubr.bf16.mxu1 %v12046_v17 }
 0x30a   :  { %4060 = vmatmul.mubr.bf16.gmra.mrb[8].mxu0 %v12047_v5  ;;  %4373 = vmatmul.mubr.bf16.gmra.mrb[8].mxu1 %v12047_v5 }
 0x30b   :  { %4069 = vmatprep.mubr.bf16.mxu0 %v12048_v42  ;;  %4382 = vmatprep.mubr.bf16.mxu1 %v12048_v42 }
 0x312   :  { %4070 = vmatmul.mubr.bf16.gmra.mrb[12].mxu0 %v10384_v4  ;;  %4383 = vmatmul.mubr.bf16.gmra.mrb[12].mxu1 %v10384_v4 }
 0x313   :  { %4079 = vmatprep.mubr.bf16.mxu0 %v10479_v36  ;;  %4392 = vmatprep.mubr.bf16.mxu1 %v10479_v36 }
 0x31a   :  { %4080 = vmatmul.mubr.bf16.gmra.mrb[16].mxu0 %v10469_v40  ;;  %4393 = vmatmul.mubr.bf16.gmra.mrb[16].mxu1 %v10469_v40 }
 0x31b   :  { %4089 = vmatprep.mubr.bf16.mxu0 %v10533_v15  ;;  %4402 = vmatprep.mubr.bf16.mxu1 %v10533_v15 }
 0x322   :  { %4090 = vmatmul.mubr.bf16.gmra.mrb[20].mxu0 %v12049_v61  ;;  %4403 = vmatmul.mubr.bf16.gmra.mrb[20].mxu1 %v12049_v61 }
 0x323   :  { %4099 = vmatprep.mubr.bf16.mxu0 %v12050_v22  ;;  %4412 = vmatprep.mubr.bf16.mxu1 %v12050_v22 }
 0x32a   :  { %4100 = vmatmul.mubr.bf16.gmra.mrb[24].mxu0 %v12051_v63  ;;  %4413 = vmatmul.mubr.bf16.gmra.mrb[24].mxu1 %v12051_v63 }
 0x32b   :  { %4109 = vmatprep.mubr.bf16.mxu0 %v12052_v13  ;;  %4422 = vmatprep.mubr.bf16.mxu1 %v12052_v13 }
 0x332   :  { %4110 = vmatmul.mubr.bf16.gmra.mrb[28].mxu0 %v10682_v9  ;;  %4423 = vmatmul.mubr.bf16.gmra.mrb[28].mxu1 %v10682_v9 }
 0x333   :  { %4119 = vmatprep.mubr.bf16.mxu0 %v10753_v1  ;;  %4432 = vmatprep.mubr.bf16.mxu1 %v10753_v1 }
 0x33a   :  { %4120 = vmatmul.mubr.bf16.gmra.mrb[32].mxu0 %v10749_v29  ;;  %4433 = vmatmul.mubr.bf16.gmra.mrb[32].mxu1 %v10749_v29 }
 0x33b   :  { %4129 = vmatprep.mubr.bf16.mxu0 %v10767_v44  ;;  %4442 = vmatprep.mubr.bf16.mxu1 %v10767_v44 }
 0x342   :  { %4130 = vmatmul.mubr.bf16.gmra.mrb[36].mxu0 %v12053_v33  ;;  %4443 = vmatmul.mubr.bf16.gmra.mrb[36].mxu1 %v12053_v33 }
 0x343   :  { %4139 = vmatprep.mubr.bf16.mxu0 %v12054_v20  ;;  %4452 = vmatprep.mubr.bf16.mxu1 %v12054_v20 }
 0x34a   :  { %4140 = vmatmul.mubr.bf16.gmra.mrb[40].mxu0 %v12055_v35  ;;  %4453 = vmatmul.mubr.bf16.gmra.mrb[40].mxu1 %v12055_v35 }
 0x34b   :  { %4149 = vmatprep.mubr.bf16.mxu0 %v12056_v31  ;;  %4462 = vmatprep.mubr.bf16.mxu1 %v12056_v31 }
 0x352   :  { %4150 = vmatmul.mubr.bf16.gmra.mrb[44].mxu0 %v10809_v48  ;;  %4463 = vmatmul.mubr.bf16.gmra.mrb[44].mxu1 %v10809_v48 }
 0x353   :  { %4159 = vmatprep.mubr.bf16.mxu0 %v10835_v49  ;;  %4472 = vmatprep.mubr.bf16.mxu1 %v10835_v49 }
 0x35a   :  { %4160 = vmatmul.mubr.bf16.gmra.mrb[48].mxu0 %v10833_v10  ;;  %4473 = vmatmul.mubr.bf16.gmra.mrb[48].mxu1 %v10833_v10 }
 0x35b   :  { %4169 = vmatprep.mubr.bf16.mxu0 %v10849_v14  ;;  %4482 = vmatprep.mubr.bf16.mxu1 %v10849_v14 }
 0x362   :  { %4170 = vmatmul.mubr.bf16.gmra.mrb[52].mxu0 %v12057_v55  ;;  %4483 = vmatmul.mubr.bf16.gmra.mrb[52].mxu1 %v12057_v55 }
 0x363   :  { %4179 = vmatprep.mubr.bf16.mxu0 %v12058_v19  ;;  %4492 = vmatprep.mubr.bf16.mxu1 %v12058_v19 }
 0x36a   :  { %4180 = vmatmul.mubr.bf16.gmra.mrb[56].mxu0 %v12059_v6  ;;  %4493 = vmatmul.mubr.bf16.gmra.mrb[56].mxu1 %v12059_v6 }
 0x36b   :  { %4189 = vmatprep.mubr.bf16.mxu0 %v12060_v52  ;;  %4502 = vmatprep.mubr.bf16.mxu1 %v12060_v52 }
 0x372   :  { %4190 = vmatmul.mubr.bf16.gmra.mrb[60].mxu0 %v10885_v7  ;;  %4503 = vmatmul.mubr.bf16.gmra.mrb[60].mxu1 %v10885_v7 }
 0x373   :  { %4199 = vmatprep.mubr.bf16.mxu0 %v10923_v57  ;;  %4512 = vmatprep.mubr.bf16.mxu1 %v10923_v57 }
 0x37a   :  { %4200 = vmatmul.mubr.bf16.gmra.mrb[64].mxu0 %v10913_v11  ;;  %4513 = vmatmul.mubr.bf16.gmra.mrb[64].mxu1 %v10913_v11 }
 0x37b   :  { %4209 = vmatprep.mubr.bf16.mxu0 %v10961_v38  ;;  %4522 = vmatprep.mubr.bf16.mxu1 %v10961_v38 }
 0x382   :  { %4210 = vmatmul.mubr.bf16.gmra.mrb[68].mxu0 %v10953_v37  ;;  %4523 = vmatmul.mubr.bf16.gmra.mrb[68].mxu1 %v10953_v37 }
 0x383   :  { %4950 = vmatprep.mubr.bf16.mxu0 %v10035_v21  ;;  %5243 = vmatprep.mubr.bf16.mxu1 %v10035_v21  ;;  %v9309_v21 = vld [vmem:[%s11946_s5 + $0xc8] sm:$0xff]  }
 0x38a   :  { %4951 = vmatmul.mubr.bf16.vlgmr.msra.gmra.mrb[72].mxu0 %v10031_v12  ;;  %5244 = vmatmul.mubr.bf16.vlgmr.msra.gmra.mrb[72].mxu1 %v10031_v12  ;;  %v9310_v12 = vld [vmem:[%s11946_s5 + $0x88] sm:$0xff]  }
 0x38b   :  { %4960 = vmatprep.mubr.bf16.mxu0 %v10064_v50  ;;  %5253 = vmatprep.mubr.bf16.mxu1 %v10064_v50  ;;  %v9312_v50 = vld [vmem:[%s11946_s5] sm:$0xff]  }
 0x38c   :  { %8285 = vmatpush3.bf16.msra.mxu0 %v9308_v34 }
 0x38d   :  { %8286 = vmatprep.subr.bf16.mxu0 %v9309_v21  ;;  %v5896_v21 = vld [vmem:[%s11947_s4] sm:$0x3] }
 0x390   :  { %8287 = vmatpush3.bf16.msra.mxu0 %v9310_v12 }
 0x392   :  { %4961 = vmatmul.mubr.bf16.gmra.mrb[76].mxu0 %v10062_v46  ;;  %5254 = vmatmul.mubr.bf16.gmra.mrb[76].mxu1 %v10062_v46  ;;  %v9311_v46 = vld [vmem:[%s11946_s5 + $0x40] sm:$0xff]  }
 0x393   :  { %4970 = vmatprep.mubr.bf16.mxu0 %v12037_v30  ;;  %5263 = vmatprep.mubr.bf16.mxu1 %v12037_v30  ;;  %v9313_v30 = vld [vmem:[%s11946_s5 + $0xd0] sm:$0xff]  }
 0x394   :  { %8312 = vmatprep.subr.bf16.mxu1 %v9311_v46  ;;  %8288 = vmatprep.subr.bf16.mxu0 %v9313_v30 }
 0x395   :  { %8313 = vmatpush3.bf16.msra.mxu1 %v9312_v50 }
 0x39a   :  { %4971 = vmatmul.mubr.bf16.gmra.mrb[224].mxu0 %v12038_v39  ;;  %5264 = vmatmul.mubr.bf16.gmra.mrb[224].mxu1 %v12038_v39  ;;  %v9317_v39 = vld [vmem:[%s11946_s5 + $0xd8] sm:$0xff]  }
 0x39b   :  { %4980 = vmatprep.mubr.bf16.mxu0 %v12039_v62  ;;  %5273 = vmatprep.mubr.bf16.mxu1 %v12039_v62  ;;  %v9322_v62 = vld [vmem:[%s11946_s5 + $0xa0] sm:$0xff]  }
 0x3a2   :  { %4981 = vmatmul.mubr.bf16.gmra.mrb[228].mxu0 %v10136_v26  ;;  %5274 = vmatmul.mubr.bf16.gmra.mrb[228].mxu1 %v10136_v26  ;;  %v9314_v26 = vld [vmem:[%s11946_s5 + $0x90] sm:$0xff]  }
 0x3a3   :  { %4990 = vmatprep.mubr.bf16.mxu0 %v10192_v2  ;;  %5283 = vmatprep.mubr.bf16.mxu1 %v10192_v2  ;;  %v9316_v2 = vld [vmem:[%s11946_s5 + $0x8] sm:$0xff]  }
 0x3a4   :  { %8289 = vmatpush3.bf16.msra.mxu0 %v9314_v26  ;;  %v12061_v26 = vld [vmem:[#allocation2_spill] sm:$0xff] }
 0x3a5   :  { %8290 = vmatprep.subr.bf16.mxu0 %v9317_v39 }
 0x3aa   :  { %4991 = vmatmul.mubr.bf16.gmra.mrb[232].mxu0 %v10188_v45  ;;  %5284 = vmatmul.mubr.bf16.gmra.mrb[232].mxu1 %v10188_v45  ;;  %v9315_v45 = vld [vmem:[%s11946_s5 + $0x48] sm:$0xff]  }
 0x3ab   :  { %5000 = vmatprep.mubr.bf16.mxu0 %v12040_v53  ;;  %5293 = vmatprep.mubr.bf16.mxu1 %v12040_v53  ;;  %v9323_v53 = vld [vmem:[%s11946_s5 + $0x58] sm:$0xff]  }
 0x3ac   :  { %8314 = vmatprep.subr.bf16.mxu1 %v9315_v45  ;;  %v12062_v45 = vsub.s32 0, %v12061_v26 }
 0x3ad   :  { %8315 = vmatpush3.bf16.msra.mxu1 %v9316_v2 }
 0x3ae   :  { %v11468_v2 = vrot.slane %v5896_v21, %v12062_v45 }
 0x3b2   :  { %5001 = vmatmul.mubr.bf16.gmra.mrb[236].mxu0 %v12041_v27  ;;  %5294 = vmatmul.mubr.bf16.gmra.mrb[236].mxu1 %v12041_v27  ;;  %v9330_v27 = vld [vmem:[%s11946_s5 + $0x30] sm:$0xff]  }
 0x3b3   :  { %5010 = vmatprep.mubr.bf16.mxu0 %v12042_v56  ;;  %5303 = vmatprep.mubr.bf16.mxu1 %v12042_v56  ;;  %v9331_v56 = vld [vmem:[%s11946_s5 + $0x78] sm:$0xff]  }
 0x3ba   :  { %5011 = vmatmul.mubr.bf16.gmra.mrb[240].mxu0 %v12043_v0  ;;  %5304 = vmatmul.mubr.bf16.gmra.mrb[240].mxu1 %v12043_v0  ;;  %v9332_v0 = vld [vmem:[%s11946_s5 + $0x38] sm:$0xff]  }
 0x3bb   :  { %5020 = vmatprep.mubr.bf16.mxu0 %v12044_v16  ;;  %5313 = vmatprep.mubr.bf16.mxu1 %v12044_v16  ;;  %v9333_v16 = vld [vmem:[%s11946_s5 + $0xe8] sm:$0xff]  }
 0x3c2   :  { %5021 = vmatmul.mubr.bf16.gmra.mrb[244].mxu0 %v10266_v58  ;;  %5314 = vmatmul.mubr.bf16.gmra.mrb[244].mxu1 %v10266_v58  ;;  %v9318_v58 = vld [vmem:[%s11946_s5 + $0x98] sm:$0xff]  }
 0x3c3   :  { %5030 = vmatprep.mubr.bf16.mxu0 %v10310_v23  ;;  %5323 = vmatprep.mubr.bf16.mxu1 %v10310_v23  ;;  %v9319_v23 = vld [vmem:[%s11946_s5 + $0x50] sm:$0xff]  }
 0x3c4   :  { %8291 = vmatpush3.bf16.msra.mxu0 %v9318_v58  ;;  %8316 = vmatprep.subr.bf16.mxu1 %v9319_v23 }
 0x3ca   :  { %5031 = vmatmul.mubr.bf16.gmra.mrb[248].mxu0 %v10306_v24  ;;  %5324 = vmatmul.mubr.bf16.gmra.mrb[248].mxu1 %v10306_v24  ;;  %v9320_v24 = vld [vmem:[%s11946_s5 + $0x10] sm:$0xff]  }
 0x3cb   :  { %5040 = vmatprep.mubr.bf16.mxu0 %v10327_v32  ;;  %5333 = vmatprep.mubr.bf16.mxu1 %v10327_v32  ;;  %v9321_v32 = vld [vmem:[%s11946_s5 + $0xe0] sm:$0xff]  }
 0x3cc   :  { %8317 = vmatpush3.bf16.msra.mxu1 %v9320_v24  ;;  %8292 = vmatprep.subr.bf16.mxu0 %v9321_v32  ;;  %v12063_v32 = vsub.s32 1, %v12061_v26 }
 0x3cd   :  { %8293 = vmatpush3.bf16.msra.mxu0 %v9322_v62  ;;  %8318 = vmatprep.subr.bf16.mxu1 %v9323_v53 }
 0x3ce   :  { %8294 = vmatprep.subr.bf16.mxu0 %v9333_v16  ;;  %v11472_v62 = vrot.slane %v5896_v21, %v12063_v32 }
 0x3d1   :  { %8295 = vmatpush3.bf16.msra.mxu0 %v9334_v47 }
 0x3d2   :  { %5041 = vmatmul.mubr.bf16.gmra.mrb[252].mxu0 %v12045_v59  ;;  %5334 = vmatmul.mubr.bf16.gmra.mrb[252].mxu1 %v12045_v59 }
 0x3d3   :  { %5050 = vmatprep.mubr.bf16.mxu0 %v12046_v17  ;;  %5343 = vmatprep.mubr.bf16.mxu1 %v12046_v17 }
 0x3da   :  { %5051 = vmatmul.mubr.bf16.gmra.mrb[0].mxu0 %v12047_v5  ;;  %5344 = vmatmul.mubr.bf16.gmra.mrb[0].mxu1 %v12047_v5 }
 0x3db   :  { %5060 = vmatprep.mubr.bf16.mxu0 %v12048_v42  ;;  %5353 = vmatprep.mubr.bf16.mxu1 %v12048_v42 }
 0x3e2   :  { %5061 = vmatmul.mubr.bf16.gmra.mrb[4].mxu0 %v10384_v4  ;;  %5354 = vmatmul.mubr.bf16.gmra.mrb[4].mxu1 %v10384_v4  ;;  %v9324_v4 = vld [vmem:[%s11946_s5 + $0x18] sm:$0xff]  }
 0x3e3   :  { %5070 = vmatprep.mubr.bf16.mxu0 %v10479_v36  ;;  %5363 = vmatprep.mubr.bf16.mxu1 %v10479_v36  ;;  %v9325_v36 = vld [vmem:[%s11946_s5 + $0x60] sm:$0xff]  }
 0x3e4   :  { %8319 = vmatpush3.bf16.msra.mxu1 %v9324_v4 }
 0x3e5   :  { %8320 = vmatprep.subr.bf16.mxu1 %v9325_v36 }
 0x3e8   :  { %8321 = vmatpush3.bf16.msra.mxu1 %v9326_v41 }
 0x3e9   :  { %8322 = vmatprep.subr.bf16.mxu1 %v9327_v25 }
 0x3ea   :  { %5071 = vmatmul.mubr.bf16.gmra.mrb[8].mxu0 %v10469_v40  ;;  %5364 = vmatmul.mubr.bf16.gmra.mrb[8].mxu1 %v10469_v40  ;;  %v9328_v40 = vld [vmem:[%s11946_s5 + $0x28] sm:$0xff]  }
 0x3eb   :  { %5080 = vmatprep.mubr.bf16.mxu0 %v10533_v15  ;;  %5373 = vmatprep.mubr.bf16.mxu1 %v10533_v15  ;;  %v9329_v15 = vld [vmem:[%s11946_s5 + $0x70] sm:$0xff]  }
 0x3ec   :  { %8323 = vmatpush3.bf16.msra.mxu1 %v9328_v40 }
 0x3ed   :  { %8324 = vmatprep.subr.bf16.mxu1 %v9329_v15 }
 0x3f0   :  { %8325 = vmatpush3.bf16.msra.mxu1 %v9330_v27 }
 0x3f1   :  { %8326 = vmatprep.subr.bf16.mxu1 %v9331_v56 }
 0x3f2   :  { %5081 = vmatmul.mubr.bf16.gmra.mrb[12].mxu0 %v12049_v61  ;;  %5374 = vmatmul.mubr.bf16.gmra.mrb[12].mxu1 %v12049_v61 }
 0x3f3   :  { %5090 = vmatprep.mubr.bf16.mxu0 %v12050_v22  ;;  %5383 = vmatprep.mubr.bf16.mxu1 %v12050_v22 }
 0x3f4   :  { %8327 = vmatpush3.bf16.msra.mxu1 %v9332_v0 }
 0x3fa   :  { %5091 = vmatmul.mubr.bf16.gmra.mrb[16].mxu0 %v12051_v63  ;;  %5384 = vmatmul.mubr.bf16.gmra.mrb[16].mxu1 %v12051_v63 }
 0x3fb   :  { %5100 = vmatprep.mubr.bf16.mxu0 %v12052_v13  ;;  %5393 = vmatprep.mubr.bf16.mxu1 %v12052_v13 }
 0x402   :  { %5101 = vmatmul.mubr.bf16.gmra.mrb[20].mxu0 %v10682_v9  ;;  %5394 = vmatmul.mubr.bf16.gmra.mrb[20].mxu1 %v10682_v9  ;;  %v9335_v9 = vld [vmem:[%s11946_s5 + $0xf0] sm:$0xff]  }
 0x403   :  { %5110 = vmatprep.mubr.bf16.mxu0 %v10753_v1  ;;  %5403 = vmatprep.mubr.bf16.mxu1 %v10753_v1  ;;  %v9337_v1 = vld [vmem:[%s11946_s5 + $0xf8] sm:$0xff]  }
 0x404   :  { %8296 = vmatprep.subr.bf16.mxu0 %v9335_v9 }
 0x40a   :  { %5111 = vmatmul.mubr.bf16.gmra.mrb[24].mxu0 %v10749_v29  ;;  %5404 = vmatmul.mubr.bf16.gmra.mrb[24].mxu1 %v10749_v29  ;;  %v9336_v29 = vld [vmem:[%s11946_s5 + $0xb0] sm:$0xff]  }
 0x40b   :  { %5120 = vmatprep.mubr.bf16.mxu0 %v10767_v44  ;;  %5413 = vmatprep.mubr.bf16.mxu1 %v10767_v44  ;;  %v9338_v44 = vld [vmem:[%s11946_s5 + $0xb8] sm:$0xff]  }
 0x40c   :  { %8297 = vmatpush3.bf16.msra.mxu0 %v9336_v29 }
 0x40d   :  { %8298 = vmatprep.subr.bf16.mxu0 %v9337_v1 }
 0x410   :  { %8299 = vmatpush3.bf16.msra.mxu0 %v9338_v44 }
 0x411   :  { %8340 = vmatprep.subr.bf16.mxu0 %v9339_v3 }
 0x412   :  { %5121 = vmatmul.mubr.bf16.gmra.mrb[28].mxu0 %v12053_v33  ;;  %5414 = vmatmul.mubr.bf16.gmra.mrb[28].mxu1 %v12053_v33 }
 0x413   :  { %5130 = vmatprep.mubr.bf16.mxu0 %v12054_v20  ;;  %5423 = vmatprep.mubr.bf16.mxu1 %v12054_v20 }
 0x41a   :  { %5131 = vmatmul.mubr.bf16.gmra.mrb[32].mxu0 %v12055_v35  ;;  %5424 = vmatmul.mubr.bf16.gmra.mrb[32].mxu1 %v12055_v35 }
 0x41b   :  { %5140 = vmatprep.mubr.bf16.mxu0 %v12056_v31  ;;  %5433 = vmatprep.mubr.bf16.mxu1 %v12056_v31 }
 0x422   :  { %5141 = vmatmul.mubr.bf16.gmra.mrb[36].mxu0 %v10809_v48  ;;  %5434 = vmatmul.mubr.bf16.gmra.mrb[36].mxu1 %v10809_v48  ;;  %v9355_v48 = vld [vmem:[%s11946_s5 + $0x1c0] sm:$0xff]  }
 0x423   :  { %5150 = vmatprep.mubr.bf16.mxu0 %v10835_v49  ;;  %5443 = vmatprep.mubr.bf16.mxu1 %v10835_v49 }
 0x424   :  { %8368 = vmatprep.subr.bf16.mxu1 %v9355_v48 }
 0x42a   :  { %5151 = vmatmul.mubr.bf16.gmra.mrb[40].mxu0 %v10833_v10  ;;  %5444 = vmatmul.mubr.bf16.gmra.mrb[40].mxu1 %v10833_v10 }
 0x42b   :  { %5160 = vmatprep.mubr.bf16.mxu0 %v10849_v14  ;;  %5453 = vmatprep.mubr.bf16.mxu1 %v10849_v14 }
 0x432   :  { %5161 = vmatmul.mubr.bf16.gmra.mrb[44].mxu0 %v12057_v55  ;;  %5454 = vmatmul.mubr.bf16.gmra.mrb[44].mxu1 %v12057_v55 }
 0x433   :  { %5170 = vmatprep.mubr.bf16.mxu0 %v12058_v19  ;;  %5463 = vmatprep.mubr.bf16.mxu1 %v12058_v19 }
 0x43a   :  { %5171 = vmatmul.mubr.bf16.gmra.mrb[48].mxu0 %v12059_v6  ;;  %5464 = vmatmul.mubr.bf16.gmra.mrb[48].mxu1 %v12059_v6 }
 0x43b   :  { %5180 = vmatprep.mubr.bf16.mxu0 %v12060_v52  ;;  %5473 = vmatprep.mubr.bf16.mxu1 %v12060_v52 }
 0x442   :  { %5181 = vmatmul.mubr.bf16.gmra.mrb[52].mxu0 %v10885_v7  ;;  %5474 = vmatmul.mubr.bf16.gmra.mrb[52].mxu1 %v10885_v7 }
 0x443   :  { %5190 = vmatprep.mubr.bf16.mxu0 %v10923_v57  ;;  %5483 = vmatprep.mubr.bf16.mxu1 %v10923_v57 }
 0x44a   :  { %5191 = vmatmul.mubr.bf16.gmra.mrb[56].mxu0 %v10913_v11  ;;  %5484 = vmatmul.mubr.bf16.gmra.mrb[56].mxu1 %v10913_v11 }
 0x44b   :  { %5200 = vmatprep.mubr.bf16.mxu0 %v10961_v38  ;;  %5493 = vmatprep.mubr.bf16.mxu1 %v10961_v38 }
 0x44d   :  { %v11429_v10 = vpop.f32.mrb[64].mxu0  ;;  %v11431_v49 = vpop.f32.mrb[64].mxu1 }
 0x44e   :  { %v11433_v14 = vpop.f32.mrb[65].mxu0  ;;  %v11435_v60 = vpop.f32.mrb[65].mxu1 }
 0x44f   :  { %v11437_v7 = vpop.f32.mrb[66].mxu0  ;;  %v11439_v54 = vpop.f32.mrb[66].mxu1 }
 0x450   :  { %v11441_v57 = vpop.f32.mrb[67].mxu0  ;;  %v11443_v43 = vpop.f32.mrb[67].mxu1 }
 0x452   :  { %5201 = vmatmul.mubr.bf16.gmra.mrb[60].mxu0 %v10953_v37  ;;  %5494 = vmatmul.mubr.bf16.gmra.mrb[60].mxu1 %v10953_v37 }
 0x455   :  { %v11447_v11 = vpop.f32.mrb[68].mxu0  ;;  %v11449_v38 = vpop.f32.mrb[68].mxu1 }
 0x456   :  { %v11451_v8 = vpop.f32.mrb[69].mxu0  ;;  %v11453_v51 = vpop.f32.mrb[69].mxu1 }
 0x457   :  { %v11455_v28 = vpop.f32.mrb[70].mxu0  ;;  %v11457_v59 = vpop.f32.mrb[70].mxu1 }
 0x458   :  { %v11459_v17 = vpop.f32.mrb[71].mxu0  ;;  %v11461_v5 = vpop.f32.mrb[71].mxu1 }
 0x45d   :  { %v4952_v42 = vpop.f32.mrb[72].mxu0  ;;  %v5245_v61 = vpop.f32.mrb[72].mxu1 }
 0x45e   :  { %v4954_v22 = vpop.f32.mrb[73].mxu0  ;;  %v5247_v37 = vpop.f32.mrb[73].mxu1 }
 0x45f   :  { %v4956_v63 = vpop.f32.mrb[74].mxu0  ;;  %v5249_v13 = vpop.f32.mrb[74].mxu1 }
 0x460   :  { %v4958_v33 = vpop.f32.mrb[75].mxu0  ;;  %v5251_v20 = vpop.f32.mrb[75].mxu1 }
 0x465   :  { %v4962_v35 = vpop.f32.mrb[76].mxu0  ;;  %v5255_v31 = vpop.f32.mrb[76].mxu1 }
 0x466   :  { %v4964_v55 = vpop.f32.mrb[77].mxu0  ;;  %v5257_v19 = vpop.f32.mrb[77].mxu1 }
 0x467   :  { %v4966_v6 = vpop.f32.mrb[78].mxu0  ;;  %v5259_v52 = vpop.f32.mrb[78].mxu1 }
 0x468   :  { %v4968_v18 = vpop.f32.mrb[79].mxu0  ;;  %v5261_v34 = vpop.f32.mrb[79].mxu1 }
 0x46d   :  { %v4972_v12 = vpop.f32.mrb[224].mxu0  ;;  %v5265_v46 = vpop.f32.mrb[224].mxu1 }
 0x46e   :  { %v5728_v50 = vmax.f32 %v4952_v42, %v4972_v12  ;;  %v5730_v30 = vmax.f32 %v5245_v61, %v5265_v46  ;;  %v4974_v39 = vpop.f32.mrb[225].mxu0  ;;  %v5267_v58 = vpop.f32.mrb[225].mxu1 }
 0x46f   :  { %v5729_v23 = vmax.f32 %v4954_v22, %v4974_v39  ;;  %v5731_v24 = vmax.f32 %v5247_v37, %v5267_v58  ;;  %v4976_v53 = vpop.f32.mrb[226].mxu0  ;;  %v5269_v4 = vpop.f32.mrb[226].mxu1 }
 0x470   :  { %v5840_v36 = vmax.f32 %v5728_v50, %v5730_v30  ;;  %v5732_v41 = vmax.f32 %v4956_v63, %v4976_v53  ;;  %v5734_v25 = vmax.f32 %v5249_v13, %v5269_v4  ;;  %v4978_v40 = vpop.f32.mrb[227].mxu0  ;;  %v5271_v15 = vpop.f32.mrb[227].mxu1 }
 0x471   :  { %v5841_v27 = vmax.f32 %v5729_v23, %v5731_v24  ;;  %v5733_v56 = vmax.f32 %v4958_v33, %v4978_v40  ;;  %v5735_v0 = vmax.f32 %v5251_v20, %v5271_v15 }
 0x472   :  { %v5908_v16 = vadd.f32 %v11468_v2, %v5840_v36  ;;  %v5842_v47 = vmax.f32 %v5732_v41, %v5734_v25  ;;  %v9358_v25 = vld [vmem:[%s11946_s5 + $0x188] sm:$0xff]  }
 0x473   :  { %v5909_v9 = vadd.f32 %v11472_v62, %v5841_v27  ;;  %v5843_v29 = vmax.f32 %v5733_v56, %v5735_v0  ;;  %v9359_v0 = vld [vmem:[%s11946_s5 + $0x1d0] sm:$0xff]  }
 0x474   :  { %v5910_v1 = vadd.f32 %v11468_v2, %v5842_v47  ;;  %v5964_v42 = vmax.f32 %v5908_v16, 0.0 }
 0x475   :  { %v5911_v44 = vadd.f32 %v11472_v62, %v5843_v29  ;;  %v4982_v3 = vpop.f32.mrb[228].mxu0  ;;  %v5275_v48 = vpop.f32.mrb[228].mxu1  ;;  %v5965_v33 = vmax.f32 %v5909_v9, 0.0 }
 0x476   :  { %v5966_v61 = vmax.f32 %v5910_v1, 0.0  ;;  %v5736_v22 = vmax.f32 %v4962_v35, %v4982_v3  ;;  %v5738_v37 = vmax.f32 %v5255_v31, %v5275_v48  ;;  %v4984_v63 = vpop.f32.mrb[229].mxu0  ;;  %v5277_v13 = vpop.f32.mrb[229].mxu1  ;;  %v9356_v35 = vld [vmem:[%s11946_s5 + $0x180] sm:$0xff]  }
 0x477   :  { %v5967_v20 = vmax.f32 %v5911_v44, 0.0  ;;  %v5737_v21 = vmax.f32 %v4964_v55, %v4984_v63  ;;  %v5739_v12 = vmax.f32 %v5257_v19, %v5277_v13  ;;  %v4986_v46 = vpop.f32.mrb[230].mxu0  ;;  %v5279_v50 = vpop.f32.mrb[230].mxu1  ;;  %v9357_v19 = vld [vmem:[%s11946_s5 + $0x1c8] sm:$0xff]   ;;  %v9362_v63 = vld [vmem:[%s11946_s5 + $0x198] sm:$0xff]  }
 0x478   :  { %v6020_v30 = vpack.c.bf16 %v5966_v61, %v5964_v42  ;;  %v5844_v26 = vmax.f32 %v5736_v22, %v5738_v37  ;;  %v5740_v45 = vmax.f32 %v4966_v6, %v4986_v46  ;;  %v5742_v39 = vmax.f32 %v5259_v52, %v5279_v50  ;;  %v4988_v58 = vpop.f32.mrb[231].mxu0  ;;  %v5281_v23 = vpop.f32.mrb[231].mxu1  ;;  %v9360_v42 = vld [vmem:[%s11946_s5 + $0x190] sm:$0xff]   ;;  %v9361_v61 = vld [vmem:[%s11946_s5 + $0x1d8] sm:$0xff]  }
 0x479   :  { %v5845_v24 = vmax.f32 %v5737_v21, %v5739_v12  ;;  %v5741_v32 = vmax.f32 %v4968_v18, %v4988_v58  ;;  %v5743_v53 = vmax.f32 %v5261_v34, %v5281_v23  ;;  %v6021_v4 = vpack.c.bf16 %v5967_v20, %v5965_v33  ;;  %v9363_v20 = vld [vmem:[%s11946_s5 + $0x1e0] sm:$0xff]   ;;  %v9366_v58 = vld [vmem:[%s11946_s5 + $0x1a8] sm:$0xff]  }
 0x47a   :  { %v5912_v31 = vadd.f32 %v11468_v2, %v5844_v26  ;;  %v5846_v55 = vmax.f32 %v5740_v45, %v5742_v39  ;;  %v9365_v26 = vld [vmem:[%s11946_s5 + $0x1e8] sm:$0xff]  }
 0x47b   :  { %v5913_v6 = vadd.f32 %v11472_v62, %v5845_v24  ;;  %v5847_v52 = vmax.f32 %v5741_v32, %v5743_v53  ;;  %6386 = vmatprep.mubr.bf16.mxu1 %v6021_v4  ;;  %v9367_v4 = vld [vmem:[%s11946_s5 + $0x1f0] sm:$0xff]  }
 0x47c   :  { %v5914_v36 = vadd.f32 %v11468_v2, %v5846_v55  ;;  %6387 = vmatmul.mubr.bf16.vlgmr.msra.gmra.mrb[80].mxu1 %v6020_v30  ;;  %v5968_v40 = vmax.f32 %v5912_v31, 0.0  ;;  %v9364_v30 = vld [vmem:[%s11946_s5 + $0x1a0] sm:$0xff]  }
 0x47d   :  { %v5915_v18 = vadd.f32 %v11472_v62, %v5847_v52  ;;  %v4992_v34 = vpop.f32.mrb[232].mxu0  ;;  %v5285_v41 = vpop.f32.mrb[232].mxu1  ;;  %8369 = vmatpush3.bf16.msra.mxu1 %v9356_v35  ;;  %v5969_v16 = vmax.f32 %v5913_v6, 0.0 }
 0x47e   :  { %v5970_v15 = vmax.f32 %v5914_v36, 0.0  ;;  %v4994_v27 = vpop.f32.mrb[233].mxu0  ;;  %v5287_v56 = vpop.f32.mrb[233].mxu1  ;;  %8370 = vmatprep.subr.bf16.mxu1 %v9357_v19 }
 0x47f   :  { %v5971_v47 = vmax.f32 %v5915_v18, 0.0  ;;  %v4996_v9 = vpop.f32.mrb[234].mxu0  ;;  %v5289_v29 = vpop.f32.mrb[234].mxu1 }
 0x480   :  { %v6022_v1 = vpack.c.bf16 %v5970_v15, %v5968_v40  ;;  %v4998_v44 = vpop.f32.mrb[235].mxu0  ;;  %v5291_v3 = vpop.f32.mrb[235].mxu1 }
 0x481   :  { %v6023_v48 = vpack.c.bf16 %v5971_v47, %v5969_v16  ;;  %8371 = vmatpush3.bf16.msra.mxu1 %v9358_v25 }
 0x482   :  { %8372 = vmatprep.subr.bf16.mxu1 %v9359_v0 }
 0x483   :  { %6394 = vmatprep.mubr.bf16.mxu1 %v6023_v48 }
 0x484   :  { %6395 = vmatmul.mubr.bf16.gmra.mrb[84].mxu1 %v6022_v1 }
 0x485   :  { %v11500_v22 = vpop.f32.mrb[236].mxu0  ;;  %v11502_v37 = vpop.f32.mrb[236].mxu1  ;;  %8373 = vmatpush3.bf16.msra.mxu1 %v9360_v42 }
 0x486   :  { %v11507_v13 = vpop.f32.mrb[237].mxu0  ;;  %v11509_v33 = vpop.f32.mrb[237].mxu1  ;;  %8374 = vmatprep.subr.bf16.mxu1 %v9361_v61 }
 0x487   :  { %v11514_v21 = vpop.f32.mrb[238].mxu0  ;;  %v11516_v12 = vpop.f32.mrb[238].mxu1 }
 0x488   :  { %v11518_v46 = vpop.f32.mrb[239].mxu0  ;;  %v11520_v50 = vpop.f32.mrb[239].mxu1 }
 0x489   :  { %8375 = vmatpush3.bf16.msra.mxu1 %v9362_v63 }
 0x48a   :  { %8376 = vmatprep.subr.bf16.mxu1 %v9363_v20 }
 0x48d   :  { %v5012_v45 = vpop.f32.mrb[240].mxu0  ;;  %v5305_v39 = vpop.f32.mrb[240].mxu1  ;;  %8377 = vmatpush3.bf16.msra.mxu1 %v9364_v30 }
 0x48e   :  { %v5744_v23 = vmax.f32 %v4992_v34, %v5012_v45  ;;  %v5746_v24 = vmax.f32 %v5285_v41, %v5305_v39  ;;  %v5014_v32 = vpop.f32.mrb[241].mxu0  ;;  %v5307_v53 = vpop.f32.mrb[241].mxu1  ;;  %8378 = vmatprep.subr.bf16.mxu1 %v9365_v26  ;;  %v9368_v41 = vld [vmem:[%s11946_s5 + $0x1b0] sm:$0xff]   ;;  %v9387_v26 = vld [vmem:[%s11946_s5 + $0x2c0] sm:$0xff]  }
 0x48f   :  { %v5745_v35 = vmax.f32 %v4994_v27, %v5014_v32  ;;  %v5747_v31 = vmax.f32 %v5287_v56, %v5307_v53  ;;  %v5016_v55 = vpop.f32.mrb[242].mxu0  ;;  %v5309_v19 = vpop.f32.mrb[242].mxu1  ;;  %v9369_v27 = vld [vmem:[%s11946_s5 + $0x1f8] sm:$0xff]  }
 0x490   :  { %v5848_v6 = vmax.f32 %v5744_v23, %v5746_v24  ;;  %v5748_v52 = vmax.f32 %v4996_v9, %v5016_v55  ;;  %v5750_v36 = vmax.f32 %v5289_v29, %v5309_v19  ;;  %v5018_v18 = vpop.f32.mrb[243].mxu0  ;;  %v5311_v25 = vpop.f32.mrb[243].mxu1 }
 0x491   :  { %v5849_v40 = vmax.f32 %v5745_v35, %v5747_v31  ;;  %v5749_v15 = vmax.f32 %v4998_v44, %v5018_v18  ;;  %v5751_v34 = vmax.f32 %v5291_v3, %v5311_v25  ;;  %8379 = vmatpush3.bf16.msra.mxu1 %v9366_v58  ;;  %v9370_v3 = vld [vmem:[%s11946_s5 + $0x1b8] sm:$0xff]  }
 0x492   :  { %v5916_v0 = vadd.f32 %v11468_v2, %v5848_v6  ;;  %v5850_v16 = vmax.f32 %v5748_v52, %v5750_v36  ;;  %8380 = vmatprep.subr.bf16.mxu1 %v9367_v4 }
 0x493   :  { %v5917_v56 = vadd.f32 %v11472_v62, %v5849_v40  ;;  %v5851_v47 = vmax.f32 %v5749_v15, %v5751_v34  ;;  %v9342_v15 = vld [vmem:[%s11946_s5 + $0x108] sm:$0xff]  }
 0x494   :  { %v5918_v9 = vadd.f32 %v11468_v2, %v5850_v16  ;;  %v5972_v48 = vmax.f32 %v5916_v0, 0.0 }
 0x495   :  { %v5919_v29 = vadd.f32 %v11472_v62, %v5851_v47  ;;  %v5022_v1 = vpop.f32.mrb[244].mxu0  ;;  %v5315_v44 = vpop.f32.mrb[244].mxu1  ;;  %8381 = vmatpush3.bf16.msra.mxu1 %v9368_v41  ;;  %v5973_v45 = vmax.f32 %v5917_v56, 0.0 }
 0x496   :  { %v5974_v42 = vmax.f32 %v5918_v9, 0.0  ;;  %v5752_v61 = vmax.f32 %v11500_v22, %v5022_v1  ;;  %v5754_v63 = vmax.f32 %v11502_v37, %v5315_v44  ;;  %v5024_v20 = vpop.f32.mrb[245].mxu0  ;;  %v5317_v30 = vpop.f32.mrb[245].mxu1  ;;  %8382 = vmatprep.subr.bf16.mxu1 %v9369_v27  ;;  %v9343_v27 = vld [vmem:[%s11946_s5 + $0x150] sm:$0xff]  }
 0x497   :  { %v5975_v39 = vmax.f32 %v5919_v29, 0.0  ;;  %v5753_v58 = vmax.f32 %v11507_v13, %v5024_v20  ;;  %v5755_v23 = vmax.f32 %v11509_v33, %v5317_v30  ;;  %v5026_v24 = vpop.f32.mrb[246].mxu0  ;;  %v5319_v32 = vpop.f32.mrb[246].mxu1  ;;  %v9340_v13 = vld [vmem:[%s11946_s5 + $0x100] sm:$0xff]   ;;  %v9346_v30 = vld [vmem:[%s11946_s5 + $0x118] sm:$0xff]  }
 0x498   :  { %v6024_v53 = vpack.c.bf16 %v5974_v42, %v5972_v48  ;;  %v5852_v4 = vmax.f32 %v5752_v61, %v5754_v63  ;;  %v5756_v22 = vmax.f32 %v11514_v21, %v5026_v24  ;;  %v5758_v37 = vmax.f32 %v11516_v12, %v5319_v32  ;;  %v5028_v35 = vpop.f32.mrb[247].mxu0  ;;  %v5321_v31 = vpop.f32.mrb[247].mxu1  ;;  %v9341_v21 = vld [vmem:[%s11946_s5 + $0x148] sm:$0xff]   ;;  %v9344_v42 = vld [vmem:[%s11946_s5 + $0x110] sm:$0xff]   ;;  %v9345_v61 = vld [vmem:[%s11946_s5 + $0x158] sm:$0xff]  }
 0x499   :  { %v5853_v55 = vmax.f32 %v5753_v58, %v5755_v23  ;;  %v5757_v19 = vmax.f32 %v11518_v46, %v5028_v35  ;;  %v5759_v6 = vmax.f32 %v11520_v50, %v5321_v31  ;;  %v6025_v52 = vpack.c.bf16 %v5975_v39, %v5973_v45  ;;  %8383 = vmatpush3.bf16.msra.mxu1 %v9370_v3  ;;  %v9347_v39 = vld [vmem:[%s11946_s5 + $0x160] sm:$0xff]   ;;  %v9350_v35 = vld [vmem:[%s11946_s5 + $0x128] sm:$0xff]  }
 0x49a   :  { %v5920_v33 = vadd.f32 %v11468_v2, %v5852_v4  ;;  %v5854_v36 = vmax.f32 %v5756_v22, %v5758_v37  ;;  %8424 = vmatprep.subr.bf16.mxu1 %v9387_v26  ;;  %v9349_v4 = vld [vmem:[%s11946_s5 + $0x168] sm:$0xff]  }
 0x49b   :  { %v5921_v12 = vadd.f32 %v11472_v62, %v5853_v55  ;;  %v5855_v18 = vmax.f32 %v5757_v19, %v5759_v6  ;;  %6241 = vmatprep.mubr.bf16.mxu0 %v6025_v52  ;;  %v9351_v52 = vld [vmem:[%s11946_s5 + $0x170] sm:$0xff]  }
 0x49c   :  { %v5922_v46 = vadd.f32 %v11468_v2, %v5854_v36  ;;  %6242 = vmatmul.mubr.bf16.vlgmr.msra.gmra.mrb[80].mxu0 %v6024_v53  ;;  %v5976_v34 = vmax.f32 %v5920_v33, 0.0  ;;  %v9348_v53 = vld [vmem:[%s11946_s5 + $0x120] sm:$0xff]  }
 0x49d   :  { %v5923_v50 = vadd.f32 %v11472_v62, %v5855_v18  ;;  %v5032_v25 = vpop.f32.mrb[248].mxu0  ;;  %v5325_v40 = vpop.f32.mrb[248].mxu1  ;;  %8341 = vmatpush3.bf16.msra.mxu0 %v9340_v13  ;;  %v5977_v56 = vmax.f32 %v5921_v12, 0.0 }
 0x49e   :  { %v5978_v41 = vmax.f32 %v5922_v46, 0.0  ;;  %v5034_v0 = vpop.f32.mrb[249].mxu0  ;;  %v5327_v16 = vpop.f32.mrb[249].mxu1  ;;  %8342 = vmatprep.subr.bf16.mxu0 %v9341_v21 }
 0x49f   :  { %v5979_v47 = vmax.f32 %v5923_v50, 0.0  ;;  %v5036_v9 = vpop.f32.mrb[250].mxu0  ;;  %v5329_v29 = vpop.f32.mrb[250].mxu1 }
 0x4a0   :  { %v6026_v1 = vpack.c.bf16 %v5978_v41, %v5976_v34  ;;  %v5038_v44 = vpop.f32.mrb[251].mxu0  ;;  %v5331_v3 = vpop.f32.mrb[251].mxu1 }
 0x4a1   :  { %8343 = vmatpush3.bf16.msra.mxu0 %v9342_v15  ;;  %v6027_v48 = vpack.c.bf16 %v5979_v47, %v5977_v56 }
 0x4a2   :  { %8344 = vmatprep.subr.bf16.mxu0 %v9343_v27 }
 0x4a3   :  { %6249 = vmatprep.mubr.bf16.mxu0 %v6027_v48 }
 0x4a4   :  { %6250 = vmatmul.mubr.bf16.gmra.mrb[84].mxu0 %v6026_v1 }
 0x4a5   :  { %v11580_v63 = vpop.f32.mrb[252].mxu0  ;;  %v11582_v20 = vpop.f32.mrb[252].mxu1  ;;  %8345 = vmatpush3.bf16.msra.mxu0 %v9344_v42 }
 0x4a6   :  { %v11587_v26 = vpop.f32.mrb[253].mxu0  ;;  %v11589_v45 = vpop.f32.mrb[253].mxu1  ;;  %8346 = vmatprep.subr.bf16.mxu0 %v9345_v61 }
 0x4a7   :  { %v11594_v58 = vpop.f32.mrb[254].mxu0  ;;  %v11596_v23 = vpop.f32.mrb[254].mxu1 }
 0x4a8   :  { %v11598_v24 = vpop.f32.mrb[255].mxu0  ;;  %v11600_v32 = vpop.f32.mrb[255].mxu1 }
 0x4a9   :  { %8347 = vmatpush3.bf16.msra.mxu0 %v9346_v30 }
 0x4aa   :  { %8348 = vmatprep.subr.bf16.mxu0 %v9347_v39 }
 0x4ad   :  { %v5052_v22 = vpop.f32.mrb[0].mxu0  ;;  %v5345_v37 = vpop.f32.mrb[0].mxu1  ;;  %8349 = vmatpush3.bf16.msra.mxu0 %v9348_v53 }
 0x4ae   :  { %v5760_v31 = vmax.f32 %v5032_v25, %v5052_v22  ;;  %v5762_v55 = vmax.f32 %v5325_v40, %v5345_v37  ;;  %v5054_v19 = vpop.f32.mrb[1].mxu0  ;;  %v5347_v6 = vpop.f32.mrb[1].mxu1  ;;  %8350 = vmatprep.subr.bf16.mxu0 %v9349_v4  ;;  %v9352_v40 = vld [vmem:[%s11946_s5 + $0x130] sm:$0xff]   ;;  %v9371_v4 = vld [vmem:[%s11946_s5 + $0x240] sm:$0xff]  }
 0x4af   :  { %v5761_v13 = vmax.f32 %v5034_v0, %v5054_v19  ;;  %v5763_v33 = vmax.f32 %v5327_v16, %v5347_v6  ;;  %v5056_v36 = vpop.f32.mrb[2].mxu0  ;;  %v5349_v21 = vpop.f32.mrb[2].mxu1  ;;  %v9353_v0 = vld [vmem:[%s11946_s5 + $0x178] sm:$0xff]  }
 0x4b0   :  { %v5856_v12 = vmax.f32 %v5760_v31, %v5762_v55  ;;  %v5764_v18 = vmax.f32 %v5036_v9, %v5056_v36  ;;  %v5766_v46 = vmax.f32 %v5329_v29, %v5349_v21  ;;  %v5058_v50 = vpop.f32.mrb[3].mxu0  ;;  %v5351_v15 = vpop.f32.mrb[3].mxu1 }
 0x4b1   :  { %v5857_v34 = vmax.f32 %v5761_v13, %v5763_v33  ;;  %v5765_v41 = vmax.f32 %v5038_v44, %v5058_v50  ;;  %v5767_v25 = vmax.f32 %v5331_v3, %v5351_v15  ;;  %8351 = vmatpush3.bf16.msra.mxu0 %v9350_v35  ;;  %v9354_v3 = vld [vmem:[%s11946_s5 + $0x138] sm:$0xff]  }
 0x4b2   :  { %v5924_v27 = vadd.f32 %v11468_v2, %v5856_v12  ;;  %v5858_v56 = vmax.f32 %v5764_v18, %v5766_v46  ;;  %8352 = vmatprep.subr.bf16.mxu0 %v9351_v52 }
 0x4b3   :  { %v5925_v16 = vadd.f32 %v11472_v62, %v5857_v34  ;;  %v5859_v47 = vmax.f32 %v5765_v41, %v5767_v25  ;;  %v9374_v41 = vld [vmem:[%s11946_s5 + $0x208] sm:$0xff]  }
 0x4b4   :  { %v5926_v9 = vadd.f32 %v11468_v2, %v5858_v56  ;;  %v5980_v48 = vmax.f32 %v5924_v27, 0.0 }
 0x4b5   :  { %v5927_v29 = vadd.f32 %v11472_v62, %v5859_v47  ;;  %v5062_v1 = vpop.f32.mrb[4].mxu0  ;;  %v5355_v44 = vpop.f32.mrb[4].mxu1  ;;  %8353 = vmatpush3.bf16.msra.mxu0 %v9352_v40  ;;  %v5981_v22 = vmax.f32 %v5925_v16, 0.0 }
 0x4b6   :  { %v5982_v42 = vmax.f32 %v5926_v9, 0.0  ;;  %v5768_v61 = vmax.f32 %v11580_v63, %v5062_v1  ;;  %v5770_v30 = vmax.f32 %v11582_v20, %v5355_v44  ;;  %v5064_v39 = vpop.f32.mrb[5].mxu0  ;;  %v5357_v53 = vpop.f32.mrb[5].mxu1  ;;  %8354 = vmatprep.subr.bf16.mxu0 %v9353_v0  ;;  %v9375_v0 = vld [vmem:[%s11946_s5 + $0x250] sm:$0xff]  }
 0x4b7   :  { %v5983_v37 = vmax.f32 %v5927_v29, 0.0  ;;  %v5769_v35 = vmax.f32 %v11587_v26, %v5064_v39  ;;  %v5771_v31 = vmax.f32 %v11589_v45, %v5357_v53  ;;  %v5066_v55 = vpop.f32.mrb[6].mxu0  ;;  %v5359_v19 = vpop.f32.mrb[6].mxu1  ;;  %v9372_v26 = vld [vmem:[%s11946_s5 + $0x200] sm:$0xff]   ;;  %v9378_v53 = vld [vmem:[%s11946_s5 + $0x218] sm:$0xff]  }
 0x4b8   :  { %v6028_v6 = vpack.c.bf16 %v5982_v42, %v5980_v48  ;;  %v5860_v52 = vmax.f32 %v5768_v61, %v5770_v30  ;;  %v5772_v63 = vmax.f32 %v11594_v58, %v5066_v55  ;;  %v5774_v20 = vmax.f32 %v11596_v23, %v5359_v19  ;;  %v5068_v13 = vpop.f32.mrb[7].mxu0  ;;  %v5361_v33 = vpop.f32.mrb[7].mxu1  ;;  %v9373_v58 = vld [vmem:[%s11946_s5 + $0x248] sm:$0xff]   ;;  %v9376_v42 = vld [vmem:[%s11946_s5 + $0x210] sm:$0xff]   ;;  %v9377_v61 = vld [vmem:[%s11946_s5 + $0x258] sm:$0xff]  }
 0x4b9   :  { %v5861_v36 = vmax.f32 %v5769_v35, %v5771_v31  ;;  %v5773_v21 = vmax.f32 %v11598_v24, %v5068_v13  ;;  %v5775_v12 = vmax.f32 %v11600_v32, %v5361_v33  ;;  %8355 = vmatpush3.bf16.msra.mxu0 %v9354_v3  ;;  %v6029_v18 = vpack.c.bf16 %v5983_v37, %v5981_v22  ;;  %v9379_v37 = vld [vmem:[%s11946_s5 + $0x260] sm:$0xff]   ;;  %v9382_v13 = vld [vmem:[%s11946_s5 + $0x228] sm:$0xff]  }
 0x4ba   :  { %v5928_v45 = vadd.f32 %v11468_v2, %v5860_v52  ;;  %v5862_v46 = vmax.f32 %v5772_v63, %v5774_v20  ;;  %8396 = vmatprep.subr.bf16.mxu0 %v9371_v4  ;;  %v9381_v52 = vld [vmem:[%s11946_s5 + $0x268] sm:$0xff]  }
 0x4bb   :  { %v5929_v23 = vadd.f32 %v11472_v62, %v5861_v36  ;;  %v5863_v50 = vmax.f32 %v5773_v21, %v5775_v12  ;;  %6564 = vmatprep.mubr.bf16.mxu0 %v6029_v18  ;;  %v9383_v18 = vld [vmem:[%s11946_s5 + $0x270] sm:$0xff]  }
 0x4bc   :  { %v5930_v24 = vadd.f32 %v11468_v2, %v5862_v46  ;;  %6565 = vmatmul.mubr.bf16.vlgmr.msra.gmra.mrb[88].mxu0 %v6028_v6  ;;  %v5984_v25 = vmax.f32 %v5928_v45, 0.0  ;;  %v9380_v6 = vld [vmem:[%s11946_s5 + $0x220] sm:$0xff]  }
 0x4bd   :  { %v5931_v32 = vadd.f32 %v11472_v62, %v5863_v50  ;;  %v5072_v15 = vpop.f32.mrb[8].mxu0  ;;  %v5365_v34 = vpop.f32.mrb[8].mxu1  ;;  %8397 = vmatpush3.bf16.msra.mxu0 %v9372_v26  ;;  %v5985_v16 = vmax.f32 %v5929_v23, 0.0 }
 0x4be   :  { %v5986_v40 = vmax.f32 %v5930_v24, 0.0  ;;  %v5074_v27 = vpop.f32.mrb[9].mxu0  ;;  %v5367_v56 = vpop.f32.mrb[9].mxu1  ;;  %8398 = vmatprep.subr.bf16.mxu0 %v9373_v58 }
 0x4bf   :  { %v5987_v47 = vmax.f32 %v5931_v32, 0.0  ;;  %v5076_v9 = vpop.f32.mrb[10].mxu0  ;;  %v5369_v29 = vpop.f32.mrb[10].mxu1 }
 0x4c0   :  { %v6030_v1 = vpack.c.bf16 %v5986_v40, %v5984_v25  ;;  %v5078_v44 = vpop.f32.mrb[11].mxu0  ;;  %v5371_v3 = vpop.f32.mrb[11].mxu1 }
 0x4c1   :  { %v6031_v48 = vpack.c.bf16 %v5987_v47, %v5985_v16  ;;  %8399 = vmatpush3.bf16.msra.mxu0 %v9374_v41 }
 0x4c2   :  { %8400 = vmatprep.subr.bf16.mxu0 %v9375_v0 }
 0x4c3   :  { %6572 = vmatprep.mubr.bf16.mxu0 %v6031_v48 }
 0x4c4   :  { %6573 = vmatmul.mubr.bf16.gmra.mrb[92].mxu0 %v6030_v1 }
 0x4c5   :  { %v11660_v30 = vpop.f32.mrb[12].mxu0  ;;  %v11662_v39 = vpop.f32.mrb[12].mxu1  ;;  %8401 = vmatpush3.bf16.msra.mxu0 %v9376_v42 }
 0x4c6   :  { %v11667_v4 = vpop.f32.mrb[13].mxu0  ;;  %v11669_v22 = vpop.f32.mrb[13].mxu1  ;;  %8402 = vmatprep.subr.bf16.mxu0 %v9377_v61 }
 0x4c7   :  { %v11674_v35 = vpop.f32.mrb[14].mxu0  ;;  %v11676_v31 = vpop.f32.mrb[14].mxu1 }
 0x4c8   :  { %v11678_v55 = vpop.f32.mrb[15].mxu0  ;;  %v11680_v19 = vpop.f32.mrb[15].mxu1 }
 0x4c9   :  { %8403 = vmatpush3.bf16.msra.mxu0 %v9378_v53 }
 0x4ca   :  { %8404 = vmatprep.subr.bf16.mxu0 %v9379_v37 }
 0x4cd   :  { %v5092_v63 = vpop.f32.mrb[16].mxu0  ;;  %v5385_v20 = vpop.f32.mrb[16].mxu1  ;;  %8405 = vmatpush3.bf16.msra.mxu0 %v9380_v6 }
 0x4ce   :  { %v5776_v33 = vmax.f32 %v5072_v15, %v5092_v63  ;;  %v5778_v36 = vmax.f32 %v5365_v34, %v5385_v20  ;;  %v5094_v21 = vpop.f32.mrb[17].mxu0  ;;  %v5387_v12 = vpop.f32.mrb[17].mxu1  ;;  %8406 = vmatprep.subr.bf16.mxu0 %v9381_v52  ;;  %v9384_v34 = vld [vmem:[%s11946_s5 + $0x230] sm:$0xff]   ;;  %v9396_v52 = vld [vmem:[%s11946_s5 + $0x340] sm:$0xff]  }
 0x4cf   :  { %v5777_v26 = vmax.f32 %v5074_v27, %v5094_v21  ;;  %v5779_v45 = vmax.f32 %v5367_v56, %v5387_v12  ;;  %v5096_v46 = vpop.f32.mrb[18].mxu0  ;;  %v5389_v58 = vpop.f32.mrb[18].mxu1  ;;  %v9385_v27 = vld [vmem:[%s11946_s5 + $0x278] sm:$0xff]  }
 0x4d0   :  { %v5864_v23 = vmax.f32 %v5776_v33, %v5778_v36  ;;  %v5780_v50 = vmax.f32 %v5076_v9, %v5096_v46  ;;  %v5782_v24 = vmax.f32 %v5369_v29, %v5389_v58  ;;  %v5098_v32 = vpop.f32.mrb[19].mxu0  ;;  %v5391_v41 = vpop.f32.mrb[19].mxu1 }
 0x4d1   :  { %v5865_v25 = vmax.f32 %v5777_v26, %v5779_v45  ;;  %v5781_v40 = vmax.f32 %v5078_v44, %v5098_v32  ;;  %v5783_v15 = vmax.f32 %v5371_v3, %v5391_v41  ;;  %8407 = vmatpush3.bf16.msra.mxu0 %v9382_v13  ;;  %v9386_v3 = vld [vmem:[%s11946_s5 + $0x238] sm:$0xff]  }
 0x4d2   :  { %v5932_v0 = vadd.f32 %v11468_v2, %v5864_v23  ;;  %v5866_v16 = vmax.f32 %v5780_v50, %v5782_v24  ;;  %8408 = vmatprep.subr.bf16.mxu0 %v9383_v18 }
 0x4d3   :  { %v5933_v56 = vadd.f32 %v11472_v62, %v5865_v25  ;;  %v5867_v47 = vmax.f32 %v5781_v40, %v5783_v15  ;;  %v9390_v40 = vld [vmem:[%s11946_s5 + $0x288] sm:$0xff]  }
 0x4d4   :  { %v5934_v9 = vadd.f32 %v11468_v2, %v5866_v16  ;;  %v5988_v48 = vmax.f32 %v5932_v0, 0.0 }
 0x4d5   :  { %v5935_v29 = vadd.f32 %v11472_v62, %v5867_v47  ;;  %v5102_v1 = vpop.f32.mrb[20].mxu0  ;;  %v5395_v44 = vpop.f32.mrb[20].mxu1  ;;  %8409 = vmatpush3.bf16.msra.mxu0 %v9384_v34  ;;  %v5989_v63 = vmax.f32 %v5933_v56, 0.0 }
 0x4d6   :  { %v5990_v42 = vmax.f32 %v5934_v9, 0.0  ;;  %v5784_v61 = vmax.f32 %v11660_v30, %v5102_v1  ;;  %v5786_v53 = vmax.f32 %v11662_v39, %v5395_v44  ;;  %v5104_v37 = vpop.f32.mrb[21].mxu0  ;;  %v5397_v6 = vpop.f32.mrb[21].mxu1  ;;  %8410 = vmatprep.subr.bf16.mxu0 %v9385_v27  ;;  %v9391_v27 = vld [vmem:[%s11946_s5 + $0x2d0] sm:$0xff]  }
 0x4d7   :  { %v5991_v20 = vmax.f32 %v5935_v29, 0.0  ;;  %v5785_v13 = vmax.f32 %v11667_v4, %v5104_v37  ;;  %v5787_v33 = vmax.f32 %v11669_v22, %v5397_v6  ;;  %v5106_v36 = vpop.f32.mrb[22].mxu0  ;;  %v5399_v21 = vpop.f32.mrb[22].mxu1  ;;  %v9388_v4 = vld [vmem:[%s11946_s5 + $0x280] sm:$0xff]   ;;  %v9394_v6 = vld [vmem:[%s11946_s5 + $0x298] sm:$0xff]  }
 0x4d8   :  { %v6032_v12 = vpack.c.bf16 %v5990_v42, %v5988_v48  ;;  %v5868_v18 = vmax.f32 %v5784_v61, %v5786_v53  ;;  %v5788_v30 = vmax.f32 %v11674_v35, %v5106_v36  ;;  %v5790_v39 = vmax.f32 %v11676_v31, %v5399_v21  ;;  %v5108_v26 = vpop.f32.mrb[23].mxu0  ;;  %v5401_v45 = vpop.f32.mrb[23].mxu1  ;;  %v9389_v35 = vld [vmem:[%s11946_s5 + $0x2c8] sm:$0xff]   ;;  %v9392_v42 = vld [vmem:[%s11946_s5 + $0x290] sm:$0xff]   ;;  %v9393_v61 = vld [vmem:[%s11946_s5 + $0x2d8] sm:$0xff]  }
 0x4d9   :  { %v5869_v46 = vmax.f32 %v5785_v13, %v5787_v33  ;;  %v5789_v58 = vmax.f32 %v11678_v55, %v5108_v26  ;;  %v5791_v23 = vmax.f32 %v11680_v19, %v5401_v45  ;;  %v6033_v50 = vpack.c.bf16 %v5991_v20, %v5989_v63  ;;  %8411 = vmatpush3.bf16.msra.mxu0 %v9386_v3  ;;  %v9395_v20 = vld [vmem:[%s11946_s5 + $0x2e0] sm:$0xff]   ;;  %v9401_v26 = vld [vmem:[%s11946_s5 + $0x2a8] sm:$0xff]  }
 0x4da   :  { %v5936_v22 = vadd.f32 %v11468_v2, %v5868_v18  ;;  %v5870_v24 = vmax.f32 %v5788_v30, %v5790_v39  ;;  %8452 = vmatprep.subr.bf16.mxu0 %v9396_v52  ;;  %v9399_v18 = vld [vmem:[%s11946_s5 + $0x2e8] sm:$0xff]  }
 0x4db   :  { %v5937_v31 = vadd.f32 %v11472_v62, %v5869_v46  ;;  %v5871_v32 = vmax.f32 %v5789_v58, %v5791_v23  ;;  %6746 = vmatprep.mubr.bf16.mxu1 %v6033_v50  ;;  %v9403_v50 = vld [vmem:[%s11946_s5 + $0x2f0] sm:$0xff]  }
 0x4dc   :  { %v5938_v55 = vadd.f32 %v11468_v2, %v5870_v24  ;;  %6747 = vmatmul.mubr.bf16.vlgmr.msra.gmra.mrb[88].mxu1 %v6032_v12  ;;  %v5992_v15 = vmax.f32 %v5936_v22, 0.0  ;;  %v9397_v12 = vld [vmem:[%s11946_s5 + $0x2a0] sm:$0xff]  }
 0x4dd   :  { %v5939_v19 = vadd.f32 %v11472_v62, %v5871_v32  ;;  %v5112_v41 = vpop.f32.mrb[24].mxu0  ;;  %v5405_v25 = vpop.f32.mrb[24].mxu1  ;;  %8425 = vmatpush3.bf16.msra.mxu1 %v9388_v4  ;;  %v5993_v56 = vmax.f32 %v5937_v31, 0.0 }
 0x4de   :  { %v5994_v34 = vmax.f32 %v5938_v55, 0.0  ;;  %v5114_v0 = vpop.f32.mrb[25].mxu0  ;;  %v5407_v16 = vpop.f32.mrb[25].mxu1  ;;  %8426 = vmatprep.subr.bf16.mxu1 %v9389_v35 }
 0x4df   :  { %v5995_v47 = vmax.f32 %v5939_v19, 0.0  ;;  %v5116_v9 = vpop.f32.mrb[26].mxu0  ;;  %v5409_v29 = vpop.f32.mrb[26].mxu1 }
 0x4e0   :  { %v6034_v1 = vpack.c.bf16 %v5994_v34, %v5992_v15  ;;  %v5118_v44 = vpop.f32.mrb[27].mxu0  ;;  %v5411_v3 = vpop.f32.mrb[27].mxu1 }
 0x4e1   :  { %v6035_v48 = vpack.c.bf16 %v5995_v47, %v5993_v56  ;;  %8427 = vmatpush3.bf16.msra.mxu1 %v9390_v40 }
 0x4e2   :  { %8428 = vmatprep.subr.bf16.mxu1 %v9391_v27 }
 0x4e3   :  { %6754 = vmatprep.mubr.bf16.mxu1 %v6035_v48 }
 0x4e4   :  { %6755 = vmatmul.mubr.bf16.gmra.mrb[92].mxu1 %v6034_v1 }
 0x4e5   :  { %v11740_v53 = vpop.f32.mrb[28].mxu0  ;;  %v11742_v37 = vpop.f32.mrb[28].mxu1  ;;  %8429 = vmatpush3.bf16.msra.mxu1 %v9392_v42 }
 0x4e6   :  { %v11747_v52 = vpop.f32.mrb[29].mxu0  ;;  %v11749_v63 = vpop.f32.mrb[29].mxu1  ;;  %8430 = vmatprep.subr.bf16.mxu1 %v9393_v61 }
 0x4e7   :  { %v11754_v13 = vpop.f32.mrb[30].mxu0  ;;  %v11756_v33 = vpop.f32.mrb[30].mxu1 }
 0x4e8   :  { %v11758_v36 = vpop.f32.mrb[31].mxu0  ;;  %v11760_v21 = vpop.f32.mrb[31].mxu1 }
 0x4e9   :  { %8431 = vmatpush3.bf16.msra.mxu1 %v9394_v6 }
 0x4ea   :  { %8432 = vmatprep.subr.bf16.mxu1 %v9395_v20 }
 0x4ed   :  { %v5132_v30 = vpop.f32.mrb[32].mxu0  ;;  %v5425_v39 = vpop.f32.mrb[32].mxu1  ;;  %8433 = vmatpush3.bf16.msra.mxu1 %v9397_v12 }
 0x4ee   :  { %v5792_v45 = vmax.f32 %v5112_v41, %v5132_v30  ;;  %v5794_v46 = vmax.f32 %v5405_v25, %v5425_v39  ;;  %v5134_v58 = vpop.f32.mrb[33].mxu0  ;;  %v5427_v23 = vpop.f32.mrb[33].mxu1  ;;  %8434 = vmatprep.subr.bf16.mxu1 %v9399_v18  ;;  %v9405_v25 = vld [vmem:[%s11946_s5 + $0x2b0] sm:$0xff]  }
 0x4ef   :  { %v5793_v4 = vmax.f32 %v5114_v0, %v5134_v58  ;;  %v5795_v22 = vmax.f32 %v5407_v16, %v5427_v23  ;;  %v5136_v24 = vpop.f32.mrb[34].mxu0  ;;  %v5429_v35 = vpop.f32.mrb[34].mxu1  ;;  %v9407_v0 = vld [vmem:[%s11946_s5 + $0x2f8] sm:$0xff]  }
 0x4f0   :  { %v5872_v31 = vmax.f32 %v5792_v45, %v5794_v46  ;;  %v5796_v32 = vmax.f32 %v5116_v9, %v5136_v24  ;;  %v5798_v55 = vmax.f32 %v5409_v29, %v5429_v35  ;;  %v5138_v19 = vpop.f32.mrb[35].mxu0  ;;  %v5431_v40 = vpop.f32.mrb[35].mxu1 }
 0x4f1   :  { %v5873_v15 = vmax.f32 %v5793_v4, %v5795_v22  ;;  %v5797_v34 = vmax.f32 %v5118_v44, %v5138_v19  ;;  %v5799_v41 = vmax.f32 %v5411_v3, %v5431_v40  ;;  %8435 = vmatpush3.bf16.msra.mxu1 %v9401_v26  ;;  %v9409_v3 = vld [vmem:[%s11946_s5 + $0x2b8] sm:$0xff]  }
 0x4f2   :  { %v5940_v27 = vadd.f32 %v11468_v2, %v5872_v31  ;;  %v5874_v56 = vmax.f32 %v5796_v32, %v5798_v55  ;;  %8436 = vmatprep.subr.bf16.mxu1 %v9403_v50 }
 0x4f3   :  { %v5941_v16 = vadd.f32 %v11472_v62, %v5873_v15  ;;  %v5875_v47 = vmax.f32 %v5797_v34, %v5799_v41  ;;  %v9402_v15 = vld [vmem:[%s11946_s5 + $0x308] sm:$0xff]  }
 0x4f4   :  { %v5942_v9 = vadd.f32 %v11468_v2, %v5874_v56  ;;  %v5996_v48 = vmax.f32 %v5940_v27, 0.0  ;;  %v9404_v56 = vld [vmem:[%s11946_s5 + $0x350] sm:$0xff]  }
 0x4f5   :  { %v5943_v29 = vadd.f32 %v11472_v62, %v5875_v47  ;;  %v5142_v1 = vpop.f32.mrb[36].mxu0  ;;  %v5435_v44 = vpop.f32.mrb[36].mxu1  ;;  %8437 = vmatpush3.bf16.msra.mxu1 %v9405_v25  ;;  %v5997_v18 = vmax.f32 %v5941_v16, 0.0 }
 0x4f6   :  { %v5998_v42 = vmax.f32 %v5942_v9, 0.0  ;;  %v5800_v61 = vmax.f32 %v11740_v53, %v5142_v1  ;;  %v5802_v6 = vmax.f32 %v11742_v37, %v5435_v44  ;;  %v5144_v20 = vpop.f32.mrb[37].mxu0  ;;  %v5437_v12 = vpop.f32.mrb[37].mxu1  ;;  %8438 = vmatprep.subr.bf16.mxu1 %v9407_v0 }
 0x4f7   :  { %v5999_v30 = vmax.f32 %v5943_v29, 0.0  ;;  %v5801_v39 = vmax.f32 %v11747_v52, %v5144_v20  ;;  %v5803_v26 = vmax.f32 %v11749_v63, %v5437_v12  ;;  %v5146_v45 = vpop.f32.mrb[38].mxu0  ;;  %v5439_v46 = vpop.f32.mrb[38].mxu1  ;;  %v9398_v52 = vld [vmem:[%s11946_s5 + $0x300] sm:$0xff]   ;;  %v9410_v20 = vld [vmem:[%s11946_s5 + $0x318] sm:$0xff]  }
 0x4f8   :  { %v6036_v58 = vpack.c.bf16 %v5998_v42, %v5996_v48  ;;  %v5876_v23 = vmax.f32 %v5800_v61, %v5802_v6  ;;  %v5804_v50 = vmax.f32 %v11754_v13, %v5146_v45  ;;  %v5806_v4 = vmax.f32 %v11756_v33, %v5439_v46  ;;  %v5148_v53 = vpop.f32.mrb[39].mxu0  ;;  %v5441_v22 = vpop.f32.mrb[39].mxu1  ;;  %v9400_v13 = vld [vmem:[%s11946_s5 + $0x348] sm:$0xff]   ;;  %v9406_v48 = vld [vmem:[%s11946_s5 + $0x310] sm:$0xff]   ;;  %v9408_v42 = vld [vmem:[%s11946_s5 + $0x358] sm:$0xff]  }
 0x4f9   :  { %v5877_v37 = vmax.f32 %v5801_v39, %v5803_v26  ;;  %v5805_v24 = vmax.f32 %v11758_v36, %v5148_v53  ;;  %v5807_v35 = vmax.f32 %v11760_v21, %v5441_v22  ;;  %v6037_v31 = vpack.c.bf16 %v5999_v30, %v5997_v18  ;;  %8439 = vmatpush3.bf16.msra.mxu1 %v9409_v3  ;;  %v9411_v30 = vld [vmem:[%s11946_s5 + $0x360] sm:$0xff]   ;;  %v9414_v53 = vld [vmem:[%s11946_s5 + $0x328] sm:$0xff]  }
 0x4fa   :  { %v5944_v63 = vadd.f32 %v11468_v2, %v5876_v23  ;;  %v5878_v32 = vmax.f32 %v5804_v50, %v5806_v4  ;;  %v9413_v23 = vld [vmem:[%s11946_s5 + $0x368] sm:$0xff]  }
 0x4fb   :  { %v5945_v33 = vadd.f32 %v11472_v62, %v5877_v37  ;;  %v5879_v55 = vmax.f32 %v5805_v24, %v5807_v35  ;;  %6928 = vmatprep.mubr.bf16.mxu0 %v6037_v31  ;;  %v9415_v31 = vld [vmem:[%s11946_s5 + $0x370] sm:$0xff]  }
 0x4fc   :  { %v5946_v36 = vadd.f32 %v11468_v2, %v5878_v32  ;;  %6929 = vmatmul.mubr.bf16.vlgmr.msra.gmra.mrb[96].mxu0 %v6036_v58  ;;  %v6000_v34 = vmax.f32 %v5944_v63, 0.0  ;;  %v9412_v58 = vld [vmem:[%s11946_s5 + $0x320] sm:$0xff]  }
 0x4fd   :  { %v5947_v21 = vadd.f32 %v11472_v62, %v5879_v55  ;;  %v5152_v19 = vpop.f32.mrb[40].mxu0  ;;  %v5445_v40 = vpop.f32.mrb[40].mxu1  ;;  %8453 = vmatpush3.bf16.msra.mxu0 %v9398_v52  ;;  %v6001_v0 = vmax.f32 %v5945_v33, 0.0 }
 0x4fe   :  { %v6002_v41 = vmax.f32 %v5946_v36, 0.0  ;;  %v5154_v25 = vpop.f32.mrb[41].mxu0  ;;  %v5447_v27 = vpop.f32.mrb[41].mxu1  ;;  %8454 = vmatprep.subr.bf16.mxu0 %v9400_v13 }
 0x4ff   :  { %v6003_v16 = vmax.f32 %v5947_v21, 0.0  ;;  %v5156_v47 = vpop.f32.mrb[42].mxu0  ;;  %v5449_v9 = vpop.f32.mrb[42].mxu1 }
 0x500   :  { %v6038_v29 = vpack.c.bf16 %v6002_v41, %v6000_v34  ;;  %v5158_v1 = vpop.f32.mrb[43].mxu0  ;;  %v5451_v44 = vpop.f32.mrb[43].mxu1 }
 0x501   :  { %v6039_v3 = vpack.c.bf16 %v6003_v16, %v6001_v0  ;;  %8455 = vmatpush3.bf16.msra.mxu0 %v9402_v15 }
 0x502   :  { %8456 = vmatprep.subr.bf16.mxu0 %v9404_v56 }
 0x503   :  { %6936 = vmatprep.mubr.bf16.mxu0 %v6039_v3 }
 0x504   :  { %6937 = vmatmul.mubr.bf16.gmra.mrb[100].mxu0 %v6038_v29 }
 0x505   :  { %v11817_v61 = vpop.f32.mrb[44].mxu0  ;;  %v11819_v6 = vpop.f32.mrb[44].mxu1  ;;  %8457 = vmatpush3.bf16.msra.mxu0 %v9406_v48 }
 0x506   :  { %v11824_v12 = vpop.f32.mrb[45].mxu0  ;;  %v11826_v18 = vpop.f32.mrb[45].mxu1  ;;  %8458 = vmatprep.subr.bf16.mxu0 %v9408_v42 }
 0x507   :  { %v11831_v39 = vpop.f32.mrb[46].mxu0  ;;  %v11833_v26 = vpop.f32.mrb[46].mxu1 }
 0x508   :  { %v11835_v45 = vpop.f32.mrb[47].mxu0  ;;  %v11837_v46 = vpop.f32.mrb[47].mxu1 }
 0x509   :  { %8459 = vmatpush3.bf16.msra.mxu0 %v9410_v20 }
 0x50a   :  { %8460 = vmatprep.subr.bf16.mxu0 %v9411_v30 }
 0x50d   :  { %v5172_v50 = vpop.f32.mrb[48].mxu0  ;;  %v5465_v4 = vpop.f32.mrb[48].mxu1  ;;  %8461 = vmatpush3.bf16.msra.mxu0 %v9412_v58 }
 0x50e   :  { %v5808_v22 = vmax.f32 %v5152_v19, %v5172_v50  ;;  %v5810_v37 = vmax.f32 %v5445_v40, %v5465_v4  ;;  %v5174_v24 = vpop.f32.mrb[49].mxu0  ;;  %v5467_v35 = vpop.f32.mrb[49].mxu1  ;;  %8462 = vmatprep.subr.bf16.mxu0 %v9413_v23  ;;  %v9416_v40 = vld [vmem:[%s11946_s5 + $0x330] sm:$0xff]  }
 0x50f   :  { %v5809_v52 = vmax.f32 %v5154_v25, %v5174_v24  ;;  %v5811_v63 = vmax.f32 %v5447_v27, %v5467_v35  ;;  %v5176_v32 = vpop.f32.mrb[50].mxu0  ;;  %v5469_v13 = vpop.f32.mrb[50].mxu1  ;;  %v9417_v25 = vld [vmem:[%s11946_s5 + $0x378] sm:$0xff]  }
 0x510   :  { %v5880_v33 = vmax.f32 %v5808_v22, %v5810_v37  ;;  %v5812_v55 = vmax.f32 %v5156_v47, %v5176_v32  ;;  %v5814_v36 = vmax.f32 %v5449_v9, %v5469_v13  ;;  %v5178_v21 = vpop.f32.mrb[51].mxu0  ;;  %v5471_v15 = vpop.f32.mrb[51].mxu1 }
 0x511   :  { %v5881_v34 = vmax.f32 %v5809_v52, %v5811_v63  ;;  %v5813_v41 = vmax.f32 %v5158_v1, %v5178_v21  ;;  %v5815_v19 = vmax.f32 %v5451_v44, %v5471_v15  ;;  %8463 = vmatpush3.bf16.msra.mxu0 %v9414_v53  ;;  %v9418_v44 = vld [vmem:[%s11946_s5 + $0x338] sm:$0xff]  }
 0x512   :  { %v5948_v56 = vadd.f32 %v11468_v2, %v5880_v33  ;;  %v5882_v0 = vmax.f32 %v5812_v55, %v5814_v36  ;;  %8464 = vmatprep.subr.bf16.mxu0 %v9415_v31 }
 0x513   :  { %v5949_v27 = vadd.f32 %v11472_v62, %v5881_v34  ;;  %v5883_v16 = vmax.f32 %v5813_v41, %v5815_v19 }
 0x514   :  { %v5950_v47 = vadd.f32 %v11468_v2, %v5882_v0  ;;  %v6004_v3 = vmax.f32 %v5948_v56, 0.0 }
 0x515   :  { %v5951_v9 = vadd.f32 %v11472_v62, %v5883_v16  ;;  %v5182_v29 = vpop.f32.mrb[52].mxu0  ;;  %v5475_v1 = vpop.f32.mrb[52].mxu1  ;;  %8465 = vmatpush3.bf16.msra.mxu0 %v9416_v40  ;;  %v6005_v23 = vmax.f32 %v5949_v27, 0.0 }
 0x516   :  { %v6006_v48 = vmax.f32 %v5950_v47, 0.0  ;;  %v5816_v42 = vmax.f32 %v11817_v61, %v5182_v29  ;;  %v5818_v20 = vmax.f32 %v11819_v6, %v5475_v1  ;;  %v5184_v30 = vpop.f32.mrb[53].mxu0  ;;  %v5477_v58 = vpop.f32.mrb[53].mxu1  ;;  %8466 = vmatprep.subr.bf16.mxu0 %v9417_v25 }
 0x517   :  { %v6007_v50 = vmax.f32 %v5951_v9, 0.0  ;;  %v5817_v4 = vmax.f32 %v11824_v12, %v5184_v30  ;;  %v5819_v53 = vmax.f32 %v11826_v18, %v5477_v58  ;;  %v5186_v22 = vpop.f32.mrb[54].mxu0  ;;  %v5479_v37 = vpop.f32.mrb[54].mxu1 }
 0x518   :  { %v6040_v24 = vpack.c.bf16 %v6006_v48, %v6004_v3  ;;  %v5884_v35 = vmax.f32 %v5816_v42, %v5818_v20  ;;  %v5820_v31 = vmax.f32 %v11831_v39, %v5186_v22  ;;  %v5822_v52 = vmax.f32 %v11833_v26, %v5479_v37  ;;  %v5188_v61 = vpop.f32.mrb[55].mxu0  ;;  %v5481_v63 = vpop.f32.mrb[55].mxu1 }
 0x519   :  { %v5885_v6 = vmax.f32 %v5817_v4, %v5819_v53  ;;  %v5821_v32 = vmax.f32 %v11835_v45, %v5188_v61  ;;  %v5823_v13 = vmax.f32 %v11837_v46, %v5481_v63  ;;  %v6041_v33 = vpack.c.bf16 %v6007_v50, %v6005_v23  ;;  %8467 = vmatpush3.bf16.msra.mxu0 %v9418_v44 }
 0x51a   :  { %v5952_v12 = vadd.f32 %v11468_v2, %v5884_v35  ;;  %v5886_v18 = vmax.f32 %v5820_v31, %v5822_v52 }
 0x51b   :  { %v5953_v55 = vadd.f32 %v11472_v62, %v5885_v6  ;;  %v5887_v36 = vmax.f32 %v5821_v32, %v5823_v13  ;;  %7110 = vmatprep.mubr.bf16.mxu1 %v6041_v33 }
 0x51c   :  { %v5954_v39 = vadd.f32 %v11468_v2, %v5886_v18  ;;  %7111 = vmatmul.mubr.bf16.vlgmr.msra.gmra.mrb[96].mxu1 %v6040_v24  ;;  %v6008_v34 = vmax.f32 %v5952_v12, 0.0 }
 0x51d   :  { %v5955_v26 = vadd.f32 %v11472_v62, %v5887_v36  ;;  %v5192_v21 = vpop.f32.mrb[56].mxu0  ;;  %v5485_v15 = vpop.f32.mrb[56].mxu1  ;;  %v6009_v56 = vmax.f32 %v5953_v55, 0.0 }
 0x51e   :  { %v6010_v45 = vmax.f32 %v5954_v39, 0.0  ;;  %v5824_v46 = vmax.f32 %v5192_v21, %v11429_v10  ;;  %v5826_v41 = vmax.f32 %v5485_v15, %v11431_v49  ;;  %v5194_v19 = vpop.f32.mrb[57].mxu0  ;;  %v5487_v40 = vpop.f32.mrb[57].mxu1 }
 0x51f   :  { %v6011_v0 = vmax.f32 %v5955_v26, 0.0  ;;  %v5825_v25 = vmax.f32 %v5194_v19, %v11433_v14  ;;  %v5827_v27 = vmax.f32 %v5487_v40, %v11435_v60  ;;  %v5196_v16 = vpop.f32.mrb[58].mxu0  ;;  %v5489_v47 = vpop.f32.mrb[58].mxu1 }
 0x520   :  { %v6042_v9 = vpack.c.bf16 %v6010_v45, %v6008_v34  ;;  %v5888_v29 = vmax.f32 %v5824_v46, %v5826_v41  ;;  %v5828_v1 = vmax.f32 %v5196_v16, %v11437_v7  ;;  %v5830_v44 = vmax.f32 %v5489_v47, %v11439_v54  ;;  %v5198_v3 = vpop.f32.mrb[59].mxu0  ;;  %v5491_v10 = vpop.f32.mrb[59].mxu1 }
 0x521   :  { %v5889_v48 = vmax.f32 %v5825_v25, %v5827_v27  ;;  %v5829_v49 = vmax.f32 %v5198_v3, %v11441_v57  ;;  %v5831_v42 = vmax.f32 %v5491_v10, %v11443_v43  ;;  %v6043_v20 = vpack.c.bf16 %v6011_v0, %v6009_v56 }
 0x522   :  { %v5956_v14 = vadd.f32 %v11468_v2, %v5888_v29  ;;  %v5890_v30 = vmax.f32 %v5828_v1, %v5830_v44 }
 0x523   :  { %v5957_v60 = vadd.f32 %v11472_v62, %v5889_v48  ;;  %v5891_v58 = vmax.f32 %v5829_v49, %v5831_v42  ;;  %7118 = vmatprep.mubr.bf16.mxu1 %v6043_v20  ;;  %v9419_v42 = vld [vmem:[%s11948_s7] sm:$0xff]  }
 0x524   :  { %v5958_v23 = vadd.f32 %v11468_v2, %v5890_v30  ;;  %7119 = vmatmul.mubr.bf16.gmra.mrb[100].mxu1 %v6042_v9  ;;  %v6012_v4 = vmax.f32 %v5956_v14, 0.0  ;;  %8490 = vmatprep.subr.bf16.mxu1 %v9419_v42 }
 0x525   :  { %v5959_v7 = vadd.f32 %v11472_v62, %v5891_v58  ;;  %v5202_v54 = vpop.f32.mrb[60].mxu0  ;;  %v5495_v50 = vpop.f32.mrb[60].mxu1  ;;  %v6013_v24 = vmax.f32 %v5957_v60, 0.0  ;;  %8491 = vmatpush3.bf16.msra.mxu1 %v9419_v42  ;;  %v9420_v58 = vld [vmem:[%s11948_s7 + $0x8] sm:$0xff]  }
 0x526   :  { %v6014_v53 = vmax.f32 %v5958_v23, 0.0  ;;  %v5832_v57 = vmax.f32 %v5202_v54, %v11447_v11  ;;  %v5834_v43 = vmax.f32 %v5495_v50, %v11449_v38  ;;  %v5204_v22 = vpop.f32.mrb[61].mxu0  ;;  %v5497_v37 = vpop.f32.mrb[61].mxu1  ;;  %8492 = vmatprep.subr.bf16.mxu1 %v9420_v58 }
 0x527   :  { %v6015_v35 = vmax.f32 %v5959_v7, 0.0  ;;  %v5833_v31 = vmax.f32 %v5204_v22, %v11451_v8  ;;  %v5835_v52 = vmax.f32 %v5497_v37, %v11453_v51  ;;  %v5206_v61 = vpop.f32.mrb[62].mxu0  ;;  %v5499_v63 = vpop.f32.mrb[62].mxu1  ;;  %v9425_v22 = vld [vmem:[%s11948_s7 + $0x30] sm:$0xff]  }
 0x528   :  { %v6044_v6 = vpack.c.bf16 %v6014_v53, %v6012_v4  ;;  %v5892_v32 = vmax.f32 %v5832_v57, %v5834_v43  ;;  %v5836_v13 = vmax.f32 %v5206_v61, %v11455_v28  ;;  %v5838_v33 = vmax.f32 %v5499_v63, %v11457_v59  ;;  %v5208_v12 = vpop.f32.mrb[63].mxu0  ;;  %v5501_v11 = vpop.f32.mrb[63].mxu1  ;;  %v9421_v4 = vld [vmem:[%s11948_s7 + $0x10] sm:$0xff]   ;;  %v9422_v53 = vld [vmem:[%s11948_s7 + $0x18] sm:$0xff]   ;;  %v9423_v57 = vld [vmem:[%s11948_s7 + $0x20] sm:$0xff]  }
 0x529   :  { %v5893_v18 = vmax.f32 %v5833_v31, %v5835_v52  ;;  %v5837_v38 = vmax.f32 %v5208_v12, %v11459_v17  ;;  %v5839_v55 = vmax.f32 %v5501_v11, %v11461_v5  ;;  %v6045_v36 = vpack.c.bf16 %v6015_v35, %v6013_v24  ;;  %8493 = vmatpush3.bf16.msra.mxu1 %v9420_v58  ;;  %v9424_v43 = vld [vmem:[%s11948_s7 + $0x28] sm:$0xff]   ;;  %v9426_v52 = vld [vmem:[%s11948_s7 + $0x38] sm:$0xff]  }
 0x52a   :  { %v5960_v8 = vadd.f32 %v11468_v2, %v5892_v32  ;;  %v5894_v39 = vmax.f32 %v5836_v13, %v5838_v33  ;;  %8494 = vmatprep.subr.bf16.mxu1 %v9421_v4 }
 0x52b   :  { %v5961_v51 = vadd.f32 %v11472_v62, %v5893_v18  ;;  %v5895_v26 = vmax.f32 %v5837_v38, %v5839_v55  ;;  %7292 = vmatprep.mubr.bf16.mxu0 %v6045_v36 }
 0x52c   :  { %v5962_v21 = vadd.f32 %v11468_v2, %v5894_v39  ;;  %7293 = vmatmul.mubr.bf16.vlgmr.msra.gmra.mrb[104].mxu0 %v6044_v6  ;;  %v6016_v59 = vmax.f32 %v5960_v8, 0.0 }
 0x52d   :  { %v5963_v28 = vadd.f32 %v11472_v62, %v5895_v26  ;;  %v6017_v34 = vmax.f32 %v5961_v51, 0.0  ;;  %8495 = vmatpush3.bf16.msra.mxu1 %v9421_v4 }
 0x52e   :  { %v6018_v15 = vmax.f32 %v5962_v21, 0.0  ;;  %8496 = vmatprep.subr.bf16.mxu1 %v9422_v53 }
 0x52f   :  { %v6019_v45 = vmax.f32 %v5963_v28, 0.0 }
 0x530   :  { %v6046_v17 = vpack.c.bf16 %v6018_v15, %v6016_v59 }
 0x531   :  { %v6047_v46 = vpack.c.bf16 %v6019_v45, %v6017_v34  ;;  %8497 = vmatpush3.bf16.msra.mxu1 %v9422_v53 }
 0x532   :  { %8498 = vmatprep.subr.bf16.mxu1 %v9423_v57 }
 0x533   :  { %7300 = vmatprep.mubr.bf16.mxu0 %v6047_v46 }
 0x534   :  { %7301 = vmatmul.mubr.bf16.gmra.mrb[108].mxu0 %v6046_v17 }
 0x535   :  { %8499 = vmatpush3.bf16.msra.mxu1 %v9423_v57 }
 0x536   :  { %8500 = vmatprep.subr.bf16.mxu1 %v9424_v43 }
 0x539   :  { %8501 = vmatpush3.bf16.msra.mxu1 %v9424_v43 }
 0x53a   :  { %8502 = vmatprep.subr.bf16.mxu1 %v9425_v22 }
 0x53d   :  { %8503 = vmatpush3.bf16.msra.mxu1 %v9425_v22 }
 0x53e   :  { %8504 = vmatprep.subr.bf16.mxu1 %v9426_v52 }
 0x541   :  { %8505 = vmatpush3.bf16.msra.mxu1 %v9426_v52 }
 0x54f   :  { %v8328_v5 = vpop.f32.mrb[80].mxu1 }
 0x550   :  { %v8329_v41 = vpop.f32.mrb[81].mxu1 }
 0x551   :  { %v8330_v19 = vadd.f32 %v8329_v41, %v8328_v5  ;;  %v8331_v40 = vpop.f32.mrb[82].mxu1 }
 0x552   :  { %v8332_v56 = vpop.f32.mrb[83].mxu1 }
 0x553   :  { %v8333_v0 = vadd.f32 %v8332_v56, %v8331_v40 }
 0x557   :  { %v8334_v25 = vpop.f32.mrb[84].mxu1 }
 0x558   :  { %v8335_v27 = vpop.f32.mrb[85].mxu1 }
 0x559   :  { %v8336_v2 = vadd.f32 %v8335_v27, %v8334_v25  ;;  %v8337_v16 = vpop.f32.mrb[86].mxu1 }
 0x55a   :  { %v8338_v47 = vpop.f32.mrb[87].mxu1 }
 0x55b   :  { %v8339_v62 = vadd.f32 %v8338_v47, %v8337_v16 }
 0x56f   :  { %v8300_v9 = vpop.f32.mrb[80].mxu0 }
 0x570   :  { %v8301_v29 = vpop.f32.mrb[81].mxu0 }
 0x571   :  { %v8302_v1 = vadd.f32 %v8301_v29, %v8300_v9  ;;  %v8303_v44 = vpop.f32.mrb[82].mxu0 }
 0x572   :  { %v8304_v3 = vpop.f32.mrb[83].mxu0 }
 0x573   :  { %v6389_v10 = vadd.f32 %v8330_v19, %v8302_v1  ;;  %v8305_v48 = vadd.f32 %v8304_v3, %v8303_v44 }
 0x575   :  { %v6392_v49 = vadd.f32 %v8333_v0, %v8305_v48 }
 0x577   :  { %v8306_v20 = vpop.f32.mrb[84].mxu0 }
 0x578   :  { %v8307_v14 = vpop.f32.mrb[85].mxu0 }
 0x579   :  { %v8308_v30 = vadd.f32 %v8307_v14, %v8306_v20  ;;  %v8309_v60 = vpop.f32.mrb[86].mxu0 }
 0x57a   :  { %v8310_v23 = vpop.f32.mrb[87].mxu0 }
 0x57b   :  { %v6397_v7 = vadd.f32 %v8336_v2, %v8308_v30  ;;  %v8311_v54 = vadd.f32 %v8310_v23, %v8309_v60 }
 0x57d   :  { %v6400_v50 = vadd.f32 %v8339_v62, %v8311_v54 }
 0x58f   :  { %v8356_v37 = vpop.f32.mrb[88].mxu0 }
 0x590   :  { %v8357_v24 = vpop.f32.mrb[89].mxu0 }
 0x591   :  { %v8358_v35 = vadd.f32 %v8357_v24, %v8356_v37  ;;  %v8359_v31 = vpop.f32.mrb[90].mxu0 }
 0x592   :  { %v8360_v61 = vpop.f32.mrb[91].mxu0 }
 0x593   :  { %v6581_v63 = vadd.f32 %v8358_v35, %v6389_v10  ;;  %v8361_v6 = vadd.f32 %v8360_v61, %v8359_v31  ;;  %v8274_v61 = vld [vmem:[%s11949_s6] ss:$0 sm:$0xff] }
 0x595   :  { %v6582_v32 = vadd.f32 %v8361_v6, %v6392_v49 }
 0x597   :  { %v8362_v13 = vpop.f32.mrb[92].mxu0 }
 0x598   :  { %v8363_v33 = vpop.f32.mrb[93].mxu0 }
 0x599   :  { %v8364_v12 = vadd.f32 %v8363_v33, %v8362_v13  ;;  %v8365_v11 = vpop.f32.mrb[94].mxu0 }
 0x59a   :  { %v8366_v18 = vpop.f32.mrb[95].mxu0 }
 0x59b   :  { %v6583_v38 = vadd.f32 %v8364_v12, %v6397_v7  ;;  %v8367_v55 = vadd.f32 %v8366_v18, %v8365_v11 }
 0x59d   :  { %v6584_v36 = vadd.f32 %v8367_v55, %v6400_v50 }
 0x5af   :  { %v8384_v8 = vpop.f32.mrb[88].mxu1 }
 0x5b0   :  { %v8385_v39 = vpop.f32.mrb[89].mxu1 }
 0x5b1   :  { %v8386_v51 = vadd.f32 %v8385_v39, %v8384_v8  ;;  %v8387_v26 = vpop.f32.mrb[90].mxu1 }
 0x5b2   :  { %v8388_v21 = vpop.f32.mrb[91].mxu1 }
 0x5b3   :  { %v6763_v28 = vadd.f32 %v8386_v51, %v6581_v63  ;;  %v8389_v59 = vadd.f32 %v8388_v21, %v8387_v26 }
 0x5b5   :  { %v6764_v15 = vadd.f32 %v8389_v59, %v6582_v32 }
 0x5b7   :  { %v8390_v34 = vpop.f32.mrb[92].mxu1 }
 0x5b8   :  { %v8391_v45 = vpop.f32.mrb[93].mxu1 }
 0x5b9   :  { %v8392_v17 = vadd.f32 %v8391_v45, %v8390_v34  ;;  %v8393_v46 = vpop.f32.mrb[94].mxu1 }
 0x5ba   :  { %v8394_v5 = vpop.f32.mrb[95].mxu1 }
 0x5bb   :  { %v6765_v41 = vadd.f32 %v8392_v17, %v6583_v38  ;;  %v8395_v19 = vadd.f32 %v8394_v5, %v8393_v46  ;;  %v8275_v46 = vld [vmem:[%s11950_s8] ss:$0 sm:$0xff] }
 0x5bd   :  { %v6766_v40 = vadd.f32 %v8395_v19, %v6584_v36 }
 0x5cf   :  { %v8412_v56 = vpop.f32.mrb[96].mxu0 }
 0x5d0   :  { %v8413_v0 = vpop.f32.mrb[97].mxu0 }
 0x5d1   :  { %v8414_v25 = vadd.f32 %v8413_v0, %v8412_v56  ;;  %v8415_v27 = vpop.f32.mrb[98].mxu0 }
 0x5d2   :  { %v8416_v2 = vpop.f32.mrb[99].mxu0 }
 0x5d3   :  { %v6945_v16 = vadd.f32 %v8414_v25, %v6763_v28  ;;  %v8417_v47 = vadd.f32 %v8416_v2, %v8415_v27 }
 0x5d5   :  { %v6946_v62 = vadd.f32 %v8417_v47, %v6764_v15 }
 0x5d7   :  { %v8418_v9 = vpop.f32.mrb[100].mxu0 }
 0x5d8   :  { %v8419_v29 = vpop.f32.mrb[101].mxu0 }
 0x5d9   :  { %v8420_v1 = vadd.f32 %v8419_v29, %v8418_v9  ;;  %v8421_v44 = vpop.f32.mrb[102].mxu0 }
 0x5da   :  { %v8422_v3 = vpop.f32.mrb[103].mxu0 }
 0x5db   :  { %v6947_v10 = vadd.f32 %v8420_v1, %v6765_v41  ;;  %v8423_v48 = vadd.f32 %v8422_v3, %v8421_v44 }
 0x5dd   :  { %v6948_v49 = vadd.f32 %v8423_v48, %v6766_v40 }
 0x5ef   :  { %v8440_v42 = vpop.f32.mrb[96].mxu1 }
 0x5f0   :  { %v8441_v20 = vpop.f32.mrb[97].mxu1 }
 0x5f1   :  { %v8442_v14 = vadd.f32 %v8441_v20, %v8440_v42  ;;  %v8443_v30 = vpop.f32.mrb[98].mxu1 }
 0x5f2   :  { %v8444_v60 = vpop.f32.mrb[99].mxu1 }
 0x5f3   :  { %v7127_v58 = vadd.f32 %v8442_v14, %v6945_v16  ;;  %v8445_v23 = vadd.f32 %v8444_v60, %v8443_v30 }
 0x5f5   :  { %v7128_v7 = vadd.f32 %v8445_v23, %v6946_v62 }
 0x5f7   :  { %v8446_v54 = vpop.f32.mrb[100].mxu1 }
 0x5f8   :  { %v8447_v50 = vpop.f32.mrb[101].mxu1 }
 0x5f9   :  { %v8448_v4 = vadd.f32 %v8447_v50, %v8446_v54  ;;  %v8449_v53 = vpop.f32.mrb[102].mxu1 }
 0x5fa   :  { %v8450_v57 = vpop.f32.mrb[103].mxu1 }
 0x5fb   :  { %v7129_v43 = vadd.f32 %v8448_v4, %v6947_v10  ;;  %v8451_v22 = vadd.f32 %v8450_v57, %v8449_v53 }
 0x5fd   :  { %v7130_v37 = vadd.f32 %v8451_v22, %v6948_v49 }
 0x5ff   :  { %v8468_v24 = vpop.f32.mrb[104].mxu0 }
 0x600   :  { %v8469_v35 = vpop.f32.mrb[105].mxu0 }
 0x601   :  { %v8470_v31 = vadd.f32 %v8469_v35, %v8468_v24  ;;  %v8471_v52 = vpop.f32.mrb[106].mxu0 }
 0x602   :  { %v8472_v63 = vpop.f32.mrb[107].mxu0 }
 0x603   :  { %v7309_v6 = vadd.f32 %v8470_v31, %v7127_v58  ;;  %v8473_v32 = vadd.f32 %v8472_v63, %v8471_v52 }
 0x605   :  { %v7320_v13 = vadd.f32 %v8274_v61, %v7309_v6  ;;  %v7310_v33 = vadd.f32 %v8473_v32, %v7128_v7 }
 0x607   :  { %v7321_v12 = vadd.f32 %v8274_v61, %v7310_v33  ;;  %v8474_v11 = vpop.f32.mrb[108].mxu0  ;;  %v7324_v38 = vmax.f32 %v7320_v13, 0.0 }
 0x608   :  { %v8475_v18 = vpop.f32.mrb[109].mxu0 }
 0x609   :  { %v7325_v55 = vmax.f32 %v7321_v12, 0.0  ;;  %v8476_v36 = vadd.f32 %v8475_v18, %v8474_v11  ;;  %v8477_v8 = vpop.f32.mrb[110].mxu0 }
 0x60a   :  { %v8478_v39 = vpop.f32.mrb[111].mxu0 }
 0x60b   :  { %v7311_v51 = vadd.f32 %v8476_v36, %v7129_v43  ;;  %v8479_v26 = vadd.f32 %v8478_v39, %v8477_v8  ;;  %v7328_v21 = vpack.c.bf16 %v7325_v55, %v7324_v38 }
 0x60d   :  { %v7322_v28 = vadd.f32 %v8274_v61, %v7311_v51  ;;  %v7312_v59 = vadd.f32 %v8479_v26, %v7130_v37  ;;  %8506 = vmatprep.mubr.bf16.mxu1 %v7328_v21 }
 0x60f   :  { %v7323_v15 = vadd.f32 %v8274_v61, %v7312_v59  ;;  %v7326_v34 = vmax.f32 %v7322_v28, 0.0 }
 0x611   :  { %v7327_v45 = vmax.f32 %v7323_v15, 0.0 }
 0x613   :  { %v7329_v17 = vpack.c.bf16 %v7327_v45, %v7326_v34 }
 0x615   :  { %8507 = vmatmul.mubr.bf16.vlgmr.msra.gmra.mrb[104].mxu1 %v7329_v17 }
 0x6e8   :  { %v8508_v5 = vpop.f32.mrb[104].mxu1 }
 0x6e9   :  { %v7444_v41 = vadd.f32 %v8508_v5, %v8275_v46  ;;  %v7435_v19 = vpop.f32.mrb[105].mxu1 }
 0x6ea   :  { %v7436_v40 = vadd.f32 %v8275_v46, %v7435_v19  ;;  %v8509_v56 = vpop.f32.mrb[106].mxu1 }
 0x6eb   :  { %7452 = vst [vmem:[%s11951_s9 + $0x10] sm:$0xff] %v7444_v41  ;;  %v7447_v0 = vadd.f32 %v8509_v56, %v8275_v46  ;;  %v7438_v25 = vpop.f32.mrb[107].mxu1 }
 0x6ec   :  { %7450 = vst [vmem:[%s11951_s9] sm:$0xff] %v7436_v40  ;;  %v7439_v27 = vadd.f32 %v8275_v46, %v7438_v25 }
 0x6ed   :  { %7453 = vst [vmem:[%s11951_s9 + $0x18] sm:$0xff] %v7447_v0 }
 0x6ee   :  { %7451 = vst [vmem:[%s11951_s9 + $0x8] sm:$0xff] %v7439_v27 }

</bundles_post_ra>
